<compile_context>
chip_gen: v6e
topology: v6e:2x2x1
jax: 0.10.0
libtpu: 0.0.40
codegen_flags: <defaults>
</compile_context>

<pallas_src>
import functools
import math

import jax
import jax.numpy as jnp
from jax.experimental import pallas as pl
from jax.experimental.pallas import tpu as pltpu


# -----------------------------------------------------------------------------
# Kernel 1: entry block = Conv1d(Cin, 64, k=7, p=3) fused with MaxPool1d(3,1,1)
# -----------------------------------------------------------------------------
def _entry_kernel(x_ref, w_ref, b_ref, o_ref, xpad, accp,
                  *, N, L, Cin, K, Cout, pad):
    Lp = L + 2 * pad          # zero-padded conv input rows per sample
    Le = L + 2                # conv rows per sample plus two -inf maxpool pads

    # In-kernel zero padding (row writes only, lane offset 0). No ReLU before
    # the entry conv in the reference model.
    zrows = jnp.zeros((pad, Cin), jnp.float32)
    for n in range(N):
        r0 = n * Lp
        xpad[r0:r0 + pad, :] = zrows
        xpad[r0 + pad:r0 + pad + L, :] = x_ref[n * L:(n + 1) * L, :]
        xpad[r0 + pad + L:r0 + Lp, :] = zrows

    # Conv as a sum of K tap matmuls over the whole padded batch slab:
    #   Z[r] = sum_t xpad[r + t] @ w[t]
    # Valid conv rows for sample n are Z[n*Lp : n*Lp + L]; the interleaved pad
    # rows of Z are garbage and simply discarded below.
    R = N * Lp - (K - 1)
    acc = jnp.zeros((R, Cout), jnp.float32)
    for t in range(K):
        acc = acc + jnp.dot(xpad[t:t + R, :], w_ref[t],
                            preferred_element_type=jnp.float32)
    acc = acc + b_ref[...]

    # Fused MaxPool1d(k=3, s=1, p=1): stage valid conv rows between -inf pad
    # rows and take the max of three shifted row windows (max with -inf ==
    # PyTorch maxpool padding semantics).
    accp[...] = jnp.full((N * Le, Cout), -jnp.inf, jnp.float32)
    for n in range(N):
        accp[n * Le + 1:n * Le + 1 + L, :] = acc[n * Lp:n * Lp + L, :]
    for n in range(N):
        b0 = n * Le
        m = jnp.maximum(accp[b0:b0 + L, :], accp[b0 + 1:b0 + 1 + L, :])
        m = jnp.maximum(m, accp[b0 + 2:b0 + 2 + L, :])
        o_ref[n * L:(n + 1) * L, :] = m.astype(o_ref.dtype)


def entry_pallas(x2, w, b, *, N, L):
    """x2: (N*L, Cin); w: (K, Cin, Cout); b: (Cout,) -> (N*L, Cout)."""
    Cin = x2.shape[1]
    K, _, Cout = w.shape
    pad = (K - 1) // 2
    Lp = L + 2 * pad
    b2 = b.reshape(1, Cout)
    kernel = functools.partial(_entry_kernel, N=N, L=L, Cin=Cin, K=K,
                               Cout=Cout, pad=pad)
    return pl.pallas_call(
        kernel,
        out_shape=jax.ShapeDtypeStruct((N * L, Cout), jnp.float32),
        grid=(1,),
        in_specs=[
            pl.BlockSpec((N * L, Cin), lambda i: (0, 0)),
            pl.BlockSpec((K, Cin, Cout), lambda i: (0, 0, 0)),
            pl.BlockSpec((1, Cout), lambda i: (0, 0)),
        ],
        out_specs=pl.BlockSpec((N * L, Cout), lambda i: (0, 0)),
        scratch_shapes=[
            pltpu.VMEM((N * Lp, Cin), jnp.float32),        # zero-padded input
            pltpu.VMEM((N * (L + 2), Cout), jnp.float32),  # conv rows + -inf pads
        ],
        compiler_params=pltpu.CompilerParams(dimension_semantics=("arbitrary",)),
    )(x2, w, b2)


# -----------------------------------------------------------------------------
# Kernel 2: one whole DDx stack (dense blocks) + its transition block, fused.
# -----------------------------------------------------------------------------
# TODO(synk): the PyTorch `block` is an injected constructor arg (not defined in
# the spec); it is implemented here as a DenseNet-style block:
# concat(x, Conv1d(32, k=3, dilation, 'same'/causal padding)(ReLU(x))), which
# matches the `in_channels += 32` bookkeeping in make_stack.
def _stack_kernel(*refs, N, L, C0, nb, dilations, causal_flags):
    x_ref = refs[0]
    w_refs = [refs[1 + 2 * i] for i in range(nb)]
    b_refs = [refs[2 + 2 * i] for i in range(nb)]
    tw_ref = refs[1 + 2 * nb]
    tb_ref = refs[2 + 2 * nb]
    o_ref = refs[3 + 2 * nb]
    ppad = refs[4 + 2 * nb]   # (N*Lp_max, C0): ReLU'd + zero-padded piece slab
    pbuf = refs[5 + 2 * nb]   # (nb*N*L, 32): per-block outputs (stay in VMEM)

    for i in range(nb):
        d = int(dilations[i])
        if causal_flags[i]:
            pad_l, pad_r = 2 * d, 0
        else:
            pad_l, pad_r = d, d
        Lp = L + 2 * d
        R = N * Lp - 2 * d

        # Weights for this block, one (Ci, 32) value per tap.
        w_taps = [w_refs[i][t] for t in range(3)]

        # conv(concat(pieces)) == sum over pieces of conv(piece) with the
        # matching row-chunk of the weight: no channel concat is materialised.
        h = jnp.zeros((R, 32), jnp.float32)
        for j in range(i + 1):
            cj = C0 if j == 0 else 32
            off = 0 if j == 0 else C0 + 32 * (j - 1)

            # ReLU applied exactly once per block; zero padding built in VMEM
            # (row writes, lane offset 0 only).
            for n in range(N):
                r0 = n * Lp
                if pad_l:
                    ppad[r0:r0 + pad_l, 0:cj] = jnp.zeros((pad_l, cj),
                                                          jnp.float32)
                if pad_r:
                    ppad[r0 + pad_l + L:r0 + Lp, 0:cj] = jnp.zeros((pad_r, cj),
                                                                   jnp.float32)
                if j == 0:
                    src = x_ref[n * L:(n + 1) * L, :]
                else:
                    s0 = (j - 1) * N * L + n * L
                    src = pbuf[s0:s0 + L, :]
                ppad[r0 + pad_l:r0 + pad_l + L, 0:cj] = jnp.maximum(src, 0.0)

            # Tap-sum conv: valid output rows for sample n are n*Lp .. n*Lp+L-1.
            for t in range(3):
                wc = w_taps[t][off:off + cj, :]
                h = h + jnp.dot(ppad[t * d:t * d + R, 0:cj], wc,
                                preferred_element_type=jnp.float32)
        h = h + b_refs[i][...]

        # Store this block's valid rows (sample-major) as piece i.
        for n in range(N):
            o0 = i * N * L + n * L
            pbuf[o0:o0 + L, :] = h[n * Lp:n * Lp + L, :]

    # Transition: ReLU -> Conv1d(k=1) -> AvgPool1d(2, 2), fused.
    # avgpool(conv1x1(relu(x))) == conv1x1(avg(relu(x_even), relu(x_odd)));
    # L is even so strided row pairs never cross sample boundaries, and the
    # channel concat is again replaced by summing weight row-chunks.
    NL2 = (N * L) // 2
    he = jnp.maximum(x_ref[pl.ds(0, NL2, stride=2), :], 0.0)
    ho = jnp.maximum(x_ref[pl.ds(1, NL2, stride=2), :], 0.0)
    out = jnp.dot((he + ho) * 0.5, tw_ref[0:C0, :],
                  preferred_element_type=jnp.float32)
    for j in range(1, nb + 1):
        base = (j - 1) * N * L
        he = jnp.maximum(pbuf[pl.ds(base, NL2, stride=2), :], 0.0)
        ho = jnp.maximum(pbuf[pl.ds(base + 1, NL2, stride=2), :], 0.0)
        off = C0 + 32 * (j - 1)
        out = out + jnp.dot((he + ho) * 0.5, tw_ref[off:off + 32, :],
                            preferred_element_type=jnp.float32)
    o_ref[...] = (out + tb_ref[...]).astype(o_ref.dtype)


def stack_pallas(x2, block_params, tw, tb, *, N, L, dilations, causal_flags):
    """x2: (N*L, C0) -> (N*(L//2), (C0 + 32*n_blocks)//2), one pallas_call."""
    C0 = x2.shape[1]
    nb = len(block_params)
    C_half = tw.shape[1]
    Lp_max = L + 2 * max(int(d) for d in dilations)

    flat = []
    for (w, b) in block_params:
        flat.append(w)                      # (3, Ci, 32)
        flat.append(b.reshape(1, 32))
    tb2 = tb.reshape(1, C_half)

    kernel = functools.partial(_stack_kernel, N=N, L=L, C0=C0, nb=nb,
                               dilations=tuple(int(d) for d in dilations),
                               causal_flags=tuple(bool(c) for c in causal_flags))

    def fullspec(a):
        return pl.BlockSpec(a.shape, lambda i, _nd=a.ndim: (0,) * _nd)

    in_specs = ([fullspec(x2)] + [fullspec(p) for p in flat]
                + [fullspec(tw), fullspec(tb2)])
    return pl.pallas_call(
        kernel,
        out_shape=jax.ShapeDtypeStruct((N * (L // 2), C_half), jnp.float32),
        grid=(1,),
        in_specs=in_specs,
        out_specs=pl.BlockSpec((N * (L // 2), C_half), lambda i: (0, 0)),
        scratch_shapes=[
            pltpu.VMEM((N * Lp_max, C0), jnp.float32),   # padded ReLU'd piece
            pltpu.VMEM((nb * N * L, 32), jnp.float32),   # block outputs
        ],
        compiler_params=pltpu.CompilerParams(dimension_semantics=("arbitrary",)),
    )(x2, *flat, tw, tb2)


# -----------------------------------------------------------------------------
# Kernel 3: global average pool + FC, batched into one matmul.
# -----------------------------------------------------------------------------
def _gap_fc_kernel(x_ref, w_ref, b_ref, o_ref, pooled, *, N, L):
    for n in range(N):
        pooled[n:n + 1, :] = jnp.mean(x_ref[n * L:(n + 1) * L, :],
                                      axis=0, keepdims=True)
    o_ref[...] = (jnp.dot(pooled[...], w_ref[...],
                          preferred_element_type=jnp.float32)
                  + b_ref[...]).astype(o_ref.dtype)


def gap_fc_pallas(x2, w, b, *, N, L):
    C = x2.shape[1]
    Out = w.shape[1]
    b2 = b.reshape(1, Out)
    kernel = functools.partial(_gap_fc_kernel, N=N, L=L)
    return pl.pallas_call(
        kernel,
        out_shape=jax.ShapeDtypeStruct((N, Out), jnp.float32),
        grid=(1,),
        in_specs=[
            pl.BlockSpec((N * L, C), lambda i: (0, 0)),
            pl.BlockSpec((C, Out), lambda i: (0, 0)),
            pl.BlockSpec((1, Out), lambda i: (0, 0)),
        ],
        out_specs=pl.BlockSpec((N, Out), lambda i: (0, 0)),
        scratch_shapes=[pltpu.VMEM((N, C), jnp.float32)],
        compiler_params=pltpu.CompilerParams(dimension_semantics=("arbitrary",)),
    )(x2, w, b2)


# -----------------------------------------------------------------------------
# Parameters (deterministic, kaiming fan_out for conv weights like __init__)
# -----------------------------------------------------------------------------
def _kaiming_conv(key, K, cin, cout):
    fan_out = cout * K
    std = math.sqrt(2.0 / fan_out)
    return jax.random.normal(key, (K, cin, cout), jnp.float32) * std


def init_ddxnet(key, in_channels, seqlen, stacks, output_dim):
    n_filters_entry = 64
    keys = iter(jax.random.split(key, 64))
    params = {
        "entry_w": _kaiming_conv(next(keys), 7, in_channels, n_filters_entry),
        "entry_b": jnp.zeros((n_filters_entry,), jnp.float32),
        "stacks": [],
        "trans": [],
    }
    ch = n_filters_entry
    for n_blocks in stacks:
        stack_p = []
        for _ in range(n_blocks):
            stack_p.append((_kaiming_conv(next(keys), 3, ch, 32),
                            jnp.zeros((32,), jnp.float32)))
            ch += 32
        params["stacks"].append(stack_p)
        tw = _kaiming_conv(next(keys), 1, ch, ch // 2)[0]      # (ch, ch//2) 1x1
        tb = jnp.zeros((ch // 2,), jnp.float32)
        params["trans"].append((tw, tb))
        ch = ch // 2
    bound = 1.0 / math.sqrt(ch)
    params["fc_w"] = jax.random.uniform(next(keys), (ch, output_dim),
                                        jnp.float32, -bound, bound)
    params["fc_b"] = jnp.zeros((output_dim,), jnp.float32)
    return params


# -----------------------------------------------------------------------------
# Forward pass (mirrors DDxNet.forward)
# -----------------------------------------------------------------------------
def ddxnet_forward(params, x_ncl, *, causal=False, use_dilation=True):
    N, _, L = x_ncl.shape
    # NCL -> NLC -> (N*L, C) slab: channels on lanes, batch folded into rows.
    x2 = jnp.transpose(x_ncl, (0, 2, 1)).astype(jnp.float32).reshape(N * L, -1)
    # cb_entry: Conv1d(k=7, p=3) + MaxPool1d(k=3, s=1, p=1), fused.
    h = entry_pallas(x2, params["entry_w"], params["entry_b"], N=N, L=L)
    # stacks + transitions, one fused kernel per stack.
    for s, stack_p in enumerate(params["stacks"]):
        dil, caus = [], []
        for i in range(len(stack_p)):
            if i == 0:
                dil.append(1)
                caus.append(False)
            else:
                dil.append(int(min(128, 2 ** (i + 2))) if use_dilation else 1)
                caus.append(causal)
        tw, tb = params["trans"][s]
        h = stack_pallas(h, stack_p, tw, tb, N=N, L=L,
                         dilations=dil, causal_flags=caus)
        L //= 2
    # global avg pool + fc
    return gap_fc_pallas(h, params["fc_w"], params["fc_b"], N=N, L=L)


if __name__ == "__main__":
    key = jax.random.PRNGKey(0)
    k_param, k_input = jax.random.split(key)

    in_channels, seqlen, output_dim = 4, 32, 5
    stacks = (2, 2, 1, 1)            # samp_factor = 2**4 = 16; seqlen % 16 == 0
    params = init_ddxnet(k_param, in_channels, seqlen, stacks, output_dim)

    x = jax.random.normal(k_input, (2, in_channels, seqlen), jnp.float32)  # NCL

    fwd = jax.jit(lambda xx: ddxnet_forward(params, xx, causal=False,
                                            use_dilation=True))
    out = jax.block_until_ready(fwd(x))
    assert out.shape == (2, output_dim), out.shape
    print("KERNEL_OK")
</pallas_src>

<mosaic_0001>
module attributes {stable_mosaic.version = 11 : i64} {
  func.func @_entry_kernel(%arg0: i32, %arg1: memref<64x4xf32, #tpu.memory_space<vmem>>, %arg2: memref<7x4x64xf32, #tpu.memory_space<vmem>>, %arg3: memref<1x64xf32, #tpu.memory_space<vmem>>, %arg4: memref<64x64xf32, #tpu.memory_space<vmem>>, %arg5: memref<76x4xf32, #tpu.memory_space<vmem>>, %arg6: memref<68x64xf32, #tpu.memory_space<vmem>>) attributes {dimension_semantics = [#tpu.dimension_semantics<arbitrary>], iteration_bounds = array<i64: 1>, scalar_prefetch = 0 : i64, scratch_operands = 2 : i64, tpu.core_type = #tpu.core_type<tc>, window_params = [{pipeline_mode = #tpu.pipeline_mode<synchronous>, transform_indices = @transform_0, window_bounds = array<i64: 64, 4>}, {pipeline_mode = #tpu.pipeline_mode<synchronous>, transform_indices = @transform_1, window_bounds = array<i64: 7, 4, 64>}, {pipeline_mode = #tpu.pipeline_mode<synchronous>, transform_indices = @transform_2, window_bounds = array<i64: 1, 64>}, {pipeline_mode = #tpu.pipeline_mode<synchronous>, transform_indices = @transform_3, window_bounds = array<i64: 64, 64>}]} {
    %cst = arith.constant 0.000000e+00 : f32
    %0 = vector.broadcast %cst : f32 to vector<3x4xf32>
    %c0 = arith.constant 0 : index
    %c0_0 = arith.constant 0 : index
    %1 = vector.load %arg5[%c0, %c0_0] : memref<76x4xf32, #tpu.memory_space<vmem>>, vector<3x4xf32>
    tpu.vector_store %arg5[%c0, %c0_0], %0 {strides = array<i32>} : memref<76x4xf32, #tpu.memory_space<vmem>>, vector<3x4xf32>,
    %c0_1 = arith.constant 0 : index
    %c0_2 = arith.constant 0 : index
    %2 = vector.load %arg1[%c0_1, %c0_2] : memref<64x4xf32, #tpu.memory_space<vmem>>, vector<32x4xf32>
    %c3 = arith.constant 3 : index
    %c0_3 = arith.constant 0 : index
    %3 = vector.load %arg5[%c3, %c0_3] : memref<76x4xf32, #tpu.memory_space<vmem>>, vector<32x4xf32>
    tpu.vector_store %arg5[%c3, %c0_3], %2 {strides = array<i32>} : memref<76x4xf32, #tpu.memory_space<vmem>>, vector<32x4xf32>,
    %c35 = arith.constant 35 : index
    %c0_4 = arith.constant 0 : index
    %4 = vector.load %arg5[%c35, %c0_4] : memref<76x4xf32, #tpu.memory_space<vmem>>, vector<3x4xf32>
    tpu.vector_store %arg5[%c35, %c0_4], %0 {strides = array<i32>} : memref<76x4xf32, #tpu.memory_space<vmem>>, vector<3x4xf32>,
    %c38 = arith.constant 38 : index
    %c0_5 = arith.constant 0 : index
    %5 = vector.load %arg5[%c38, %c0_5] : memref<76x4xf32, #tpu.memory_space<vmem>>, vector<3x4xf32>
    tpu.vector_store %arg5[%c38, %c0_5], %0 {strides = array<i32>} : memref<76x4xf32, #tpu.memory_space<vmem>>, vector<3x4xf32>,
    %c32 = arith.constant 32 : index
    %c0_6 = arith.constant 0 : index
    %6 = vector.load %arg1[%c32, %c0_6] : memref<64x4xf32, #tpu.memory_space<vmem>>, vector<32x4xf32>
    %c41 = arith.constant 41 : index
    %c0_7 = arith.constant 0 : index
    %7 = vector.load %arg5[%c41, %c0_7] : memref<76x4xf32, #tpu.memory_space<vmem>>, vector<32x4xf32>
    tpu.vector_store %arg5[%c41, %c0_7], %6 {strides = array<i32>} : memref<76x4xf32, #tpu.memory_space<vmem>>, vector<32x4xf32>,
    %c73 = arith.constant 73 : index
    %c0_8 = arith.constant 0 : index
    %8 = vector.load %arg5[%c73, %c0_8] : memref<76x4xf32, #tpu.memory_space<vmem>>, vector<3x4xf32>
    tpu.vector_store %arg5[%c73, %c0_8], %0 {strides = array<i32>} : memref<76x4xf32, #tpu.memory_space<vmem>>, vector<3x4xf32>,
    %cst_9 = arith.constant 0.000000e+00 : f32
    %9 = vector.broadcast %cst_9 : f32 to vector<70x64xf32>
    %c0_10 = arith.constant 0 : index
    %c0_11 = arith.constant 0 : index
    %10 = vector.load %arg5[%c0_10, %c0_11] : memref<76x4xf32, #tpu.memory_space<vmem>>, vector<70x4xf32>
    %c0_12 = arith.constant 0 : index
    %c0_13 = arith.constant 0 : index
    %c0_14 = arith.constant 0 : index
    %11 = vector.load %arg2[%c0_12, %c0_13, %c0_14] : memref<7x4x64xf32, #tpu.memory_space<vmem>>, vector<1x4x64xf32>
    %12 = vector.shape_cast %11 : vector<1x4x64xf32> to vector<4x64xf32>
    %cst_15 = arith.constant dense<0.000000e+00> : vector<70x64xf32>
    %13 = tpu.matmul %10, %12, %cst_15 {dimension_numbers = #tpu.dot_dimension_numbers<[1], [0], [0], [1], [0, 0, 1, 1], [], []>} : vector<70x4xf32>, vector<4x64xf32>, vector<70x64xf32> -> vector<70x64xf32>
    %14 = arith.addf %9, %13 : vector<70x64xf32>
    %c1 = arith.constant 1 : index
    %c0_16 = arith.constant 0 : index
    %15 = vector.load %arg5[%c1, %c0_16] : memref<76x4xf32, #tpu.memory_space<vmem>>, vector<70x4xf32>
    %c1_17 = arith.constant 1 : index
    %c0_18 = arith.constant 0 : index
    %c0_19 = arith.constant 0 : index
    %16 = vector.load %arg2[%c1_17, %c0_18, %c0_19] : memref<7x4x64xf32, #tpu.memory_space<vmem>>, vector<1x4x64xf32>
    %17 = vector.shape_cast %16 : vector<1x4x64xf32> to vector<4x64xf32>
    %cst_20 = arith.constant dense<0.000000e+00> : vector<70x64xf32>
    %18 = tpu.matmul %15, %17, %cst_20 {dimension_numbers = #tpu.dot_dimension_numbers<[1], [0], [0], [1], [0, 0, 1, 1], [], []>} : vector<70x4xf32>, vector<4x64xf32>, vector<70x64xf32> -> vector<70x64xf32>
    %19 = arith.addf %14, %18 : vector<70x64xf32>
    %c2 = arith.constant 2 : index
    %c0_21 = arith.constant 0 : index
    %20 = vector.load %arg5[%c2, %c0_21] : memref<76x4xf32, #tpu.memory_space<vmem>>, vector<70x4xf32>
    %c2_22 = arith.constant 2 : index
    %c0_23 = arith.constant 0 : index
    %c0_24 = arith.constant 0 : index
    %21 = vector.load %arg2[%c2_22, %c0_23, %c0_24] : memref<7x4x64xf32, #tpu.memory_space<vmem>>, vector<1x4x64xf32>
    %22 = vector.shape_cast %21 : vector<1x4x64xf32> to vector<4x64xf32>
    %cst_25 = arith.constant dense<0.000000e+00> : vector<70x64xf32>
    %23 = tpu.matmul %20, %22, %cst_25 {dimension_numbers = #tpu.dot_dimension_numbers<[1], [0], [0], [1], [0, 0, 1, 1], [], []>} : vector<70x4xf32>, vector<4x64xf32>, vector<70x64xf32> -> vector<70x64xf32>
    %24 = arith.addf %19, %23 : vector<70x64xf32>
    %c3_26 = arith.constant 3 : index
    %c0_27 = arith.constant 0 : index
    %25 = vector.load %arg5[%c3_26, %c0_27] : memref<76x4xf32, #tpu.memory_space<vmem>>, vector<70x4xf32>
    %c3_28 = arith.constant 3 : index
    %c0_29 = arith.constant 0 : index
    %c0_30 = arith.constant 0 : index
    %26 = vector.load %arg2[%c3_28, %c0_29, %c0_30] : memref<7x4x64xf32, #tpu.memory_space<vmem>>, vector<1x4x64xf32>
    %27 = vector.shape_cast %26 : vector<1x4x64xf32> to vector<4x64xf32>
    %cst_31 = arith.constant dense<0.000000e+00> : vector<70x64xf32>
    %28 = tpu.matmul %25, %27, %cst_31 {dimension_numbers = #tpu.dot_dimension_numbers<[1], [0], [0], [1], [0, 0, 1, 1], [], []>} : vector<70x4xf32>, vector<4x64xf32>, vector<70x64xf32> -> vector<70x64xf32>
    %29 = arith.addf %24, %28 : vector<70x64xf32>
    %c4 = arith.constant 4 : index
    %c0_32 = arith.constant 0 : index
    %30 = vector.load %arg5[%c4, %c0_32] : memref<76x4xf32, #tpu.memory_space<vmem>>, vector<70x4xf32>
    %c4_33 = arith.constant 4 : index
    %c0_34 = arith.constant 0 : index
    %c0_35 = arith.constant 0 : index
    %31 = vector.load %arg2[%c4_33, %c0_34, %c0_35] : memref<7x4x64xf32, #tpu.memory_space<vmem>>, vector<1x4x64xf32>
    %32 = vector.shape_cast %31 : vector<1x4x64xf32> to vector<4x64xf32>
    %cst_36 = arith.constant dense<0.000000e+00> : vector<70x64xf32>
    %33 = tpu.matmul %30, %32, %cst_36 {dimension_numbers = #tpu.dot_dimension_numbers<[1], [0], [0], [1], [0, 0, 1, 1], [], []>} : vector<70x4xf32>, vector<4x64xf32>, vector<70x64xf32> -> vector<70x64xf32>
    %34 = arith.addf %29, %33 : vector<70x64xf32>
    %c5 = arith.constant 5 : index
    %c0_37 = arith.constant 0 : index
    %35 = vector.load %arg5[%c5, %c0_37] : memref<76x4xf32, #tpu.memory_space<vmem>>, vector<70x4xf32>
    %c5_38 = arith.constant 5 : index
    %c0_39 = arith.constant 0 : index
    %c0_40 = arith.constant 0 : index
    %36 = vector.load %arg2[%c5_38, %c0_39, %c0_40] : memref<7x4x64xf32, #tpu.memory_space<vmem>>, vector<1x4x64xf32>
    %37 = vector.shape_cast %36 : vector<1x4x64xf32> to vector<4x64xf32>
    %cst_41 = arith.constant dense<0.000000e+00> : vector<70x64xf32>
    %38 = tpu.matmul %35, %37, %cst_41 {dimension_numbers = #tpu.dot_dimension_numbers<[1], [0], [0], [1], [0, 0, 1, 1], [], []>} : vector<70x4xf32>, vector<4x64xf32>, vector<70x64xf32> -> vector<70x64xf32>
    %39 = arith.addf %34, %38 : vector<70x64xf32>
    %c6 = arith.constant 6 : index
    %c0_42 = arith.constant 0 : index
    %40 = vector.load %arg5[%c6, %c0_42] : memref<76x4xf32, #tpu.memory_space<vmem>>, vector<70x4xf32>
    %c6_43 = arith.constant 6 : index
    %c0_44 = arith.constant 0 : index
    %c0_45 = arith.constant 0 : index
    %41 = vector.load %arg2[%c6_43, %c0_44, %c0_45] : memref<7x4x64xf32, #tpu.memory_space<vmem>>, vector<1x4x64xf32>
    %42 = vector.shape_cast %41 : vector<1x4x64xf32> to vector<4x64xf32>
    %cst_46 = arith.constant dense<0.000000e+00> : vector<70x64xf32>
    %43 = tpu.matmul %40, %42, %cst_46 {dimension_numbers = #tpu.dot_dimension_numbers<[1], [0], [0], [1], [0, 0, 1, 1], [], []>} : vector<70x4xf32>, vector<4x64xf32>, vector<70x64xf32> -> vector<70x64xf32>
    %44 = arith.addf %39, %43 : vector<70x64xf32>
    %c0_47 = arith.constant 0 : index
    %c0_48 = arith.constant 0 : index
    %45 = vector.load %arg3[%c0_47, %c0_48] : memref<1x64xf32, #tpu.memory_space<vmem>>, vector<1x64xf32>
    %46 = vector.broadcast %45 : vector<1x64xf32> to vector<70x64xf32>
    %47 = arith.addf %44, %46 : vector<70x64xf32>
    %cst_49 = arith.constant 0xFF800000 : f32
    %48 = vector.broadcast %cst_49 : f32 to vector<68x64xf32>
    %c0_50 = arith.constant 0 : index
    %c0_51 = arith.constant 0 : index
    %49 = vector.load %arg6[%c0_50, %c0_51] : memref<68x64xf32, #tpu.memory_space<vmem>>, vector<68x64xf32>
    tpu.vector_store %arg6[%c0_50, %c0_51], %48 {strides = array<i32>} : memref<68x64xf32, #tpu.memory_space<vmem>>, vector<68x64xf32>,
    %50 = vector.extract_strided_slice %47 {offsets = [0, 0], sizes = [32, 64], strides = [1, 1]} : vector<70x64xf32> to vector<32x64xf32>
    %c1_52 = arith.constant 1 : index
    %c0_53 = arith.constant 0 : index
    %51 = vector.load %arg6[%c1_52, %c0_53] : memref<68x64xf32, #tpu.memory_space<vmem>>, vector<32x64xf32>
    tpu.vector_store %arg6[%c1_52, %c0_53], %50 {strides = array<i32>} : memref<68x64xf32, #tpu.memory_space<vmem>>, vector<32x64xf32>,
    %52 = vector.extract_strided_slice %47 {offsets = [38, 0], sizes = [32, 64], strides = [1, 1]} : vector<70x64xf32> to vector<32x64xf32>
    %c35_54 = arith.constant 35 : index
    %c0_55 = arith.constant 0 : index
    %53 = vector.load %arg6[%c35_54, %c0_55] : memref<68x64xf32, #tpu.memory_space<vmem>>, vector<32x64xf32>
    tpu.vector_store %arg6[%c35_54, %c0_55], %52 {strides = array<i32>} : memref<68x64xf32, #tpu.memory_space<vmem>>, vector<32x64xf32>,
    %c0_56 = arith.constant 0 : index
    %c0_57 = arith.constant 0 : index
    %54 = vector.load %arg6[%c0_56, %c0_57] : memref<68x64xf32, #tpu.memory_space<vmem>>, vector<32x64xf32>
    %c1_58 = arith.constant 1 : index
    %c0_59 = arith.constant 0 : index
    %55 = vector.load %arg6[%c1_58, %c0_59] : memref<68x64xf32, #tpu.memory_space<vmem>>, vector<32x64xf32>
    %56 = arith.maximumf %54, %55 : vector<32x64xf32>
    %c2_60 = arith.constant 2 : index
    %c0_61 = arith.constant 0 : index
    %57 = vector.load %arg6[%c2_60, %c0_61] : memref<68x64xf32, #tpu.memory_space<vmem>>, vector<32x64xf32>
    %58 = arith.maximumf %56, %57 : vector<32x64xf32>
    %c0_62 = arith.constant 0 : index
    %c0_63 = arith.constant 0 : index
    %59 = vector.load %arg4[%c0_62, %c0_63] : memref<64x64xf32, #tpu.memory_space<vmem>>, vector<32x64xf32>
    tpu.vector_store %arg4[%c0_62, %c0_63], %58 {strides = array<i32>} : memref<64x64xf32, #tpu.memory_space<vmem>>, vector<32x64xf32>,
    %c34 = arith.constant 34 : index
    %c0_64 = arith.constant 0 : index
    %60 = vector.load %arg6[%c34, %c0_64] : memref<68x64xf32, #tpu.memory_space<vmem>>, vector<32x64xf32>
    %c35_65 = arith.constant 35 : index
    %c0_66 = arith.constant 0 : index
    %61 = vector.load %arg6[%c35_65, %c0_66] : memref<68x64xf32, #tpu.memory_space<vmem>>, vector<32x64xf32>
    %62 = arith.maximumf %60, %61 : vector<32x64xf32>
    %c36 = arith.constant 36 : index
    %c0_67 = arith.constant 0 : index
    %63 = vector.load %arg6[%c36, %c0_67] : memref<68x64xf32, #tpu.memory_space<vmem>>, vector<32x64xf32>
    %64 = arith.maximumf %62, %63 : vector<32x64xf32>
    %c32_68 = arith.constant 32 : index
    %c0_69 = arith.constant 0 : index
    %65 = vector.load %arg4[%c32_68, %c0_69] : memref<64x64xf32, #tpu.memory_space<vmem>>, vector<32x64xf32>
    tpu.vector_store %arg4[%c32_68, %c0_69], %64 {strides = array<i32>} : memref<64x64xf32, #tpu.memory_space<vmem>>, vector<32x64xf32>,
    return
  }
  func.func @transform_0(%arg0: i32) -> (i32, i32) {
    %c0_i32 = arith.constant 0 : i32
    %c0_i32_0 = arith.constant 0 : i32
    %c0_i32_1 = arith.constant 0 : i32
    return %c0_i32, %c0_i32_0 : i32, i32
  }
  func.func @transform_1(%arg0: i32) -> (i32, i32, i32) {
    %c0_i32 = arith.constant 0 : i32
    %c0_i32_0 = arith.constant 0 : i32
    %c0_i32_1 = arith.constant 0 : i32
    %c0_i32_2 = arith.constant 0 : i32
    return %c0_i32, %c0_i32_0, %c0_i32_1 : i32, i32, i32
  }
  func.func @transform_2(%arg0: i32) -> (i32, i32) {
    %c0_i32 = arith.constant 0 : i32
    %c0_i32_0 = arith.constant 0 : i32
    %c0_i32_1 = arith.constant 0 : i32
    return %c0_i32, %c0_i32_0 : i32, i32
  }
  func.func @transform_3(%arg0: i32) -> (i32, i32) {
    %c0_i32 = arith.constant 0 : i32
    %c0_i32_0 = arith.constant 0 : i32
    %c0_i32_1 = arith.constant 0 : i32
    return %c0_i32, %c0_i32_0 : i32, i32
  }
}

module attributes {stable_mosaic.version = 11 : i64} {
  func.func @_stack_kernel(%arg0: i32, %arg1: memref<16x64xf32, #tpu.memory_space<vmem>>, %arg2: memref<3x64x32xf32, #tpu.memory_space<vmem>>, %arg3: memref<1x32xf32, #tpu.memory_space<vmem>>, %arg4: memref<96x48xf32, #tpu.memory_space<vmem>>, %arg5: memref<1x48xf32, #tpu.memory_space<vmem>>, %arg6: memref<8x48xf32, #tpu.memory_space<vmem>>, %arg7: memref<20x64xf32, #tpu.memory_space<vmem>>, %arg8: memref<16x32xf32, #tpu.memory_space<vmem>>) attributes {dimension_semantics = [#tpu.dimension_semantics<arbitrary>], iteration_bounds = array<i64: 1>, scalar_prefetch = 0 : i64, scratch_operands = 2 : i64, tpu.core_type = #tpu.core_type<tc>, window_params = [{pipeline_mode = #tpu.pipeline_mode<synchronous>, transform_indices = @transform_0, window_bounds = array<i64: 16, 64>}, {pipeline_mode = #tpu.pipeline_mode<synchronous>, transform_indices = @transform_1, window_bounds = array<i64: 3, 64, 32>}, {pipeline_mode = #tpu.pipeline_mode<synchronous>, transform_indices = @transform_2, window_bounds = array<i64: 1, 32>}, {pipeline_mode = #tpu.pipeline_mode<synchronous>, transform_indices = @transform_3, window_bounds = array<i64: 96, 48>}, {pipeline_mode = #tpu.pipeline_mode<synchronous>, transform_indices = @transform_4, window_bounds = array<i64: 1, 48>}, {pipeline_mode = #tpu.pipeline_mode<synchronous>, transform_indices = @transform_5, window_bounds = array<i64: 8, 48>}]} {
    %c0 = arith.constant 0 : index
    %c0_0 = arith.constant 0 : index
    %c0_1 = arith.constant 0 : index
    %0 = vector.load %arg2[%c0, %c0_0, %c0_1] : memref<3x64x32xf32, #tpu.memory_space<vmem>>, vector<1x64x32xf32>
    %1 = vector.shape_cast %0 : vector<1x64x32xf32> to vector<64x32xf32>
    %c1 = arith.constant 1 : index
    %c0_2 = arith.constant 0 : index
    %c0_3 = arith.constant 0 : index
    %2 = vector.load %arg2[%c1, %c0_2, %c0_3] : memref<3x64x32xf32, #tpu.memory_space<vmem>>, vector<1x64x32xf32>
    %3 = vector.shape_cast %2 : vector<1x64x32xf32> to vector<64x32xf32>
    %c2 = arith.constant 2 : index
    %c0_4 = arith.constant 0 : index
    %c0_5 = arith.constant 0 : index
    %4 = vector.load %arg2[%c2, %c0_4, %c0_5] : memref<3x64x32xf32, #tpu.memory_space<vmem>>, vector<1x64x32xf32>
    %5 = vector.shape_cast %4 : vector<1x64x32xf32> to vector<64x32xf32>
    %cst = arith.constant 0.000000e+00 : f32
    %6 = vector.broadcast %cst : f32 to vector<18x32xf32>
    %cst_6 = arith.constant 0.000000e+00 : f32
    %7 = vector.broadcast %cst_6 : f32 to vector<1x64xf32>
    %c0_7 = arith.constant 0 : index
    %c0_8 = arith.constant 0 : index
    %8 = vector.load %arg7[%c0_7, %c0_8] : memref<20x64xf32, #tpu.memory_space<vmem>>, vector<1x64xf32>
    tpu.vector_store %arg7[%c0_7, %c0_8], %7 {strides = array<i32>} : memref<20x64xf32, #tpu.memory_space<vmem>>, vector<1x64xf32>,
    %cst_9 = arith.constant 0.000000e+00 : f32
    %9 = vector.broadcast %cst_9 : f32 to vector<1x64xf32>
    %c9 = arith.constant 9 : index
    %c0_10 = arith.constant 0 : index
    %10 = vector.load %arg7[%c9, %c0_10] : memref<20x64xf32, #tpu.memory_space<vmem>>, vector<1x64xf32>
    tpu.vector_store %arg7[%c9, %c0_10], %9 {strides = array<i32>} : memref<20x64xf32, #tpu.memory_space<vmem>>, vector<1x64xf32>,
    %c0_11 = arith.constant 0 : index
    %c0_12 = arith.constant 0 : index
    %11 = vector.load %arg1[%c0_11, %c0_12] : memref<16x64xf32, #tpu.memory_space<vmem>>, vector<8x64xf32>
    %cst_13 = arith.constant 0.000000e+00 : f32
    %12 = vector.broadcast %cst_13 : f32 to vector<8x64xf32>
    %13 = arith.maximumf %11, %12 : vector<8x64xf32>
    %c1_14 = arith.constant 1 : index
    %c0_15 = arith.constant 0 : index
    %14 = vector.load %arg7[%c1_14, %c0_15] : memref<20x64xf32, #tpu.memory_space<vmem>>, vector<8x64xf32>
    tpu.vector_store %arg7[%c1_14, %c0_15], %13 {strides = array<i32>} : memref<20x64xf32, #tpu.memory_space<vmem>>, vector<8x64xf32>,
    %cst_16 = arith.constant 0.000000e+00 : f32
    %15 = vector.broadcast %cst_16 : f32 to vector<1x64xf32>
    %c10 = arith.constant 10 : index
    %c0_17 = arith.constant 0 : index
    %16 = vector.load %arg7[%c10, %c0_17] : memref<20x64xf32, #tpu.memory_space<vmem>>, vector<1x64xf32>
    tpu.vector_store %arg7[%c10, %c0_17], %15 {strides = array<i32>} : memref<20x64xf32, #tpu.memory_space<vmem>>, vector<1x64xf32>,
    %cst_18 = arith.constant 0.000000e+00 : f32
    %17 = vector.broadcast %cst_18 : f32 to vector<1x64xf32>
    %c19 = arith.constant 19 : index
    %c0_19 = arith.constant 0 : index
    %18 = vector.load %arg7[%c19, %c0_19] : memref<20x64xf32, #tpu.memory_space<vmem>>, vector<1x64xf32>
    tpu.vector_store %arg7[%c19, %c0_19], %17 {strides = array<i32>} : memref<20x64xf32, #tpu.memory_space<vmem>>, vector<1x64xf32>,
    %c8 = arith.constant 8 : index
    %c0_20 = arith.constant 0 : index
    %19 = vector.load %arg1[%c8, %c0_20] : memref<16x64xf32, #tpu.memory_space<vmem>>, vector<8x64xf32>
    %cst_21 = arith.constant 0.000000e+00 : f32
    %20 = vector.broadcast %cst_21 : f32 to vector<8x64xf32>
    %21 = arith.maximumf %19, %20 : vector<8x64xf32>
    %c11 = arith.constant 11 : index
    %c0_22 = arith.constant 0 : index
    %22 = vector.load %arg7[%c11, %c0_22] : memref<20x64xf32, #tpu.memory_space<vmem>>, vector<8x64xf32>
    tpu.vector_store %arg7[%c11, %c0_22], %21 {strides = array<i32>} : memref<20x64xf32, #tpu.memory_space<vmem>>, vector<8x64xf32>,
    %c0_23 = arith.constant 0 : index
    %c0_24 = arith.constant 0 : index
    %23 = vector.load %arg7[%c0_23, %c0_24] : memref<20x64xf32, #tpu.memory_space<vmem>>, vector<18x64xf32>
    %cst_25 = arith.constant dense<0.000000e+00> : vector<18x32xf32>
    %24 = tpu.matmul %23, %1, %cst_25 {dimension_numbers = #tpu.dot_dimension_numbers<[1], [0], [0], [1], [0, 0, 1, 1], [], []>} : vector<18x64xf32>, vector<64x32xf32>, vector<18x32xf32> -> vector<18x32xf32>
    %25 = arith.addf %6, %24 : vector<18x32xf32>
    %c1_26 = arith.constant 1 : index
    %c0_27 = arith.constant 0 : index
    %26 = vector.load %arg7[%c1_26, %c0_27] : memref<20x64xf32, #tpu.memory_space<vmem>>, vector<18x64xf32>
    %cst_28 = arith.constant dense<0.000000e+00> : vector<18x32xf32>
    %27 = tpu.matmul %26, %3, %cst_28 {dimension_numbers = #tpu.dot_dimension_numbers<[1], [0], [0], [1], [0, 0, 1, 1], [], []>} : vector<18x64xf32>, vector<64x32xf32>, vector<18x32xf32> -> vector<18x32xf32>
    %28 = arith.addf %25, %27 : vector<18x32xf32>
    %c2_29 = arith.constant 2 : index
    %c0_30 = arith.constant 0 : index
    %29 = vector.load %arg7[%c2_29, %c0_30] : memref<20x64xf32, #tpu.memory_space<vmem>>, vector<18x64xf32>
    %cst_31 = arith.constant dense<0.000000e+00> : vector<18x32xf32>
    %30 = tpu.matmul %29, %5, %cst_31 {dimension_numbers = #tpu.dot_dimension_numbers<[1], [0], [0], [1], [0, 0, 1, 1], [], []>} : vector<18x64xf32>, vector<64x32xf32>, vector<18x32xf32> -> vector<18x32xf32>
    %31 = arith.addf %28, %30 : vector<18x32xf32>
    %c0_32 = arith.constant 0 : index
    %c0_33 = arith.constant 0 : index
    %32 = vector.load %arg3[%c0_32, %c0_33] : memref<1x32xf32, #tpu.memory_space<vmem>>, vector<1x32xf32>
    %33 = vector.broadcast %32 : vector<1x32xf32> to vector<18x32xf32>
    %34 = arith.addf %31, %33 : vector<18x32xf32>
    %35 = vector.extract_strided_slice %34 {offsets = [0, 0], sizes = [8, 32], strides = [1, 1]} : vector<18x32xf32> to vector<8x32xf32>
    %c0_34 = arith.constant 0 : index
    %c0_35 = arith.constant 0 : index
    %36 = vector.load %arg8[%c0_34, %c0_35] : memref<16x32xf32, #tpu.memory_space<vmem>>, vector<8x32xf32>
    tpu.vector_store %arg8[%c0_34, %c0_35], %35 {strides = array<i32>} : memref<16x32xf32, #tpu.memory_space<vmem>>, vector<8x32xf32>,
    %37 = vector.extract_strided_slice %34 {offsets = [10, 0], sizes = [8, 32], strides = [1, 1]} : vector<18x32xf32> to vector<8x32xf32>
    %c8_36 = arith.constant 8 : index
    %c0_37 = arith.constant 0 : index
    %38 = vector.load %arg8[%c8_36, %c0_37] : memref<16x32xf32, #tpu.memory_space<vmem>>, vector<8x32xf32>
    tpu.vector_store %arg8[%c8_36, %c0_37], %37 {strides = array<i32>} : memref<16x32xf32, #tpu.memory_space<vmem>>, vector<8x32xf32>,
    %c0_38 = arith.constant 0 : index
    %c0_39 = arith.constant 0 : index
    %39 = tpu.strided_load %arg1[%c0_38, %c0_39] {strides = array<i32: 2, 1>} : memref<16x64xf32, #tpu.memory_space<vmem>>, vector<8x64xf32>
    %cst_40 = arith.constant 0.000000e+00 : f32
    %40 = vector.broadcast %cst_40 : f32 to vector<8x64xf32>
    %41 = arith.maximumf %39, %40 : vector<8x64xf32>
    %c1_41 = arith.constant 1 : index
    %c0_42 = arith.constant 0 : index
    %42 = tpu.strided_load %arg1[%c1_41, %c0_42] {strides = array<i32: 2, 1>} : memref<16x64xf32, #tpu.memory_space<vmem>>, vector<8x64xf32>
    %cst_43 = arith.constant 0.000000e+00 : f32
    %43 = vector.broadcast %cst_43 : f32 to vector<8x64xf32>
    %44 = arith.maximumf %42, %43 : vector<8x64xf32>
    %45 = arith.addf %41, %44 : vector<8x64xf32>
    %cst_44 = arith.constant 5.000000e-01 : f32
    %46 = vector.broadcast %cst_44 : f32 to vector<8x64xf32>
    %47 = arith.mulf %45, %46 : vector<8x64xf32>
    %c0_45 = arith.constant 0 : index
    %c0_46 = arith.constant 0 : index
    %48 = vector.load %arg4[%c0_45, %c0_46] : memref<96x48xf32, #tpu.memory_space<vmem>>, vector<64x48xf32>
    %cst_47 = arith.constant dense<0.000000e+00> : vector<8x48xf32>
    %49 = tpu.matmul %47, %48, %cst_47 {dimension_numbers = #tpu.dot_dimension_numbers<[1], [0], [0], [1], [0, 0, 1, 1], [], []>} : vector<8x64xf32>, vector<64x48xf32>, vector<8x48xf32> -> vector<8x48xf32>
    %c0_48 = arith.constant 0 : index
    %c0_49 = arith.constant 0 : index
    %50 = tpu.strided_load %arg8[%c0_48, %c0_49] {strides = array<i32: 2, 1>} : memref<16x32xf32, #tpu.memory_space<vmem>>, vector<8x32xf32>
    %cst_50 = arith.constant 0.000000e+00 : f32
    %51 = vector.broadcast %cst_50 : f32 to vector<8x32xf32>
    %52 = arith.maximumf %50, %51 : vector<8x32xf32>
    %c1_51 = arith.constant 1 : index
    %c0_52 = arith.constant 0 : index
    %53 = tpu.strided_load %arg8[%c1_51, %c0_52] {strides = array<i32: 2, 1>} : memref<16x32xf32, #tpu.memory_space<vmem>>, vector<8x32xf32>
    %cst_53 = arith.constant 0.000000e+00 : f32
    %54 = vector.broadcast %cst_53 : f32 to vector<8x32xf32>
    %55 = arith.maximumf %53, %54 : vector<8x32xf32>
    %56 = arith.addf %52, %55 : vector<8x32xf32>
    %cst_54 = arith.constant 5.000000e-01 : f32
    %57 = vector.broadcast %cst_54 : f32 to vector<8x32xf32>
    %58 = arith.mulf %56, %57 : vector<8x32xf32>
    %c64 = arith.constant 64 : index
    %c0_55 = arith.constant 0 : index
    %59 = vector.load %arg4[%c64, %c0_55] : memref<96x48xf32, #tpu.memory_space<vmem>>, vector<32x48xf32>
    %cst_56 = arith.constant dense<0.000000e+00> : vector<8x48xf32>
    %60 = tpu.matmul %58, %59, %cst_56 {dimension_numbers = #tpu.dot_dimension_numbers<[1], [0], [0], [1], [0, 0, 1, 1], [], []>} : vector<8x32xf32>, vector<32x48xf32>, vector<8x48xf32> -> vector<8x48xf32>
    %61 = arith.addf %49, %60 : vector<8x48xf32>
    %c0_57 = arith.constant 0 : index
    %c0_58 = arith.constant 0 : index
    %62 = vector.load %arg5[%c0_57, %c0_58] : memref<1x48xf32, #tpu.memory_space<vmem>>, vector<1x48xf32>
    %63 = vector.broadcast %62 : vector<1x48xf32> to vector<8x48xf32>
    %64 = arith.addf %61, %63 : vector<8x48xf32>
    %c0_59 = arith.constant 0 : index
    %c0_60 = arith.constant 0 : index
    %65 = vector.load %arg6[%c0_59, %c0_60] : memref<8x48xf32, #tpu.memory_space<vmem>>, vector<8x48xf32>
    tpu.vector_store %arg6[%c0_59, %c0_60], %64 {strides = array<i32>} : memref<8x48xf32, #tpu.memory_space<vmem>>, vector<8x48xf32>,
    return
  }
  func.func @transform_0(%arg0: i32) -> (i32, i32) {
    %c0_i32 = arith.constant 0 : i32
    %c0_i32_0 = arith.constant 0 : i32
    %c0_i32_1 = arith.constant 0 : i32
    return %c0_i32, %c0_i32_0 : i32, i32
  }
  func.func @transform_1(%arg0: i32) -> (i32, i32, i32) {
    %c0_i32 = arith.constant 0 : i32
    %c0_i32_0 = arith.constant 0 : i32
    %c0_i32_1 = arith.constant 0 : i32
    %c0_i32_2 = arith.constant 0 : i32
    return %c0_i32, %c0_i32_0, %c0_i32_1 : i32, i32, i32
  }
  func.func @transform_2(%arg0: i32) -> (i32, i32) {
    %c0_i32 = arith.constant 0 : i32
    %c0_i32_0 = arith.constant 0 : i32
    %c0_i32_1 = arith.constant 0 : i32
    return %c0_i32, %c0_i32_0 : i32, i32
  }
  func.func @transform_3(%arg0: i32) -> (i32, i32) {
    %c0_i32 = arith.constant 0 : i32
    %c0_i32_0 = arith.constant 0 : i32
    %c0_i32_1 = arith.constant 0 : i32
    return %c0_i32, %c0_i32_0 : i32, i32
  }
  func.func @transform_4(%arg0: i32) -> (i32, i32) {
    %c0_i32 = arith.constant 0 : i32
    %c0_i32_0 = arith.constant 0 : i32
    %c0_i32_1 = arith.constant 0 : i32
    return %c0_i32, %c0_i32_0 : i32, i32
  }
  func.func @transform_5(%arg0: i32) -> (i32, i32) {
    %c0_i32 = arith.constant 0 : i32
    %c0_i32_0 = arith.constant 0 : i32
    %c0_i32_1 = arith.constant 0 : i32
    return %c0_i32, %c0_i32_0 : i32, i32
  }
}

module attributes {stable_mosaic.version = 11 : i64} {
  func.func @_stack_kernel(%arg0: i32, %arg1: memref<32x64xf32, #tpu.memory_space<vmem>>, %arg2: memref<3x64x32xf32, #tpu.memory_space<vmem>>, %arg3: memref<1x32xf32, #tpu.memory_space<vmem>>, %arg4: memref<3x96x32xf32, #tpu.memory_space<vmem>>, %arg5: memref<1x32xf32, #tpu.memory_space<vmem>>, %arg6: memref<128x64xf32, #tpu.memory_space<vmem>>, %arg7: memref<1x64xf32, #tpu.memory_space<vmem>>, %arg8: memref<16x64xf32, #tpu.memory_space<vmem>>, %arg9: memref<64x64xf32, #tpu.memory_space<vmem>>, %arg10: memref<64x32xf32, #tpu.memory_space<vmem>>) attributes {dimension_semantics = [#tpu.dimension_semantics<arbitrary>], iteration_bounds = array<i64: 1>, scalar_prefetch = 0 : i64, scratch_operands = 2 : i64, tpu.core_type = #tpu.core_type<tc>, window_params = [{pipeline_mode = #tpu.pipeline_mode<synchronous>, transform_indices = @transform_0, window_bounds = array<i64: 32, 64>}, {pipeline_mode = #tpu.pipeline_mode<synchronous>, transform_indices = @transform_1, window_bounds = array<i64: 3, 64, 32>}, {pipeline_mode = #tpu.pipeline_mode<synchronous>, transform_indices = @transform_2, window_bounds = array<i64: 1, 32>}, {pipeline_mode = #tpu.pipeline_mode<synchronous>, transform_indices = @transform_3, window_bounds = array<i64: 3, 96, 32>}, {pipeline_mode = #tpu.pipeline_mode<synchronous>, transform_indices = @transform_4, window_bounds = array<i64: 1, 32>}, {pipeline_mode = #tpu.pipeline_mode<synchronous>, transform_indices = @transform_5, window_bounds = array<i64: 128, 64>}, {pipeline_mode = #tpu.pipeline_mode<synchronous>, transform_indices = @transform_6, window_bounds = array<i64: 1, 64>}, {pipeline_mode = #tpu.pipeline_mode<synchronous>, transform_indices = @transform_7, window_bounds = array<i64: 16, 64>}]} {
    %c0 = arith.constant 0 : index
    %c0_0 = arith.constant 0 : index
    %c0_1 = arith.constant 0 : index
    %0 = vector.load %arg2[%c0, %c0_0, %c0_1] : memref<3x64x32xf32, #tpu.memory_space<vmem>>, vector<1x64x32xf32>
    %1 = vector.shape_cast %0 : vector<1x64x32xf32> to vector<64x32xf32>
    %c1 = arith.constant 1 : index
    %c0_2 = arith.constant 0 : index
    %c0_3 = arith.constant 0 : index
    %2 = vector.load %arg2[%c1, %c0_2, %c0_3] : memref<3x64x32xf32, #tpu.memory_space<vmem>>, vector<1x64x32xf32>
    %3 = vector.shape_cast %2 : vector<1x64x32xf32> to vector<64x32xf32>
    %c2 = arith.constant 2 : index
    %c0_4 = arith.constant 0 : index
    %c0_5 = arith.constant 0 : index
    %4 = vector.load %arg2[%c2, %c0_4, %c0_5] : memref<3x64x32xf32, #tpu.memory_space<vmem>>, vector<1x64x32xf32>
    %5 = vector.shape_cast %4 : vector<1x64x32xf32> to vector<64x32xf32>
    %cst = arith.constant 0.000000e+00 : f32
    %6 = vector.broadcast %cst : f32 to vector<34x32xf32>
    %cst_6 = arith.constant 0.000000e+00 : f32
    %7 = vector.broadcast %cst_6 : f32 to vector<1x64xf32>
    %c0_7 = arith.constant 0 : index
    %c0_8 = arith.constant 0 : index
    %8 = vector.load %arg9[%c0_7, %c0_8] : memref<64x64xf32, #tpu.memory_space<vmem>>, vector<1x64xf32>
    tpu.vector_store %arg9[%c0_7, %c0_8], %7 {strides = array<i32>} : memref<64x64xf32, #tpu.memory_space<vmem>>, vector<1x64xf32>,
    %cst_9 = arith.constant 0.000000e+00 : f32
    %9 = vector.broadcast %cst_9 : f32 to vector<1x64xf32>
    %c17 = arith.constant 17 : index
    %c0_10 = arith.constant 0 : index
    %10 = vector.load %arg9[%c17, %c0_10] : memref<64x64xf32, #tpu.memory_space<vmem>>, vector<1x64xf32>
    tpu.vector_store %arg9[%c17, %c0_10], %9 {strides = array<i32>} : memref<64x64xf32, #tpu.memory_space<vmem>>, vector<1x64xf32>,
    %c0_11 = arith.constant 0 : index
    %c0_12 = arith.constant 0 : index
    %11 = vector.load %arg1[%c0_11, %c0_12] : memref<32x64xf32, #tpu.memory_space<vmem>>, vector<16x64xf32>
    %cst_13 = arith.constant 0.000000e+00 : f32
    %12 = vector.broadcast %cst_13 : f32 to vector<16x64xf32>
    %13 = arith.maximumf %11, %12 : vector<16x64xf32>
    %c1_14 = arith.constant 1 : index
    %c0_15 = arith.constant 0 : index
    %14 = vector.load %arg9[%c1_14, %c0_15] : memref<64x64xf32, #tpu.memory_space<vmem>>, vector<16x64xf32>
    tpu.vector_store %arg9[%c1_14, %c0_15], %13 {strides = array<i32>} : memref<64x64xf32, #tpu.memory_space<vmem>>, vector<16x64xf32>,
    %cst_16 = arith.constant 0.000000e+00 : f32
    %15 = vector.broadcast %cst_16 : f32 to vector<1x64xf32>
    %c18 = arith.constant 18 : index
    %c0_17 = arith.constant 0 : index
    %16 = vector.load %arg9[%c18, %c0_17] : memref<64x64xf32, #tpu.memory_space<vmem>>, vector<1x64xf32>
    tpu.vector_store %arg9[%c18, %c0_17], %15 {strides = array<i32>} : memref<64x64xf32, #tpu.memory_space<vmem>>, vector<1x64xf32>,
    %cst_18 = arith.constant 0.000000e+00 : f32
    %17 = vector.broadcast %cst_18 : f32 to vector<1x64xf32>
    %c35 = arith.constant 35 : index
    %c0_19 = arith.constant 0 : index
    %18 = vector.load %arg9[%c35, %c0_19] : memref<64x64xf32, #tpu.memory_space<vmem>>, vector<1x64xf32>
    tpu.vector_store %arg9[%c35, %c0_19], %17 {strides = array<i32>} : memref<64x64xf32, #tpu.memory_space<vmem>>, vector<1x64xf32>,
    %c16 = arith.constant 16 : index
    %c0_20 = arith.constant 0 : index
    %19 = vector.load %arg1[%c16, %c0_20] : memref<32x64xf32, #tpu.memory_space<vmem>>, vector<16x64xf32>
    %cst_21 = arith.constant 0.000000e+00 : f32
    %20 = vector.broadcast %cst_21 : f32 to vector<16x64xf32>
    %21 = arith.maximumf %19, %20 : vector<16x64xf32>
    %c19 = arith.constant 19 : index
    %c0_22 = arith.constant 0 : index
    %22 = vector.load %arg9[%c19, %c0_22] : memref<64x64xf32, #tpu.memory_space<vmem>>, vector<16x64xf32>
    tpu.vector_store %arg9[%c19, %c0_22], %21 {strides = array<i32>} : memref<64x64xf32, #tpu.memory_space<vmem>>, vector<16x64xf32>,
    %c0_23 = arith.constant 0 : index
    %c0_24 = arith.constant 0 : index
    %23 = vector.load %arg9[%c0_23, %c0_24] : memref<64x64xf32, #tpu.memory_space<vmem>>, vector<34x64xf32>
    %cst_25 = arith.constant dense<0.000000e+00> : vector<34x32xf32>
    %24 = tpu.matmul %23, %1, %cst_25 {dimension_numbers = #tpu.dot_dimension_numbers<[1], [0], [0], [1], [0, 0, 1, 1], [], []>} : vector<34x64xf32>, vector<64x32xf32>, vector<34x32xf32> -> vector<34x32xf32>
    %25 = arith.addf %6, %24 : vector<34x32xf32>
    %c1_26 = arith.constant 1 : index
    %c0_27 = arith.constant 0 : index
    %26 = vector.load %arg9[%c1_26, %c0_27] : memref<64x64xf32, #tpu.memory_space<vmem>>, vector<34x64xf32>
    %cst_28 = arith.constant dense<0.000000e+00> : vector<34x32xf32>
    %27 = tpu.matmul %26, %3, %cst_28 {dimension_numbers = #tpu.dot_dimension_numbers<[1], [0], [0], [1], [0, 0, 1, 1], [], []>} : vector<34x64xf32>, vector<64x32xf32>, vector<34x32xf32> -> vector<34x32xf32>
    %28 = arith.addf %25, %27 : vector<34x32xf32>
    %c2_29 = arith.constant 2 : index
    %c0_30 = arith.constant 0 : index
    %29 = vector.load %arg9[%c2_29, %c0_30] : memref<64x64xf32, #tpu.memory_space<vmem>>, vector<34x64xf32>
    %cst_31 = arith.constant dense<0.000000e+00> : vector<34x32xf32>
    %30 = tpu.matmul %29, %5, %cst_31 {dimension_numbers = #tpu.dot_dimension_numbers<[1], [0], [0], [1], [0, 0, 1, 1], [], []>} : vector<34x64xf32>, vector<64x32xf32>, vector<34x32xf32> -> vector<34x32xf32>
    %31 = arith.addf %28, %30 : vector<34x32xf32>
    %c0_32 = arith.constant 0 : index
    %c0_33 = arith.constant 0 : index
    %32 = vector.load %arg3[%c0_32, %c0_33] : memref<1x32xf32, #tpu.memory_space<vmem>>, vector<1x32xf32>
    %33 = vector.broadcast %32 : vector<1x32xf32> to vector<34x32xf32>
    %34 = arith.addf %31, %33 : vector<34x32xf32>
    %35 = vector.extract_strided_slice %34 {offsets = [0, 0], sizes = [16, 32], strides = [1, 1]} : vector<34x32xf32> to vector<16x32xf32>
    %c0_34 = arith.constant 0 : index
    %c0_35 = arith.constant 0 : index
    %36 = vector.load %arg10[%c0_34, %c0_35] : memref<64x32xf32, #tpu.memory_space<vmem>>, vector<16x32xf32>
    tpu.vector_store %arg10[%c0_34, %c0_35], %35 {strides = array<i32>} : memref<64x32xf32, #tpu.memory_space<vmem>>, vector<16x32xf32>,
    %37 = vector.extract_strided_slice %34 {offsets = [18, 0], sizes = [16, 32], strides = [1, 1]} : vector<34x32xf32> to vector<16x32xf32>
    %c16_36 = arith.constant 16 : index
    %c0_37 = arith.constant 0 : index
    %38 = vector.load %arg10[%c16_36, %c0_37] : memref<64x32xf32, #tpu.memory_space<vmem>>, vector<16x32xf32>
    tpu.vector_store %arg10[%c16_36, %c0_37], %37 {strides = array<i32>} : memref<64x32xf32, #tpu.memory_space<vmem>>, vector<16x32xf32>,
    %c0_38 = arith.constant 0 : index
    %c0_39 = arith.constant 0 : index
    %c0_40 = arith.constant 0 : index
    %39 = vector.load %arg4[%c0_38, %c0_39, %c0_40] : memref<3x96x32xf32, #tpu.memory_space<vmem>>, vector<1x96x32xf32>
    %40 = vector.shape_cast %39 : vector<1x96x32xf32> to vector<96x32xf32>
    %c1_41 = arith.constant 1 : index
    %c0_42 = arith.constant 0 : index
    %c0_43 = arith.constant 0 : index
    %41 = vector.load %arg4[%c1_41, %c0_42, %c0_43] : memref<3x96x32xf32, #tpu.memory_space<vmem>>, vector<1x96x32xf32>
    %42 = vector.shape_cast %41 : vector<1x96x32xf32> to vector<96x32xf32>
    %c2_44 = arith.constant 2 : index
    %c0_45 = arith.constant 0 : index
    %c0_46 = arith.constant 0 : index
    %43 = vector.load %arg4[%c2_44, %c0_45, %c0_46] : memref<3x96x32xf32, #tpu.memory_space<vmem>>, vector<1x96x32xf32>
    %44 = vector.shape_cast %43 : vector<1x96x32xf32> to vector<96x32xf32>
    %cst_47 = arith.constant 0.000000e+00 : f32
    %45 = vector.broadcast %cst_47 : f32 to vector<48x32xf32>
    %cst_48 = arith.constant 0.000000e+00 : f32
    %46 = vector.broadcast %cst_48 : f32 to vector<8x64xf32>
    %c0_49 = arith.constant 0 : index
    %c0_50 = arith.constant 0 : index
    %47 = vector.load %arg9[%c0_49, %c0_50] : memref<64x64xf32, #tpu.memory_space<vmem>>, vector<8x64xf32>
    tpu.vector_store %arg9[%c0_49, %c0_50], %46 {strides = array<i32>} : memref<64x64xf32, #tpu.memory_space<vmem>>, vector<8x64xf32>,
    %cst_51 = arith.constant 0.000000e+00 : f32
    %48 = vector.broadcast %cst_51 : f32 to vector<8x64xf32>
    %c24 = arith.constant 24 : index
    %c0_52 = arith.constant 0 : index
    %49 = vector.load %arg9[%c24, %c0_52] : memref<64x64xf32, #tpu.memory_space<vmem>>, vector<8x64xf32>
    tpu.vector_store %arg9[%c24, %c0_52], %48 {strides = array<i32>} : memref<64x64xf32, #tpu.memory_space<vmem>>, vector<8x64xf32>,
    %c0_53 = arith.constant 0 : index
    %c0_54 = arith.constant 0 : index
    %50 = vector.load %arg1[%c0_53, %c0_54] : memref<32x64xf32, #tpu.memory_space<vmem>>, vector<16x64xf32>
    %cst_55 = arith.constant 0.000000e+00 : f32
    %51 = vector.broadcast %cst_55 : f32 to vector<16x64xf32>
    %52 = arith.maximumf %50, %51 : vector<16x64xf32>
    %c8 = arith.constant 8 : index
    %c0_56 = arith.constant 0 : index
    %53 = vector.load %arg9[%c8, %c0_56] : memref<64x64xf32, #tpu.memory_space<vmem>>, vector<16x64xf32>
    tpu.vector_store %arg9[%c8, %c0_56], %52 {strides = array<i32>} : memref<64x64xf32, #tpu.memory_space<vmem>>, vector<16x64xf32>,
    %cst_57 = arith.constant 0.000000e+00 : f32
    %54 = vector.broadcast %cst_57 : f32 to vector<8x64xf32>
    %c32 = arith.constant 32 : index
    %c0_58 = arith.constant 0 : index
    %55 = vector.load %arg9[%c32, %c0_58] : memref<64x64xf32, #tpu.memory_space<vmem>>, vector<8x64xf32>
    tpu.vector_store %arg9[%c32, %c0_58], %54 {strides = array<i32>} : memref<64x64xf32, #tpu.memory_space<vmem>>, vector<8x64xf32>,
    %cst_59 = arith.constant 0.000000e+00 : f32
    %56 = vector.broadcast %cst_59 : f32 to vector<8x64xf32>
    %c56 = arith.constant 56 : index
    %c0_60 = arith.constant 0 : index
    %57 = vector.load %arg9[%c56, %c0_60] : memref<64x64xf32, #tpu.memory_space<vmem>>, vector<8x64xf32>
    tpu.vector_store %arg9[%c56, %c0_60], %56 {strides = array<i32>} : memref<64x64xf32, #tpu.memory_space<vmem>>, vector<8x64xf32>,
    %c16_61 = arith.constant 16 : index
    %c0_62 = arith.constant 0 : index
    %58 = vector.load %arg1[%c16_61, %c0_62] : memref<32x64xf32, #tpu.memory_space<vmem>>, vector<16x64xf32>
    %cst_63 = arith.constant 0.000000e+00 : f32
    %59 = vector.broadcast %cst_63 : f32 to vector<16x64xf32>
    %60 = arith.maximumf %58, %59 : vector<16x64xf32>
    %c40 = arith.constant 40 : index
    %c0_64 = arith.constant 0 : index
    %61 = vector.load %arg9[%c40, %c0_64] : memref<64x64xf32, #tpu.memory_space<vmem>>, vector<16x64xf32>
    tpu.vector_store %arg9[%c40, %c0_64], %60 {strides = array<i32>} : memref<64x64xf32, #tpu.memory_space<vmem>>, vector<16x64xf32>,
    %62 = vector.extract_strided_slice %40 {offsets = [0, 0], sizes = [64, 32], strides = [1, 1]} : vector<96x32xf32> to vector<64x32xf32>
    %c0_65 = arith.constant 0 : index
    %c0_66 = arith.constant 0 : index
    %63 = vector.load %arg9[%c0_65, %c0_66] : memref<64x64xf32, #tpu.memory_space<vmem>>, vector<48x64xf32>
    %cst_67 = arith.constant dense<0.000000e+00> : vector<48x32xf32>
    %64 = tpu.matmul %63, %62, %cst_67 {dimension_numbers = #tpu.dot_dimension_numbers<[1], [0], [0], [1], [0, 0, 1, 1], [], []>} : vector<48x64xf32>, vector<64x32xf32>, vector<48x32xf32> -> vector<48x32xf32>
    %65 = arith.addf %45, %64 : vector<48x32xf32>
    %66 = vector.extract_strided_slice %42 {offsets = [0, 0], sizes = [64, 32], strides = [1, 1]} : vector<96x32xf32> to vector<64x32xf32>
    %c8_68 = arith.constant 8 : index
    %c0_69 = arith.constant 0 : index
    %67 = vector.load %arg9[%c8_68, %c0_69] : memref<64x64xf32, #tpu.memory_space<vmem>>, vector<48x64xf32>
    %cst_70 = arith.constant dense<0.000000e+00> : vector<48x32xf32>
    %68 = tpu.matmul %67, %66, %cst_70 {dimension_numbers = #tpu.dot_dimension_numbers<[1], [0], [0], [1], [0, 0, 1, 1], [], []>} : vector<48x64xf32>, vector<64x32xf32>, vector<48x32xf32> -> vector<48x32xf32>
    %69 = arith.addf %65, %68 : vector<48x32xf32>
    %70 = vector.extract_strided_slice %44 {offsets = [0, 0], sizes = [64, 32], strides = [1, 1]} : vector<96x32xf32> to vector<64x32xf32>
    %c16_71 = arith.constant 16 : index
    %c0_72 = arith.constant 0 : index
    %71 = vector.load %arg9[%c16_71, %c0_72] : memref<64x64xf32, #tpu.memory_space<vmem>>, vector<48x64xf32>
    %cst_73 = arith.constant dense<0.000000e+00> : vector<48x32xf32>
    %72 = tpu.matmul %71, %70, %cst_73 {dimension_numbers = #tpu.dot_dimension_numbers<[1], [0], [0], [1], [0, 0, 1, 1], [], []>} : vector<48x64xf32>, vector<64x32xf32>, vector<48x32xf32> -> vector<48x32xf32>
    %73 = arith.addf %69, %72 : vector<48x32xf32>
    %cst_74 = arith.constant 0.000000e+00 : f32
    %74 = vector.broadcast %cst_74 : f32 to vector<8x32xf32>
    %c0_75 = arith.constant 0 : index
    %c0_76 = arith.constant 0 : index
    %75 = vector.load %arg9[%c0_75, %c0_76] : memref<64x64xf32, #tpu.memory_space<vmem>>, vector<8x32xf32>
    tpu.vector_store %arg9[%c0_75, %c0_76], %74 {strides = array<i32>} : memref<64x64xf32, #tpu.memory_space<vmem>>, vector<8x32xf32>,
    %cst_77 = arith.constant 0.000000e+00 : f32
    %76 = vector.broadcast %cst_77 : f32 to vector<8x32xf32>
    %c24_78 = arith.constant 24 : index
    %c0_79 = arith.constant 0 : index
    %77 = vector.load %arg9[%c24_78, %c0_79] : memref<64x64xf32, #tpu.memory_space<vmem>>, vector<8x32xf32>
    tpu.vector_store %arg9[%c24_78, %c0_79], %76 {strides = array<i32>} : memref<64x64xf32, #tpu.memory_space<vmem>>, vector<8x32xf32>,
    %c0_80 = arith.constant 0 : index
    %c0_81 = arith.constant 0 : index
    %78 = vector.load %arg10[%c0_80, %c0_81] : memref<64x32xf32, #tpu.memory_space<vmem>>, vector<16x32xf32>
    %cst_82 = arith.constant 0.000000e+00 : f32
    %79 = vector.broadcast %cst_82 : f32 to vector<16x32xf32>
    %80 = arith.maximumf %78, %79 : vector<16x32xf32>
    %c8_83 = arith.constant 8 : index
    %c0_84 = arith.constant 0 : index
    %81 = vector.load %arg9[%c8_83, %c0_84] : memref<64x64xf32, #tpu.memory_space<vmem>>, vector<16x32xf32>
    tpu.vector_store %arg9[%c8_83, %c0_84], %80 {strides = array<i32>} : memref<64x64xf32, #tpu.memory_space<vmem>>, vector<16x32xf32>,
    %cst_85 = arith.constant 0.000000e+00 : f32
    %82 = vector.broadcast %cst_85 : f32 to vector<8x32xf32>
    %c32_86 = arith.constant 32 : index
    %c0_87 = arith.constant 0 : index
    %83 = vector.load %arg9[%c32_86, %c0_87] : memref<64x64xf32, #tpu.memory_space<vmem>>, vector<8x32xf32>
    tpu.vector_store %arg9[%c32_86, %c0_87], %82 {strides = array<i32>} : memref<64x64xf32, #tpu.memory_space<vmem>>, vector<8x32xf32>,
    %cst_88 = arith.constant 0.000000e+00 : f32
    %84 = vector.broadcast %cst_88 : f32 to vector<8x32xf32>
    %c56_89 = arith.constant 56 : index
    %c0_90 = arith.constant 0 : index
    %85 = vector.load %arg9[%c56_89, %c0_90] : memref<64x64xf32, #tpu.memory_space<vmem>>, vector<8x32xf32>
    tpu.vector_store %arg9[%c56_89, %c0_90], %84 {strides = array<i32>} : memref<64x64xf32, #tpu.memory_space<vmem>>, vector<8x32xf32>,
    %c16_91 = arith.constant 16 : index
    %c0_92 = arith.constant 0 : index
    %86 = vector.load %arg10[%c16_91, %c0_92] : memref<64x32xf32, #tpu.memory_space<vmem>>, vector<16x32xf32>
    %cst_93 = arith.constant 0.000000e+00 : f32
    %87 = vector.broadcast %cst_93 : f32 to vector<16x32xf32>
    %88 = arith.maximumf %86, %87 : vector<16x32xf32>
    %c40_94 = arith.constant 40 : index
    %c0_95 = arith.constant 0 : index
    %89 = vector.load %arg9[%c40_94, %c0_95] : memref<64x64xf32, #tpu.memory_space<vmem>>, vector<16x32xf32>
    tpu.vector_store %arg9[%c40_94, %c0_95], %88 {strides = array<i32>} : memref<64x64xf32, #tpu.memory_space<vmem>>, vector<16x32xf32>,
    %90 = vector.extract_strided_slice %40 {offsets = [64, 0], sizes = [32, 32], strides = [1, 1]} : vector<96x32xf32> to vector<32x32xf32>
    %c0_96 = arith.constant 0 : index
    %c0_97 = arith.constant 0 : index
    %91 = vector.load %arg9[%c0_96, %c0_97] : memref<64x64xf32, #tpu.memory_space<vmem>>, vector<48x32xf32>
    %cst_98 = arith.constant dense<0.000000e+00> : vector<48x32xf32>
    %92 = tpu.matmul %91, %90, %cst_98 {dimension_numbers = #tpu.dot_dimension_numbers<[1], [0], [0], [1], [0, 0, 1, 1], [], []>} : vector<48x32xf32>, vector<32x32xf32>, vector<48x32xf32> -> vector<48x32xf32>
    %93 = arith.addf %73, %92 : vector<48x32xf32>
    %94 = vector.extract_strided_slice %42 {offsets = [64, 0], sizes = [32, 32], strides = [1, 1]} : vector<96x32xf32> to vector<32x32xf32>
    %c8_99 = arith.constant 8 : index
    %c0_100 = arith.constant 0 : index
    %95 = vector.load %arg9[%c8_99, %c0_100] : memref<64x64xf32, #tpu.memory_space<vmem>>, vector<48x32xf32>
    %cst_101 = arith.constant dense<0.000000e+00> : vector<48x32xf32>
    %96 = tpu.matmul %95, %94, %cst_101 {dimension_numbers = #tpu.dot_dimension_numbers<[1], [0], [0], [1], [0, 0, 1, 1], [], []>} : vector<48x32xf32>, vector<32x32xf32>, vector<48x32xf32> -> vector<48x32xf32>
    %97 = arith.addf %93, %96 : vector<48x32xf32>
    %98 = vector.extract_strided_slice %44 {offsets = [64, 0], sizes = [32, 32], strides = [1, 1]} : vector<96x32xf32> to vector<32x32xf32>
    %c16_102 = arith.constant 16 : index
    %c0_103 = arith.constant 0 : index
    %99 = vector.load %arg9[%c16_102, %c0_103] : memref<64x64xf32, #tpu.memory_space<vmem>>, vector<48x32xf32>
    %cst_104 = arith.constant dense<0.000000e+00> : vector<48x32xf32>
    %100 = tpu.matmul %99, %98, %cst_104 {dimension_numbers = #tpu.dot_dimension_numbers<[1], [0], [0], [1], [0, 0, 1, 1], [], []>} : vector<48x32xf32>, vector<32x32xf32>, vector<48x32xf32> -> vector<48x32xf32>
    %101 = arith.addf %97, %100 : vector<48x32xf32>
    %c0_105 = arith.constant 0 : index
    %c0_106 = arith.constant 0 : index
    %102 = vector.load %arg5[%c0_105, %c0_106] : memref<1x32xf32, #tpu.memory_space<vmem>>, vector<1x32xf32>
    %103 = vector.broadcast %102 : vector<1x32xf32> to vector<48x32xf32>
    %104 = arith.addf %101, %103 : vector<48x32xf32>
    %105 = vector.extract_strided_slice %104 {offsets = [0, 0], sizes = [16, 32], strides = [1, 1]} : vector<48x32xf32> to vector<16x32xf32>
    %c32_107 = arith.constant 32 : index
    %c0_108 = arith.constant 0 : index
    %106 = vector.load %arg10[%c32_107, %c0_108] : memref<64x32xf32, #tpu.memory_space<vmem>>, vector<16x32xf32>
    tpu.vector_store %arg10[%c32_107, %c0_108], %105 {strides = array<i32>} : memref<64x32xf32, #tpu.memory_space<vmem>>, vector<16x32xf32>,
    %107 = vector.extract_strided_slice %104 {offsets = [32, 0], sizes = [16, 32], strides = [1, 1]} : vector<48x32xf32> to vector<16x32xf32>
    %c48 = arith.constant 48 : index
    %c0_109 = arith.constant 0 : index
    %108 = vector.load %arg10[%c48, %c0_109] : memref<64x32xf32, #tpu.memory_space<vmem>>, vector<16x32xf32>
    tpu.vector_store %arg10[%c48, %c0_109], %107 {strides = array<i32>} : memref<64x32xf32, #tpu.memory_space<vmem>>, vector<16x32xf32>,
    %c0_110 = arith.constant 0 : index
    %c0_111 = arith.constant 0 : index
    %109 = tpu.strided_load %arg1[%c0_110, %c0_111] {strides = array<i32: 2, 1>} : memref<32x64xf32, #tpu.memory_space<vmem>>, vector<16x64xf32>
    %cst_112 = arith.constant 0.000000e+00 : f32
    %110 = vector.broadcast %cst_112 : f32 to vector<16x64xf32>
    %111 = arith.maximumf %109, %110 : vector<16x64xf32>
    %c1_113 = arith.constant 1 : index
    %c0_114 = arith.constant 0 : index
    %112 = tpu.strided_load %arg1[%c1_113, %c0_114] {strides = array<i32: 2, 1>} : memref<32x64xf32, #tpu.memory_space<vmem>>, vector<16x64xf32>
    %cst_115 = arith.constant 0.000000e+00 : f32
    %113 = vector.broadcast %cst_115 : f32 to vector<16x64xf32>
    %114 = arith.maximumf %112, %113 : vector<16x64xf32>
    %115 = arith.addf %111, %114 : vector<16x64xf32>
    %cst_116 = arith.constant 5.000000e-01 : f32
    %116 = vector.broadcast %cst_116 : f32 to vector<16x64xf32>
    %117 = arith.mulf %115, %116 : vector<16x64xf32>
    %c0_117 = arith.constant 0 : index
    %c0_118 = arith.constant 0 : index
    %118 = vector.load %arg6[%c0_117, %c0_118] : memref<128x64xf32, #tpu.memory_space<vmem>>, vector<64x64xf32>
    %cst_119 = arith.constant dense<0.000000e+00> : vector<16x64xf32>
    %119 = tpu.matmul %117, %118, %cst_119 {dimension_numbers = #tpu.dot_dimension_numbers<[1], [0], [0], [1], [0, 0, 1, 1], [], []>} : vector<16x64xf32>, vector<64x64xf32>, vector<16x64xf32> -> vector<16x64xf32>
    %c0_120 = arith.constant 0 : index
    %c0_121 = arith.constant 0 : index
    %120 = tpu.strided_load %arg10[%c0_120, %c0_121] {strides = array<i32: 2, 1>} : memref<64x32xf32, #tpu.memory_space<vmem>>, vector<16x32xf32>
    %cst_122 = arith.constant 0.000000e+00 : f32
    %121 = vector.broadcast %cst_122 : f32 to vector<16x32xf32>
    %122 = arith.maximumf %120, %121 : vector<16x32xf32>
    %c1_123 = arith.constant 1 : index
    %c0_124 = arith.constant 0 : index
    %123 = tpu.strided_load %arg10[%c1_123, %c0_124] {strides = array<i32: 2, 1>} : memref<64x32xf32, #tpu.memory_space<vmem>>, vector<16x32xf32>
    %cst_125 = arith.constant 0.000000e+00 : f32
    %124 = vector.broadcast %cst_125 : f32 to vector<16x32xf32>
    %125 = arith.maximumf %123, %124 : vector<16x32xf32>
    %126 = arith.addf %122, %125 : vector<16x32xf32>
    %cst_126 = arith.constant 5.000000e-01 : f32
    %127 = vector.broadcast %cst_126 : f32 to vector<16x32xf32>
    %128 = arith.mulf %126, %127 : vector<16x32xf32>
    %c64 = arith.constant 64 : index
    %c0_127 = arith.constant 0 : index
    %129 = vector.load %arg6[%c64, %c0_127] : memref<128x64xf32, #tpu.memory_space<vmem>>, vector<32x64xf32>
    %cst_128 = arith.constant dense<0.000000e+00> : vector<16x64xf32>
    %130 = tpu.matmul %128, %129, %cst_128 {dimension_numbers = #tpu.dot_dimension_numbers<[1], [0], [0], [1], [0, 0, 1, 1], [], []>} : vector<16x32xf32>, vector<32x64xf32>, vector<16x64xf32> -> vector<16x64xf32>
    %131 = arith.addf %119, %130 : vector<16x64xf32>
    %c32_129 = arith.constant 32 : index
    %c0_130 = arith.constant 0 : index
    %132 = tpu.strided_load %arg10[%c32_129, %c0_130] {strides = array<i32: 2, 1>} : memref<64x32xf32, #tpu.memory_space<vmem>>, vector<16x32xf32>
    %cst_131 = arith.constant 0.000000e+00 : f32
    %133 = vector.broadcast %cst_131 : f32 to vector<16x32xf32>
    %134 = arith.maximumf %132, %133 : vector<16x32xf32>
    %c33 = arith.constant 33 : index
    %c0_132 = arith.constant 0 : index
    %135 = tpu.strided_load %arg10[%c33, %c0_132] {strides = array<i32: 2, 1>} : memref<64x32xf32, #tpu.memory_space<vmem>>, vector<16x32xf32>
    %cst_133 = arith.constant 0.000000e+00 : f32
    %136 = vector.broadcast %cst_133 : f32 to vector<16x32xf32>
    %137 = arith.maximumf %135, %136 : vector<16x32xf32>
    %138 = arith.addf %134, %137 : vector<16x32xf32>
    %cst_134 = arith.constant 5.000000e-01 : f32
    %139 = vector.broadcast %cst_134 : f32 to vector<16x32xf32>
    %140 = arith.mulf %138, %139 : vector<16x32xf32>
    %c96 = arith.constant 96 : index
    %c0_135 = arith.constant 0 : index
    %141 = vector.load %arg6[%c96, %c0_135] : memref<128x64xf32, #tpu.memory_space<vmem>>, vector<32x64xf32>
    %cst_136 = arith.constant dense<0.000000e+00> : vector<16x64xf32>
    %142 = tpu.matmul %140, %141, %cst_136 {dimension_numbers = #tpu.dot_dimension_numbers<[1], [0], [0], [1], [0, 0, 1, 1], [], []>} : vector<16x32xf32>, vector<32x64xf32>, vector<16x64xf32> -> vector<16x64xf32>
    %143 = arith.addf %131, %142 : vector<16x64xf32>
    %c0_137 = arith.constant 0 : index
    %c0_138 = arith.constant 0 : index
    %144 = vector.load %arg7[%c0_137, %c0_138] : memref<1x64xf32, #tpu.memory_space<vmem>>, vector<1x64xf32>
    %145 = vector.broadcast %144 : vector<1x64xf32> to vector<16x64xf32>
    %146 = arith.addf %143, %145 : vector<16x64xf32>
    %c0_139 = arith.constant 0 : index
    %c0_140 = arith.constant 0 : index
    %147 = vector.load %arg8[%c0_139, %c0_140] : memref<16x64xf32, #tpu.memory_space<vmem>>, vector<16x64xf32>
    tpu.vector_store %arg8[%c0_139, %c0_140], %146 {strides = array<i32>} : memref<16x64xf32, #tpu.memory_space<vmem>>, vector<16x64xf32>,
    return
  }
  func.func @transform_0(%arg0: i32) -> (i32, i32) {
    %c0_i32 = arith.constant 0 : i32
    %c0_i32_0 = arith.constant 0 : i32
    %c0_i32_1 = arith.constant 0 : i32
    return %c0_i32, %c0_i32_0 : i32, i32
  }
  func.func @transform_1(%arg0: i32) -> (i32, i32, i32) {
    %c0_i32 = arith.constant 0 : i32
    %c0_i32_0 = arith.constant 0 : i32
    %c0_i32_1 = arith.constant 0 : i32
    %c0_i32_2 = arith.constant 0 : i32
    return %c0_i32, %c0_i32_0, %c0_i32_1 : i32, i32, i32
  }
  func.func @transform_2(%arg0: i32) -> (i32, i32) {
    %c0_i32 = arith.constant 0 : i32
    %c0_i32_0 = arith.constant 0 : i32
    %c0_i32_1 = arith.constant 0 : i32
    return %c0_i32, %c0_i32_0 : i32, i32
  }
  func.func @transform_3(%arg0: i32) -> (i32, i32, i32) {
    %c0_i32 = arith.constant 0 : i32
    %c0_i32_0 = arith.constant 0 : i32
    %c0_i32_1 = arith.constant 0 : i32
    %c0_i32_2 = arith.constant 0 : i32
    return %c0_i32, %c0_i32_0, %c0_i32_1 : i32, i32, i32
  }
  func.func @transform_4(%arg0: i32) -> (i32, i32) {
    %c0_i32 = arith.constant 0 : i32
    %c0_i32_0 = arith.constant 0 : i32
    %c0_i32_1 = arith.constant 0 : i32
    return %c0_i32, %c0_i32_0 : i32, i32
  }
  func.func @transform_5(%arg0: i32) -> (i32, i32) {
    %c0_i32 = arith.constant 0 : i32
    %c0_i32_0 = arith.constant 0 : i32
    %c0_i32_1 = arith.constant 0 : i32
    return %c0_i32, %c0_i32_0 : i32, i32
  }
  func.func @transform_6(%arg0: i32) -> (i32, i32) {
    %c0_i32 = arith.constant 0 : i32
    %c0_i32_0 = arith.constant 0 : i32
    %c0_i32_1 = arith.constant 0 : i32
    return %c0_i32, %c0_i32_0 : i32, i32
  }
  func.func @transform_7(%arg0: i32) -> (i32, i32) {
    %c0_i32 = arith.constant 0 : i32
    %c0_i32_0 = arith.constant 0 : i32
    %c0_i32_1 = arith.constant 0 : i32
    return %c0_i32, %c0_i32_0 : i32, i32
  }
}

module attributes {stable_mosaic.version = 11 : i64} {
  func.func @_stack_kernel(%arg0: i32, %arg1: memref<64x64xf32, #tpu.memory_space<vmem>>, %arg2: memref<3x64x32xf32, #tpu.memory_space<vmem>>, %arg3: memref<1x32xf32, #tpu.memory_space<vmem>>, %arg4: memref<3x96x32xf32, #tpu.memory_space<vmem>>, %arg5: memref<1x32xf32, #tpu.memory_space<vmem>>, %arg6: memref<128x64xf32, #tpu.memory_space<vmem>>, %arg7: memref<1x64xf32, #tpu.memory_space<vmem>>, %arg8: memref<32x64xf32, #tpu.memory_space<vmem>>, %arg9: memref<96x64xf32, #tpu.memory_space<vmem>>, %arg10: memref<128x32xf32, #tpu.memory_space<vmem>>) attributes {dimension_semantics = [#tpu.dimension_semantics<arbitrary>], iteration_bounds = array<i64: 1>, scalar_prefetch = 0 : i64, scratch_operands = 2 : i64, tpu.core_type = #tpu.core_type<tc>, window_params = [{pipeline_mode = #tpu.pipeline_mode<synchronous>, transform_indices = @transform_0, window_bounds = array<i64: 64, 64>}, {pipeline_mode = #tpu.pipeline_mode<synchronous>, transform_indices = @transform_1, window_bounds = array<i64: 3, 64, 32>}, {pipeline_mode = #tpu.pipeline_mode<synchronous>, transform_indices = @transform_2, window_bounds = array<i64: 1, 32>}, {pipeline_mode = #tpu.pipeline_mode<synchronous>, transform_indices = @transform_3, window_bounds = array<i64: 3, 96, 32>}, {pipeline_mode = #tpu.pipeline_mode<synchronous>, transform_indices = @transform_4, window_bounds = array<i64: 1, 32>}, {pipeline_mode = #tpu.pipeline_mode<synchronous>, transform_indices = @transform_5, window_bounds = array<i64: 128, 64>}, {pipeline_mode = #tpu.pipeline_mode<synchronous>, transform_indices = @transform_6, window_bounds = array<i64: 1, 64>}, {pipeline_mode = #tpu.pipeline_mode<synchronous>, transform_indices = @transform_7, window_bounds = array<i64: 32, 64>}]} {
    %c0 = arith.constant 0 : index
    %c0_0 = arith.constant 0 : index
    %c0_1 = arith.constant 0 : index
    %0 = vector.load %arg2[%c0, %c0_0, %c0_1] : memref<3x64x32xf32, #tpu.memory_space<vmem>>, vector<1x64x32xf32>
    %1 = vector.shape_cast %0 : vector<1x64x32xf32> to vector<64x32xf32>
    %c1 = arith.constant 1 : index
    %c0_2 = arith.constant 0 : index
    %c0_3 = arith.constant 0 : index
    %2 = vector.load %arg2[%c1, %c0_2, %c0_3] : memref<3x64x32xf32, #tpu.memory_space<vmem>>, vector<1x64x32xf32>
    %3 = vector.shape_cast %2 : vector<1x64x32xf32> to vector<64x32xf32>
    %c2 = arith.constant 2 : index
    %c0_4 = arith.constant 0 : index
    %c0_5 = arith.constant 0 : index
    %4 = vector.load %arg2[%c2, %c0_4, %c0_5] : memref<3x64x32xf32, #tpu.memory_space<vmem>>, vector<1x64x32xf32>
    %5 = vector.shape_cast %4 : vector<1x64x32xf32> to vector<64x32xf32>
    %cst = arith.constant 0.000000e+00 : f32
    %6 = vector.broadcast %cst : f32 to vector<66x32xf32>
    %cst_6 = arith.constant 0.000000e+00 : f32
    %7 = vector.broadcast %cst_6 : f32 to vector<1x64xf32>
    %c0_7 = arith.constant 0 : index
    %c0_8 = arith.constant 0 : index
    %8 = vector.load %arg9[%c0_7, %c0_8] : memref<96x64xf32, #tpu.memory_space<vmem>>, vector<1x64xf32>
    tpu.vector_store %arg9[%c0_7, %c0_8], %7 {strides = array<i32>} : memref<96x64xf32, #tpu.memory_space<vmem>>, vector<1x64xf32>,
    %cst_9 = arith.constant 0.000000e+00 : f32
    %9 = vector.broadcast %cst_9 : f32 to vector<1x64xf32>
    %c33 = arith.constant 33 : index
    %c0_10 = arith.constant 0 : index
    %10 = vector.load %arg9[%c33, %c0_10] : memref<96x64xf32, #tpu.memory_space<vmem>>, vector<1x64xf32>
    tpu.vector_store %arg9[%c33, %c0_10], %9 {strides = array<i32>} : memref<96x64xf32, #tpu.memory_space<vmem>>, vector<1x64xf32>,
    %c0_11 = arith.constant 0 : index
    %c0_12 = arith.constant 0 : index
    %11 = vector.load %arg1[%c0_11, %c0_12] : memref<64x64xf32, #tpu.memory_space<vmem>>, vector<32x64xf32>
    %cst_13 = arith.constant 0.000000e+00 : f32
    %12 = vector.broadcast %cst_13 : f32 to vector<32x64xf32>
    %13 = arith.maximumf %11, %12 : vector<32x64xf32>
    %c1_14 = arith.constant 1 : index
    %c0_15 = arith.constant 0 : index
    %14 = vector.load %arg9[%c1_14, %c0_15] : memref<96x64xf32, #tpu.memory_space<vmem>>, vector<32x64xf32>
    tpu.vector_store %arg9[%c1_14, %c0_15], %13 {strides = array<i32>} : memref<96x64xf32, #tpu.memory_space<vmem>>, vector<32x64xf32>,
    %cst_16 = arith.constant 0.000000e+00 : f32
    %15 = vector.broadcast %cst_16 : f32 to vector<1x64xf32>
    %c34 = arith.constant 34 : index
    %c0_17 = arith.constant 0 : index
    %16 = vector.load %arg9[%c34, %c0_17] : memref<96x64xf32, #tpu.memory_space<vmem>>, vector<1x64xf32>
    tpu.vector_store %arg9[%c34, %c0_17], %15 {strides = array<i32>} : memref<96x64xf32, #tpu.memory_space<vmem>>, vector<1x64xf32>,
    %cst_18 = arith.constant 0.000000e+00 : f32
    %17 = vector.broadcast %cst_18 : f32 to vector<1x64xf32>
    %c67 = arith.constant 67 : index
    %c0_19 = arith.constant 0 : index
    %18 = vector.load %arg9[%c67, %c0_19] : memref<96x64xf32, #tpu.memory_space<vmem>>, vector<1x64xf32>
    tpu.vector_store %arg9[%c67, %c0_19], %17 {strides = array<i32>} : memref<96x64xf32, #tpu.memory_space<vmem>>, vector<1x64xf32>,
    %c32 = arith.constant 32 : index
    %c0_20 = arith.constant 0 : index
    %19 = vector.load %arg1[%c32, %c0_20] : memref<64x64xf32, #tpu.memory_space<vmem>>, vector<32x64xf32>
    %cst_21 = arith.constant 0.000000e+00 : f32
    %20 = vector.broadcast %cst_21 : f32 to vector<32x64xf32>
    %21 = arith.maximumf %19, %20 : vector<32x64xf32>
    %c35 = arith.constant 35 : index
    %c0_22 = arith.constant 0 : index
    %22 = vector.load %arg9[%c35, %c0_22] : memref<96x64xf32, #tpu.memory_space<vmem>>, vector<32x64xf32>
    tpu.vector_store %arg9[%c35, %c0_22], %21 {strides = array<i32>} : memref<96x64xf32, #tpu.memory_space<vmem>>, vector<32x64xf32>,
    %c0_23 = arith.constant 0 : index
    %c0_24 = arith.constant 0 : index
    %23 = vector.load %arg9[%c0_23, %c0_24] : memref<96x64xf32, #tpu.memory_space<vmem>>, vector<66x64xf32>
    %cst_25 = arith.constant dense<0.000000e+00> : vector<66x32xf32>
    %24 = tpu.matmul %23, %1, %cst_25 {dimension_numbers = #tpu.dot_dimension_numbers<[1], [0], [0], [1], [0, 0, 1, 1], [], []>} : vector<66x64xf32>, vector<64x32xf32>, vector<66x32xf32> -> vector<66x32xf32>
    %25 = arith.addf %6, %24 : vector<66x32xf32>
    %c1_26 = arith.constant 1 : index
    %c0_27 = arith.constant 0 : index
    %26 = vector.load %arg9[%c1_26, %c0_27] : memref<96x64xf32, #tpu.memory_space<vmem>>, vector<66x64xf32>
    %cst_28 = arith.constant dense<0.000000e+00> : vector<66x32xf32>
    %27 = tpu.matmul %26, %3, %cst_28 {dimension_numbers = #tpu.dot_dimension_numbers<[1], [0], [0], [1], [0, 0, 1, 1], [], []>} : vector<66x64xf32>, vector<64x32xf32>, vector<66x32xf32> -> vector<66x32xf32>
    %28 = arith.addf %25, %27 : vector<66x32xf32>
    %c2_29 = arith.constant 2 : index
    %c0_30 = arith.constant 0 : index
    %29 = vector.load %arg9[%c2_29, %c0_30] : memref<96x64xf32, #tpu.memory_space<vmem>>, vector<66x64xf32>
    %cst_31 = arith.constant dense<0.000000e+00> : vector<66x32xf32>
    %30 = tpu.matmul %29, %5, %cst_31 {dimension_numbers = #tpu.dot_dimension_numbers<[1], [0], [0], [1], [0, 0, 1, 1], [], []>} : vector<66x64xf32>, vector<64x32xf32>, vector<66x32xf32> -> vector<66x32xf32>
    %31 = arith.addf %28, %30 : vector<66x32xf32>
    %c0_32 = arith.constant 0 : index
    %c0_33 = arith.constant 0 : index
    %32 = vector.load %arg3[%c0_32, %c0_33] : memref<1x32xf32, #tpu.memory_space<vmem>>, vector<1x32xf32>
    %33 = vector.broadcast %32 : vector<1x32xf32> to vector<66x32xf32>
    %34 = arith.addf %31, %33 : vector<66x32xf32>
    %35 = vector.extract_strided_slice %34 {offsets = [0, 0], sizes = [32, 32], strides = [1, 1]} : vector<66x32xf32> to vector<32x32xf32>
    %c0_34 = arith.constant 0 : index
    %c0_35 = arith.constant 0 : index
    %36 = vector.load %arg10[%c0_34, %c0_35] : memref<128x32xf32, #tpu.memory_space<vmem>>, vector<32x32xf32>
    tpu.vector_store %arg10[%c0_34, %c0_35], %35 {strides = array<i32>} : memref<128x32xf32, #tpu.memory_space<vmem>>, vector<32x32xf32>,
    %37 = vector.extract_strided_slice %34 {offsets = [34, 0], sizes = [32, 32], strides = [1, 1]} : vector<66x32xf32> to vector<32x32xf32>
    %c32_36 = arith.constant 32 : index
    %c0_37 = arith.constant 0 : index
    %38 = vector.load %arg10[%c32_36, %c0_37] : memref<128x32xf32, #tpu.memory_space<vmem>>, vector<32x32xf32>
    tpu.vector_store %arg10[%c32_36, %c0_37], %37 {strides = array<i32>} : memref<128x32xf32, #tpu.memory_space<vmem>>, vector<32x32xf32>,
    %c0_38 = arith.constant 0 : index
    %c0_39 = arith.constant 0 : index
    %c0_40 = arith.constant 0 : index
    %39 = vector.load %arg4[%c0_38, %c0_39, %c0_40] : memref<3x96x32xf32, #tpu.memory_space<vmem>>, vector<1x96x32xf32>
    %40 = vector.shape_cast %39 : vector<1x96x32xf32> to vector<96x32xf32>
    %c1_41 = arith.constant 1 : index
    %c0_42 = arith.constant 0 : index
    %c0_43 = arith.constant 0 : index
    %41 = vector.load %arg4[%c1_41, %c0_42, %c0_43] : memref<3x96x32xf32, #tpu.memory_space<vmem>>, vector<1x96x32xf32>
    %42 = vector.shape_cast %41 : vector<1x96x32xf32> to vector<96x32xf32>
    %c2_44 = arith.constant 2 : index
    %c0_45 = arith.constant 0 : index
    %c0_46 = arith.constant 0 : index
    %43 = vector.load %arg4[%c2_44, %c0_45, %c0_46] : memref<3x96x32xf32, #tpu.memory_space<vmem>>, vector<1x96x32xf32>
    %44 = vector.shape_cast %43 : vector<1x96x32xf32> to vector<96x32xf32>
    %cst_47 = arith.constant 0.000000e+00 : f32
    %45 = vector.broadcast %cst_47 : f32 to vector<80x32xf32>
    %cst_48 = arith.constant 0.000000e+00 : f32
    %46 = vector.broadcast %cst_48 : f32 to vector<8x64xf32>
    %c0_49 = arith.constant 0 : index
    %c0_50 = arith.constant 0 : index
    %47 = vector.load %arg9[%c0_49, %c0_50] : memref<96x64xf32, #tpu.memory_space<vmem>>, vector<8x64xf32>
    tpu.vector_store %arg9[%c0_49, %c0_50], %46 {strides = array<i32>} : memref<96x64xf32, #tpu.memory_space<vmem>>, vector<8x64xf32>,
    %cst_51 = arith.constant 0.000000e+00 : f32
    %48 = vector.broadcast %cst_51 : f32 to vector<8x64xf32>
    %c40 = arith.constant 40 : index
    %c0_52 = arith.constant 0 : index
    %49 = vector.load %arg9[%c40, %c0_52] : memref<96x64xf32, #tpu.memory_space<vmem>>, vector<8x64xf32>
    tpu.vector_store %arg9[%c40, %c0_52], %48 {strides = array<i32>} : memref<96x64xf32, #tpu.memory_space<vmem>>, vector<8x64xf32>,
    %c0_53 = arith.constant 0 : index
    %c0_54 = arith.constant 0 : index
    %50 = vector.load %arg1[%c0_53, %c0_54] : memref<64x64xf32, #tpu.memory_space<vmem>>, vector<32x64xf32>
    %cst_55 = arith.constant 0.000000e+00 : f32
    %51 = vector.broadcast %cst_55 : f32 to vector<32x64xf32>
    %52 = arith.maximumf %50, %51 : vector<32x64xf32>
    %c8 = arith.constant 8 : index
    %c0_56 = arith.constant 0 : index
    %53 = vector.load %arg9[%c8, %c0_56] : memref<96x64xf32, #tpu.memory_space<vmem>>, vector<32x64xf32>
    tpu.vector_store %arg9[%c8, %c0_56], %52 {strides = array<i32>} : memref<96x64xf32, #tpu.memory_space<vmem>>, vector<32x64xf32>,
    %cst_57 = arith.constant 0.000000e+00 : f32
    %54 = vector.broadcast %cst_57 : f32 to vector<8x64xf32>
    %c48 = arith.constant 48 : index
    %c0_58 = arith.constant 0 : index
    %55 = vector.load %arg9[%c48, %c0_58] : memref<96x64xf32, #tpu.memory_space<vmem>>, vector<8x64xf32>
    tpu.vector_store %arg9[%c48, %c0_58], %54 {strides = array<i32>} : memref<96x64xf32, #tpu.memory_space<vmem>>, vector<8x64xf32>,
    %cst_59 = arith.constant 0.000000e+00 : f32
    %56 = vector.broadcast %cst_59 : f32 to vector<8x64xf32>
    %c88 = arith.constant 88 : index
    %c0_60 = arith.constant 0 : index
    %57 = vector.load %arg9[%c88, %c0_60] : memref<96x64xf32, #tpu.memory_space<vmem>>, vector<8x64xf32>
    tpu.vector_store %arg9[%c88, %c0_60], %56 {strides = array<i32>} : memref<96x64xf32, #tpu.memory_space<vmem>>, vector<8x64xf32>,
    %c32_61 = arith.constant 32 : index
    %c0_62 = arith.constant 0 : index
    %58 = vector.load %arg1[%c32_61, %c0_62] : memref<64x64xf32, #tpu.memory_space<vmem>>, vector<32x64xf32>
    %cst_63 = arith.constant 0.000000e+00 : f32
    %59 = vector.broadcast %cst_63 : f32 to vector<32x64xf32>
    %60 = arith.maximumf %58, %59 : vector<32x64xf32>
    %c56 = arith.constant 56 : index
    %c0_64 = arith.constant 0 : index
    %61 = vector.load %arg9[%c56, %c0_64] : memref<96x64xf32, #tpu.memory_space<vmem>>, vector<32x64xf32>
    tpu.vector_store %arg9[%c56, %c0_64], %60 {strides = array<i32>} : memref<96x64xf32, #tpu.memory_space<vmem>>, vector<32x64xf32>,
    %62 = vector.extract_strided_slice %40 {offsets = [0, 0], sizes = [64, 32], strides = [1, 1]} : vector<96x32xf32> to vector<64x32xf32>
    %c0_65 = arith.constant 0 : index
    %c0_66 = arith.constant 0 : index
    %63 = vector.load %arg9[%c0_65, %c0_66] : memref<96x64xf32, #tpu.memory_space<vmem>>, vector<80x64xf32>
    %cst_67 = arith.constant dense<0.000000e+00> : vector<80x32xf32>
    %64 = tpu.matmul %63, %62, %cst_67 {dimension_numbers = #tpu.dot_dimension_numbers<[1], [0], [0], [1], [0, 0, 1, 1], [], []>} : vector<80x64xf32>, vector<64x32xf32>, vector<80x32xf32> -> vector<80x32xf32>
    %65 = arith.addf %45, %64 : vector<80x32xf32>
    %66 = vector.extract_strided_slice %42 {offsets = [0, 0], sizes = [64, 32], strides = [1, 1]} : vector<96x32xf32> to vector<64x32xf32>
    %c8_68 = arith.constant 8 : index
    %c0_69 = arith.constant 0 : index
    %67 = vector.load %arg9[%c8_68, %c0_69] : memref<96x64xf32, #tpu.memory_space<vmem>>, vector<80x64xf32>
    %cst_70 = arith.constant dense<0.000000e+00> : vector<80x32xf32>
    %68 = tpu.matmul %67, %66, %cst_70 {dimension_numbers = #tpu.dot_dimension_numbers<[1], [0], [0], [1], [0, 0, 1, 1], [], []>} : vector<80x64xf32>, vector<64x32xf32>, vector<80x32xf32> -> vector<80x32xf32>
    %69 = arith.addf %65, %68 : vector<80x32xf32>
    %70 = vector.extract_strided_slice %44 {offsets = [0, 0], sizes = [64, 32], strides = [1, 1]} : vector<96x32xf32> to vector<64x32xf32>
    %c16 = arith.constant 16 : index
    %c0_71 = arith.constant 0 : index
    %71 = vector.load %arg9[%c16, %c0_71] : memref<96x64xf32, #tpu.memory_space<vmem>>, vector<80x64xf32>
    %cst_72 = arith.constant dense<0.000000e+00> : vector<80x32xf32>
    %72 = tpu.matmul %71, %70, %cst_72 {dimension_numbers = #tpu.dot_dimension_numbers<[1], [0], [0], [1], [0, 0, 1, 1], [], []>} : vector<80x64xf32>, vector<64x32xf32>, vector<80x32xf32> -> vector<80x32xf32>
    %73 = arith.addf %69, %72 : vector<80x32xf32>
    %cst_73 = arith.constant 0.000000e+00 : f32
    %74 = vector.broadcast %cst_73 : f32 to vector<8x32xf32>
    %c0_74 = arith.constant 0 : index
    %c0_75 = arith.constant 0 : index
    %75 = vector.load %arg9[%c0_74, %c0_75] : memref<96x64xf32, #tpu.memory_space<vmem>>, vector<8x32xf32>
    tpu.vector_store %arg9[%c0_74, %c0_75], %74 {strides = array<i32>} : memref<96x64xf32, #tpu.memory_space<vmem>>, vector<8x32xf32>,
    %cst_76 = arith.constant 0.000000e+00 : f32
    %76 = vector.broadcast %cst_76 : f32 to vector<8x32xf32>
    %c40_77 = arith.constant 40 : index
    %c0_78 = arith.constant 0 : index
    %77 = vector.load %arg9[%c40_77, %c0_78] : memref<96x64xf32, #tpu.memory_space<vmem>>, vector<8x32xf32>
    tpu.vector_store %arg9[%c40_77, %c0_78], %76 {strides = array<i32>} : memref<96x64xf32, #tpu.memory_space<vmem>>, vector<8x32xf32>,
    %c0_79 = arith.constant 0 : index
    %c0_80 = arith.constant 0 : index
    %78 = vector.load %arg10[%c0_79, %c0_80] : memref<128x32xf32, #tpu.memory_space<vmem>>, vector<32x32xf32>
    %cst_81 = arith.constant 0.000000e+00 : f32
    %79 = vector.broadcast %cst_81 : f32 to vector<32x32xf32>
    %80 = arith.maximumf %78, %79 : vector<32x32xf32>
    %c8_82 = arith.constant 8 : index
    %c0_83 = arith.constant 0 : index
    %81 = vector.load %arg9[%c8_82, %c0_83] : memref<96x64xf32, #tpu.memory_space<vmem>>, vector<32x32xf32>
    tpu.vector_store %arg9[%c8_82, %c0_83], %80 {strides = array<i32>} : memref<96x64xf32, #tpu.memory_space<vmem>>, vector<32x32xf32>,
    %cst_84 = arith.constant 0.000000e+00 : f32
    %82 = vector.broadcast %cst_84 : f32 to vector<8x32xf32>
    %c48_85 = arith.constant 48 : index
    %c0_86 = arith.constant 0 : index
    %83 = vector.load %arg9[%c48_85, %c0_86] : memref<96x64xf32, #tpu.memory_space<vmem>>, vector<8x32xf32>
    tpu.vector_store %arg9[%c48_85, %c0_86], %82 {strides = array<i32>} : memref<96x64xf32, #tpu.memory_space<vmem>>, vector<8x32xf32>,
    %cst_87 = arith.constant 0.000000e+00 : f32
    %84 = vector.broadcast %cst_87 : f32 to vector<8x32xf32>
    %c88_88 = arith.constant 88 : index
    %c0_89 = arith.constant 0 : index
    %85 = vector.load %arg9[%c88_88, %c0_89] : memref<96x64xf32, #tpu.memory_space<vmem>>, vector<8x32xf32>
    tpu.vector_store %arg9[%c88_88, %c0_89], %84 {strides = array<i32>} : memref<96x64xf32, #tpu.memory_space<vmem>>, vector<8x32xf32>,
    %c32_90 = arith.constant 32 : index
    %c0_91 = arith.constant 0 : index
    %86 = vector.load %arg10[%c32_90, %c0_91] : memref<128x32xf32, #tpu.memory_space<vmem>>, vector<32x32xf32>
    %cst_92 = arith.constant 0.000000e+00 : f32
    %87 = vector.broadcast %cst_92 : f32 to vector<32x32xf32>
    %88 = arith.maximumf %86, %87 : vector<32x32xf32>
    %c56_93 = arith.constant 56 : index
    %c0_94 = arith.constant 0 : index
    %89 = vector.load %arg9[%c56_93, %c0_94] : memref<96x64xf32, #tpu.memory_space<vmem>>, vector<32x32xf32>
    tpu.vector_store %arg9[%c56_93, %c0_94], %88 {strides = array<i32>} : memref<96x64xf32, #tpu.memory_space<vmem>>, vector<32x32xf32>,
    %90 = vector.extract_strided_slice %40 {offsets = [64, 0], sizes = [32, 32], strides = [1, 1]} : vector<96x32xf32> to vector<32x32xf32>
    %c0_95 = arith.constant 0 : index
    %c0_96 = arith.constant 0 : index
    %91 = vector.load %arg9[%c0_95, %c0_96] : memref<96x64xf32, #tpu.memory_space<vmem>>, vector<80x32xf32>
    %cst_97 = arith.constant dense<0.000000e+00> : vector<80x32xf32>
    %92 = tpu.matmul %91, %90, %cst_97 {dimension_numbers = #tpu.dot_dimension_numbers<[1], [0], [0], [1], [0, 0, 1, 1], [], []>} : vector<80x32xf32>, vector<32x32xf32>, vector<80x32xf32> -> vector<80x32xf32>
    %93 = arith.addf %73, %92 : vector<80x32xf32>
    %94 = vector.extract_strided_slice %42 {offsets = [64, 0], sizes = [32, 32], strides = [1, 1]} : vector<96x32xf32> to vector<32x32xf32>
    %c8_98 = arith.constant 8 : index
    %c0_99 = arith.constant 0 : index
    %95 = vector.load %arg9[%c8_98, %c0_99] : memref<96x64xf32, #tpu.memory_space<vmem>>, vector<80x32xf32>
    %cst_100 = arith.constant dense<0.000000e+00> : vector<80x32xf32>
    %96 = tpu.matmul %95, %94, %cst_100 {dimension_numbers = #tpu.dot_dimension_numbers<[1], [0], [0], [1], [0, 0, 1, 1], [], []>} : vector<80x32xf32>, vector<32x32xf32>, vector<80x32xf32> -> vector<80x32xf32>
    %97 = arith.addf %93, %96 : vector<80x32xf32>
    %98 = vector.extract_strided_slice %44 {offsets = [64, 0], sizes = [32, 32], strides = [1, 1]} : vector<96x32xf32> to vector<32x32xf32>
    %c16_101 = arith.constant 16 : index
    %c0_102 = arith.constant 0 : index
    %99 = vector.load %arg9[%c16_101, %c0_102] : memref<96x64xf32, #tpu.memory_space<vmem>>, vector<80x32xf32>
    %cst_103 = arith.constant dense<0.000000e+00> : vector<80x32xf32>
    %100 = tpu.matmul %99, %98, %cst_103 {dimension_numbers = #tpu.dot_dimension_numbers<[1], [0], [0], [1], [0, 0, 1, 1], [], []>} : vector<80x32xf32>, vector<32x32xf32>, vector<80x32xf32> -> vector<80x32xf32>
    %101 = arith.addf %97, %100 : vector<80x32xf32>
    %c0_104 = arith.constant 0 : index
    %c0_105 = arith.constant 0 : index
    %102 = vector.load %arg5[%c0_104, %c0_105] : memref<1x32xf32, #tpu.memory_space<vmem>>, vector<1x32xf32>
    %103 = vector.broadcast %102 : vector<1x32xf32> to vector<80x32xf32>
    %104 = arith.addf %101, %103 : vector<80x32xf32>
    %105 = vector.extract_strided_slice %104 {offsets = [0, 0], sizes = [32, 32], strides = [1, 1]} : vector<80x32xf32> to vector<32x32xf32>
    %c64 = arith.constant 64 : index
    %c0_106 = arith.constant 0 : index
    %106 = vector.load %arg10[%c64, %c0_106] : memref<128x32xf32, #tpu.memory_space<vmem>>, vector<32x32xf32>
    tpu.vector_store %arg10[%c64, %c0_106], %105 {strides = array<i32>} : memref<128x32xf32, #tpu.memory_space<vmem>>, vector<32x32xf32>,
    %107 = vector.extract_strided_slice %104 {offsets = [48, 0], sizes = [32, 32], strides = [1, 1]} : vector<80x32xf32> to vector<32x32xf32>
    %c96 = arith.constant 96 : index
    %c0_107 = arith.constant 0 : index
    %108 = vector.load %arg10[%c96, %c0_107] : memref<128x32xf32, #tpu.memory_space<vmem>>, vector<32x32xf32>
    tpu.vector_store %arg10[%c96, %c0_107], %107 {strides = array<i32>} : memref<128x32xf32, #tpu.memory_space<vmem>>, vector<32x32xf32>,
    %c0_108 = arith.constant 0 : index
    %c0_109 = arith.constant 0 : index
    %109 = tpu.strided_load %arg1[%c0_108, %c0_109] {strides = array<i32: 2, 1>} : memref<64x64xf32, #tpu.memory_space<vmem>>, vector<32x64xf32>
    %cst_110 = arith.constant 0.000000e+00 : f32
    %110 = vector.broadcast %cst_110 : f32 to vector<32x64xf32>
    %111 = arith.maximumf %109, %110 : vector<32x64xf32>
    %c1_111 = arith.constant 1 : index
    %c0_112 = arith.constant 0 : index
    %112 = tpu.strided_load %arg1[%c1_111, %c0_112] {strides = array<i32: 2, 1>} : memref<64x64xf32, #tpu.memory_space<vmem>>, vector<32x64xf32>
    %cst_113 = arith.constant 0.000000e+00 : f32
    %113 = vector.broadcast %cst_113 : f32 to vector<32x64xf32>
    %114 = arith.maximumf %112, %113 : vector<32x64xf32>
    %115 = arith.addf %111, %114 : vector<32x64xf32>
    %cst_114 = arith.constant 5.000000e-01 : f32
    %116 = vector.broadcast %cst_114 : f32 to vector<32x64xf32>
    %117 = arith.mulf %115, %116 : vector<32x64xf32>
    %c0_115 = arith.constant 0 : index
    %c0_116 = arith.constant 0 : index
    %118 = vector.load %arg6[%c0_115, %c0_116] : memref<128x64xf32, #tpu.memory_space<vmem>>, vector<64x64xf32>
    %cst_117 = arith.constant dense<0.000000e+00> : vector<32x64xf32>
    %119 = tpu.matmul %117, %118, %cst_117 {dimension_numbers = #tpu.dot_dimension_numbers<[1], [0], [0], [1], [0, 0, 1, 1], [], []>} : vector<32x64xf32>, vector<64x64xf32>, vector<32x64xf32> -> vector<32x64xf32>
    %c0_118 = arith.constant 0 : index
    %c0_119 = arith.constant 0 : index
    %120 = tpu.strided_load %arg10[%c0_118, %c0_119] {strides = array<i32: 2, 1>} : memref<128x32xf32, #tpu.memory_space<vmem>>, vector<32x32xf32>
    %cst_120 = arith.constant 0.000000e+00 : f32
    %121 = vector.broadcast %cst_120 : f32 to vector<32x32xf32>
    %122 = arith.maximumf %120, %121 : vector<32x32xf32>
    %c1_121 = arith.constant 1 : index
    %c0_122 = arith.constant 0 : index
    %123 = tpu.strided_load %arg10[%c1_121, %c0_122] {strides = array<i32: 2, 1>} : memref<128x32xf32, #tpu.memory_space<vmem>>, vector<32x32xf32>
    %cst_123 = arith.constant 0.000000e+00 : f32
    %124 = vector.broadcast %cst_123 : f32 to vector<32x32xf32>
    %125 = arith.maximumf %123, %124 : vector<32x32xf32>
    %126 = arith.addf %122, %125 : vector<32x32xf32>
    %cst_124 = arith.constant 5.000000e-01 : f32
    %127 = vector.broadcast %cst_124 : f32 to vector<32x32xf32>
    %128 = arith.mulf %126, %127 : vector<32x32xf32>
    %c64_125 = arith.constant 64 : index
    %c0_126 = arith.constant 0 : index
    %129 = vector.load %arg6[%c64_125, %c0_126] : memref<128x64xf32, #tpu.memory_space<vmem>>, vector<32x64xf32>
    %cst_127 = arith.constant dense<0.000000e+00> : vector<32x64xf32>
    %130 = tpu.matmul %128, %129, %cst_127 {dimension_numbers = #tpu.dot_dimension_numbers<[1], [0], [0], [1], [0, 0, 1, 1], [], []>} : vector<32x32xf32>, vector<32x64xf32>, vector<32x64xf32> -> vector<32x64xf32>
    %131 = arith.addf %119, %130 : vector<32x64xf32>
    %c64_128 = arith.constant 64 : index
    %c0_129 = arith.constant 0 : index
    %132 = tpu.strided_load %arg10[%c64_128, %c0_129] {strides = array<i32: 2, 1>} : memref<128x32xf32, #tpu.memory_space<vmem>>, vector<32x32xf32>
    %cst_130 = arith.constant 0.000000e+00 : f32
    %133 = vector.broadcast %cst_130 : f32 to vector<32x32xf32>
    %134 = arith.maximumf %132, %133 : vector<32x32xf32>
    %c65 = arith.constant 65 : index
    %c0_131 = arith.constant 0 : index
    %135 = tpu.strided_load %arg10[%c65, %c0_131] {strides = array<i32: 2, 1>} : memref<128x32xf32, #tpu.memory_space<vmem>>, vector<32x32xf32>
    %cst_132 = arith.constant 0.000000e+00 : f32
    %136 = vector.broadcast %cst_132 : f32 to vector<32x32xf32>
    %137 = arith.maximumf %135, %136 : vector<32x32xf32>
    %138 = arith.addf %134, %137 : vector<32x32xf32>
    %cst_133 = arith.constant 5.000000e-01 : f32
    %139 = vector.broadcast %cst_133 : f32 to vector<32x32xf32>
    %140 = arith.mulf %138, %139 : vector<32x32xf32>
    %c96_134 = arith.constant 96 : index
    %c0_135 = arith.constant 0 : index
    %141 = vector.load %arg6[%c96_134, %c0_135] : memref<128x64xf32, #tpu.memory_space<vmem>>, vector<32x64xf32>
    %cst_136 = arith.constant dense<0.000000e+00> : vector<32x64xf32>
    %142 = tpu.matmul %140, %141, %cst_136 {dimension_numbers = #tpu.dot_dimension_numbers<[1], [0], [0], [1], [0, 0, 1, 1], [], []>} : vector<32x32xf32>, vector<32x64xf32>, vector<32x64xf32> -> vector<32x64xf32>
    %143 = arith.addf %131, %142 : vector<32x64xf32>
    %c0_137 = arith.constant 0 : index
    %c0_138 = arith.constant 0 : index
    %144 = vector.load %arg7[%c0_137, %c0_138] : memref<1x64xf32, #tpu.memory_space<vmem>>, vector<1x64xf32>
    %145 = vector.broadcast %144 : vector<1x64xf32> to vector<32x64xf32>
    %146 = arith.addf %143, %145 : vector<32x64xf32>
    %c0_139 = arith.constant 0 : index
    %c0_140 = arith.constant 0 : index
    %147 = vector.load %arg8[%c0_139, %c0_140] : memref<32x64xf32, #tpu.memory_space<vmem>>, vector<32x64xf32>
    tpu.vector_store %arg8[%c0_139, %c0_140], %146 {strides = array<i32>} : memref<32x64xf32, #tpu.memory_space<vmem>>, vector<32x64xf32>,
    return
  }
  func.func @transform_0(%arg0: i32) -> (i32, i32) {
    %c0_i32 = arith.constant 0 : i32
    %c0_i32_0 = arith.constant 0 : i32
    %c0_i32_1 = arith.constant 0 : i32
    return %c0_i32, %c0_i32_0 : i32, i32
  }
  func.func @transform_1(%arg0: i32) -> (i32, i32, i32) {
    %c0_i32 = arith.constant 0 : i32
    %c0_i32_0 = arith.constant 0 : i32
    %c0_i32_1 = arith.constant 0 : i32
    %c0_i32_2 = arith.constant 0 : i32
    return %c0_i32, %c0_i32_0, %c0_i32_1 : i32, i32, i32
  }
  func.func @transform_2(%arg0: i32) -> (i32, i32) {
    %c0_i32 = arith.constant 0 : i32
    %c0_i32_0 = arith.constant 0 : i32
    %c0_i32_1 = arith.constant 0 : i32
    return %c0_i32, %c0_i32_0 : i32, i32
  }
  func.func @transform_3(%arg0: i32) -> (i32, i32, i32) {
    %c0_i32 = arith.constant 0 : i32
    %c0_i32_0 = arith.constant 0 : i32
    %c0_i32_1 = arith.constant 0 : i32
    %c0_i32_2 = arith.constant 0 : i32
    return %c0_i32, %c0_i32_0, %c0_i32_1 : i32, i32, i32
  }
  func.func @transform_4(%arg0: i32) -> (i32, i32) {
    %c0_i32 = arith.constant 0 : i32
    %c0_i32_0 = arith.constant 0 : i32
    %c0_i32_1 = arith.constant 0 : i32
    return %c0_i32, %c0_i32_0 : i32, i32
  }
  func.func @transform_5(%arg0: i32) -> (i32, i32) {
    %c0_i32 = arith.constant 0 : i32
    %c0_i32_0 = arith.constant 0 : i32
    %c0_i32_1 = arith.constant 0 : i32
    return %c0_i32, %c0_i32_0 : i32, i32
  }
  func.func @transform_6(%arg0: i32) -> (i32, i32) {
    %c0_i32 = arith.constant 0 : i32
    %c0_i32_0 = arith.constant 0 : i32
    %c0_i32_1 = arith.constant 0 : i32
    return %c0_i32, %c0_i32_0 : i32, i32
  }
  func.func @transform_7(%arg0: i32) -> (i32, i32) {
    %c0_i32 = arith.constant 0 : i32
    %c0_i32_0 = arith.constant 0 : i32
    %c0_i32_1 = arith.constant 0 : i32
    return %c0_i32, %c0_i32_0 : i32, i32
  }
}

module attributes {stable_mosaic.version = 11 : i64} {
  func.func @_stack_kernel(%arg0: i32, %arg1: memref<8x48xf32, #tpu.memory_space<vmem>>, %arg2: memref<3x48x32xf32, #tpu.memory_space<vmem>>, %arg3: memref<1x32xf32, #tpu.memory_space<vmem>>, %arg4: memref<80x40xf32, #tpu.memory_space<vmem>>, %arg5: memref<1x40xf32, #tpu.memory_space<vmem>>, %arg6: memref<4x40xf32, #tpu.memory_space<vmem>>, %arg7: memref<12x48xf32, #tpu.memory_space<vmem>>, %arg8: memref<8x32xf32, #tpu.memory_space<vmem>>) attributes {dimension_semantics = [#tpu.dimension_semantics<arbitrary>], iteration_bounds = array<i64: 1>, scalar_prefetch = 0 : i64, scratch_operands = 2 : i64, tpu.core_type = #tpu.core_type<tc>, window_params = [{pipeline_mode = #tpu.pipeline_mode<synchronous>, transform_indices = @transform_0, window_bounds = array<i64: 8, 48>}, {pipeline_mode = #tpu.pipeline_mode<synchronous>, transform_indices = @transform_1, window_bounds = array<i64: 3, 48, 32>}, {pipeline_mode = #tpu.pipeline_mode<synchronous>, transform_indices = @transform_2, window_bounds = array<i64: 1, 32>}, {pipeline_mode = #tpu.pipeline_mode<synchronous>, transform_indices = @transform_3, window_bounds = array<i64: 80, 40>}, {pipeline_mode = #tpu.pipeline_mode<synchronous>, transform_indices = @transform_4, window_bounds = array<i64: 1, 40>}, {pipeline_mode = #tpu.pipeline_mode<synchronous>, transform_indices = @transform_5, window_bounds = array<i64: 4, 40>}]} {
    %c0 = arith.constant 0 : index
    %c0_0 = arith.constant 0 : index
    %c0_1 = arith.constant 0 : index
    %0 = vector.load %arg2[%c0, %c0_0, %c0_1] : memref<3x48x32xf32, #tpu.memory_space<vmem>>, vector<1x48x32xf32>
    %1 = vector.shape_cast %0 : vector<1x48x32xf32> to vector<48x32xf32>
    %c1 = arith.constant 1 : index
    %c0_2 = arith.constant 0 : index
    %c0_3 = arith.constant 0 : index
    %2 = vector.load %arg2[%c1, %c0_2, %c0_3] : memref<3x48x32xf32, #tpu.memory_space<vmem>>, vector<1x48x32xf32>
    %3 = vector.shape_cast %2 : vector<1x48x32xf32> to vector<48x32xf32>
    %c2 = arith.constant 2 : index
    %c0_4 = arith.constant 0 : index
    %c0_5 = arith.constant 0 : index
    %4 = vector.load %arg2[%c2, %c0_4, %c0_5] : memref<3x48x32xf32, #tpu.memory_space<vmem>>, vector<1x48x32xf32>
    %5 = vector.shape_cast %4 : vector<1x48x32xf32> to vector<48x32xf32>
    %cst = arith.constant 0.000000e+00 : f32
    %6 = vector.broadcast %cst : f32 to vector<10x32xf32>
    %cst_6 = arith.constant 0.000000e+00 : f32
    %7 = vector.broadcast %cst_6 : f32 to vector<1x48xf32>
    %c0_7 = arith.constant 0 : index
    %c0_8 = arith.constant 0 : index
    %8 = vector.load %arg7[%c0_7, %c0_8] : memref<12x48xf32, #tpu.memory_space<vmem>>, vector<1x48xf32>
    tpu.vector_store %arg7[%c0_7, %c0_8], %7 {strides = array<i32>} : memref<12x48xf32, #tpu.memory_space<vmem>>, vector<1x48xf32>,
    %cst_9 = arith.constant 0.000000e+00 : f32
    %9 = vector.broadcast %cst_9 : f32 to vector<1x48xf32>
    %c5 = arith.constant 5 : index
    %c0_10 = arith.constant 0 : index
    %10 = vector.load %arg7[%c5, %c0_10] : memref<12x48xf32, #tpu.memory_space<vmem>>, vector<1x48xf32>
    tpu.vector_store %arg7[%c5, %c0_10], %9 {strides = array<i32>} : memref<12x48xf32, #tpu.memory_space<vmem>>, vector<1x48xf32>,
    %c0_11 = arith.constant 0 : index
    %c0_12 = arith.constant 0 : index
    %11 = vector.load %arg1[%c0_11, %c0_12] : memref<8x48xf32, #tpu.memory_space<vmem>>, vector<4x48xf32>
    %cst_13 = arith.constant 0.000000e+00 : f32
    %12 = vector.broadcast %cst_13 : f32 to vector<4x48xf32>
    %13 = arith.maximumf %11, %12 : vector<4x48xf32>
    %c1_14 = arith.constant 1 : index
    %c0_15 = arith.constant 0 : index
    %14 = vector.load %arg7[%c1_14, %c0_15] : memref<12x48xf32, #tpu.memory_space<vmem>>, vector<4x48xf32>
    tpu.vector_store %arg7[%c1_14, %c0_15], %13 {strides = array<i32>} : memref<12x48xf32, #tpu.memory_space<vmem>>, vector<4x48xf32>,
    %cst_16 = arith.constant 0.000000e+00 : f32
    %15 = vector.broadcast %cst_16 : f32 to vector<1x48xf32>
    %c6 = arith.constant 6 : index
    %c0_17 = arith.constant 0 : index
    %16 = vector.load %arg7[%c6, %c0_17] : memref<12x48xf32, #tpu.memory_space<vmem>>, vector<1x48xf32>
    tpu.vector_store %arg7[%c6, %c0_17], %15 {strides = array<i32>} : memref<12x48xf32, #tpu.memory_space<vmem>>, vector<1x48xf32>,
    %cst_18 = arith.constant 0.000000e+00 : f32
    %17 = vector.broadcast %cst_18 : f32 to vector<1x48xf32>
    %c11 = arith.constant 11 : index
    %c0_19 = arith.constant 0 : index
    %18 = vector.load %arg7[%c11, %c0_19] : memref<12x48xf32, #tpu.memory_space<vmem>>, vector<1x48xf32>
    tpu.vector_store %arg7[%c11, %c0_19], %17 {strides = array<i32>} : memref<12x48xf32, #tpu.memory_space<vmem>>, vector<1x48xf32>,
    %c4 = arith.constant 4 : index
    %c0_20 = arith.constant 0 : index
    %19 = vector.load %arg1[%c4, %c0_20] : memref<8x48xf32, #tpu.memory_space<vmem>>, vector<4x48xf32>
    %cst_21 = arith.constant 0.000000e+00 : f32
    %20 = vector.broadcast %cst_21 : f32 to vector<4x48xf32>
    %21 = arith.maximumf %19, %20 : vector<4x48xf32>
    %c7 = arith.constant 7 : index
    %c0_22 = arith.constant 0 : index
    %22 = vector.load %arg7[%c7, %c0_22] : memref<12x48xf32, #tpu.memory_space<vmem>>, vector<4x48xf32>
    tpu.vector_store %arg7[%c7, %c0_22], %21 {strides = array<i32>} : memref<12x48xf32, #tpu.memory_space<vmem>>, vector<4x48xf32>,
    %c0_23 = arith.constant 0 : index
    %c0_24 = arith.constant 0 : index
    %23 = vector.load %arg7[%c0_23, %c0_24] : memref<12x48xf32, #tpu.memory_space<vmem>>, vector<10x48xf32>
    %cst_25 = arith.constant dense<0.000000e+00> : vector<10x32xf32>
    %24 = tpu.matmul %23, %1, %cst_25 {dimension_numbers = #tpu.dot_dimension_numbers<[1], [0], [0], [1], [0, 0, 1, 1], [], []>} : vector<10x48xf32>, vector<48x32xf32>, vector<10x32xf32> -> vector<10x32xf32>
    %25 = arith.addf %6, %24 : vector<10x32xf32>
    %c1_26 = arith.constant 1 : index
    %c0_27 = arith.constant 0 : index
    %26 = vector.load %arg7[%c1_26, %c0_27] : memref<12x48xf32, #tpu.memory_space<vmem>>, vector<10x48xf32>
    %cst_28 = arith.constant dense<0.000000e+00> : vector<10x32xf32>
    %27 = tpu.matmul %26, %3, %cst_28 {dimension_numbers = #tpu.dot_dimension_numbers<[1], [0], [0], [1], [0, 0, 1, 1], [], []>} : vector<10x48xf32>, vector<48x32xf32>, vector<10x32xf32> -> vector<10x32xf32>
    %28 = arith.addf %25, %27 : vector<10x32xf32>
    %c2_29 = arith.constant 2 : index
    %c0_30 = arith.constant 0 : index
    %29 = vector.load %arg7[%c2_29, %c0_30] : memref<12x48xf32, #tpu.memory_space<vmem>>, vector<10x48xf32>
    %cst_31 = arith.constant dense<0.000000e+00> : vector<10x32xf32>
    %30 = tpu.matmul %29, %5, %cst_31 {dimension_numbers = #tpu.dot_dimension_numbers<[1], [0], [0], [1], [0, 0, 1, 1], [], []>} : vector<10x48xf32>, vector<48x32xf32>, vector<10x32xf32> -> vector<10x32xf32>
    %31 = arith.addf %28, %30 : vector<10x32xf32>
    %c0_32 = arith.constant 0 : index
    %c0_33 = arith.constant 0 : index
    %32 = vector.load %arg3[%c0_32, %c0_33] : memref<1x32xf32, #tpu.memory_space<vmem>>, vector<1x32xf32>
    %33 = vector.broadcast %32 : vector<1x32xf32> to vector<10x32xf32>
    %34 = arith.addf %31, %33 : vector<10x32xf32>
    %35 = vector.extract_strided_slice %34 {offsets = [0, 0], sizes = [4, 32], strides = [1, 1]} : vector<10x32xf32> to vector<4x32xf32>
    %c0_34 = arith.constant 0 : index
    %c0_35 = arith.constant 0 : index
    %36 = vector.load %arg8[%c0_34, %c0_35] : memref<8x32xf32, #tpu.memory_space<vmem>>, vector<4x32xf32>
    tpu.vector_store %arg8[%c0_34, %c0_35], %35 {strides = array<i32>} : memref<8x32xf32, #tpu.memory_space<vmem>>, vector<4x32xf32>,
    %37 = vector.extract_strided_slice %34 {offsets = [6, 0], sizes = [4, 32], strides = [1, 1]} : vector<10x32xf32> to vector<4x32xf32>
    %c4_36 = arith.constant 4 : index
    %c0_37 = arith.constant 0 : index
    %38 = vector.load %arg8[%c4_36, %c0_37] : memref<8x32xf32, #tpu.memory_space<vmem>>, vector<4x32xf32>
    tpu.vector_store %arg8[%c4_36, %c0_37], %37 {strides = array<i32>} : memref<8x32xf32, #tpu.memory_space<vmem>>, vector<4x32xf32>,
    %c0_38 = arith.constant 0 : index
    %c0_39 = arith.constant 0 : index
    %39 = tpu.strided_load %arg1[%c0_38, %c0_39] {strides = array<i32: 2, 1>} : memref<8x48xf32, #tpu.memory_space<vmem>>, vector<4x48xf32>
    %cst_40 = arith.constant 0.000000e+00 : f32
    %40 = vector.broadcast %cst_40 : f32 to vector<4x48xf32>
    %41 = arith.maximumf %39, %40 : vector<4x48xf32>
    %c1_41 = arith.constant 1 : index
    %c0_42 = arith.constant 0 : index
    %42 = tpu.strided_load %arg1[%c1_41, %c0_42] {strides = array<i32: 2, 1>} : memref<8x48xf32, #tpu.memory_space<vmem>>, vector<4x48xf32>
    %cst_43 = arith.constant 0.000000e+00 : f32
    %43 = vector.broadcast %cst_43 : f32 to vector<4x48xf32>
    %44 = arith.maximumf %42, %43 : vector<4x48xf32>
    %45 = arith.addf %41, %44 : vector<4x48xf32>
    %cst_44 = arith.constant 5.000000e-01 : f32
    %46 = vector.broadcast %cst_44 : f32 to vector<4x48xf32>
    %47 = arith.mulf %45, %46 : vector<4x48xf32>
    %c0_45 = arith.constant 0 : index
    %c0_46 = arith.constant 0 : index
    %48 = vector.load %arg4[%c0_45, %c0_46] : memref<80x40xf32, #tpu.memory_space<vmem>>, vector<48x40xf32>
    %cst_47 = arith.constant dense<0.000000e+00> : vector<4x40xf32>
    %49 = tpu.matmul %47, %48, %cst_47 {dimension_numbers = #tpu.dot_dimension_numbers<[1], [0], [0], [1], [0, 0, 1, 1], [], []>} : vector<4x48xf32>, vector<48x40xf32>, vector<4x40xf32> -> vector<4x40xf32>
    %c0_48 = arith.constant 0 : index
    %c0_49 = arith.constant 0 : index
    %50 = tpu.strided_load %arg8[%c0_48, %c0_49] {strides = array<i32: 2, 1>} : memref<8x32xf32, #tpu.memory_space<vmem>>, vector<4x32xf32>
    %cst_50 = arith.constant 0.000000e+00 : f32
    %51 = vector.broadcast %cst_50 : f32 to vector<4x32xf32>
    %52 = arith.maximumf %50, %51 : vector<4x32xf32>
    %c1_51 = arith.constant 1 : index
    %c0_52 = arith.constant 0 : index
    %53 = tpu.strided_load %arg8[%c1_51, %c0_52] {strides = array<i32: 2, 1>} : memref<8x32xf32, #tpu.memory_space<vmem>>, vector<4x32xf32>
    %cst_53 = arith.constant 0.000000e+00 : f32
    %54 = vector.broadcast %cst_53 : f32 to vector<4x32xf32>
    %55 = arith.maximumf %53, %54 : vector<4x32xf32>
    %56 = arith.addf %52, %55 : vector<4x32xf32>
    %cst_54 = arith.constant 5.000000e-01 : f32
    %57 = vector.broadcast %cst_54 : f32 to vector<4x32xf32>
    %58 = arith.mulf %56, %57 : vector<4x32xf32>
    %c48 = arith.constant 48 : index
    %c0_55 = arith.constant 0 : index
    %59 = vector.load %arg4[%c48, %c0_55] : memref<80x40xf32, #tpu.memory_space<vmem>>, vector<32x40xf32>
    %cst_56 = arith.constant dense<0.000000e+00> : vector<4x40xf32>
    %60 = tpu.matmul %58, %59, %cst_56 {dimension_numbers = #tpu.dot_dimension_numbers<[1], [0], [0], [1], [0, 0, 1, 1], [], []>} : vector<4x32xf32>, vector<32x40xf32>, vector<4x40xf32> -> vector<4x40xf32>
    %61 = arith.addf %49, %60 : vector<4x40xf32>
    %c0_57 = arith.constant 0 : index
    %c0_58 = arith.constant 0 : index
    %62 = vector.load %arg5[%c0_57, %c0_58] : memref<1x40xf32, #tpu.memory_space<vmem>>, vector<1x40xf32>
    %63 = vector.broadcast %62 : vector<1x40xf32> to vector<4x40xf32>
    %64 = arith.addf %61, %63 : vector<4x40xf32>
    %c0_59 = arith.constant 0 : index
    %c0_60 = arith.constant 0 : index
    %65 = vector.load %arg6[%c0_59, %c0_60] : memref<4x40xf32, #tpu.memory_space<vmem>>, vector<4x40xf32>
    tpu.vector_store %arg6[%c0_59, %c0_60], %64 {strides = array<i32>} : memref<4x40xf32, #tpu.memory_space<vmem>>, vector<4x40xf32>,
    return
  }
  func.func @transform_0(%arg0: i32) -> (i32, i32) {
    %c0_i32 = arith.constant 0 : i32
    %c0_i32_0 = arith.constant 0 : i32
    %c0_i32_1 = arith.constant 0 : i32
    return %c0_i32, %c0_i32_0 : i32, i32
  }
  func.func @transform_1(%arg0: i32) -> (i32, i32, i32) {
    %c0_i32 = arith.constant 0 : i32
    %c0_i32_0 = arith.constant 0 : i32
    %c0_i32_1 = arith.constant 0 : i32
    %c0_i32_2 = arith.constant 0 : i32
    return %c0_i32, %c0_i32_0, %c0_i32_1 : i32, i32, i32
  }
  func.func @transform_2(%arg0: i32) -> (i32, i32) {
    %c0_i32 = arith.constant 0 : i32
    %c0_i32_0 = arith.constant 0 : i32
    %c0_i32_1 = arith.constant 0 : i32
    return %c0_i32, %c0_i32_0 : i32, i32
  }
  func.func @transform_3(%arg0: i32) -> (i32, i32) {
    %c0_i32 = arith.constant 0 : i32
    %c0_i32_0 = arith.constant 0 : i32
    %c0_i32_1 = arith.constant 0 : i32
    return %c0_i32, %c0_i32_0 : i32, i32
  }
  func.func @transform_4(%arg0: i32) -> (i32, i32) {
    %c0_i32 = arith.constant 0 : i32
    %c0_i32_0 = arith.constant 0 : i32
    %c0_i32_1 = arith.constant 0 : i32
    return %c0_i32, %c0_i32_0 : i32, i32
  }
  func.func @transform_5(%arg0: i32) -> (i32, i32) {
    %c0_i32 = arith.constant 0 : i32
    %c0_i32_0 = arith.constant 0 : i32
    %c0_i32_1 = arith.constant 0 : i32
    return %c0_i32, %c0_i32_0 : i32, i32
  }
}

module attributes {stable_mosaic.version = 11 : i64} {
  func.func @_gap_fc_kernel(%arg0: i32, %arg1: memref<4x40xf32, #tpu.memory_space<vmem>>, %arg2: memref<40x5xf32, #tpu.memory_space<vmem>>, %arg3: memref<1x5xf32, #tpu.memory_space<vmem>>, %arg4: memref<2x5xf32, #tpu.memory_space<vmem>>, %arg5: memref<2x40xf32, #tpu.memory_space<vmem>>) attributes {dimension_semantics = [#tpu.dimension_semantics<arbitrary>], iteration_bounds = array<i64: 1>, scalar_prefetch = 0 : i64, scratch_operands = 1 : i64, tpu.core_type = #tpu.core_type<tc>, window_params = [{pipeline_mode = #tpu.pipeline_mode<synchronous>, transform_indices = @transform_0, window_bounds = array<i64: 4, 40>}, {pipeline_mode = #tpu.pipeline_mode<synchronous>, transform_indices = @transform_1, window_bounds = array<i64: 40, 5>}, {pipeline_mode = #tpu.pipeline_mode<synchronous>, transform_indices = @transform_2, window_bounds = array<i64: 1, 5>}, {pipeline_mode = #tpu.pipeline_mode<synchronous>, transform_indices = @transform_3, window_bounds = array<i64: 2, 5>}]} {
    %c0 = arith.constant 0 : index
    %c0_0 = arith.constant 0 : index
    %0 = vector.load %arg1[%c0, %c0_0] : memref<4x40xf32, #tpu.memory_space<vmem>>, vector<2x40xf32>
    %cst = arith.constant dense<0.000000e+00> : vector<40xf32>
    %1 = vector.multi_reduction <add>, %0, %cst [0] : vector<2x40xf32> to vector<40xf32>
    %2 = vector.shape_cast %1 : vector<40xf32> to vector<1x40xf32>
    %cst_1 = arith.constant 2.000000e+00 : f32
    %3 = vector.broadcast %cst_1 : f32 to vector<1x40xf32>
    %4 = arith.divf %2, %3 : vector<1x40xf32>
    %c0_2 = arith.constant 0 : index
    %c0_3 = arith.constant 0 : index
    %5 = vector.load %arg5[%c0_2, %c0_3] : memref<2x40xf32, #tpu.memory_space<vmem>>, vector<1x40xf32>
    tpu.vector_store %arg5[%c0_2, %c0_3], %4 {strides = array<i32>} : memref<2x40xf32, #tpu.memory_space<vmem>>, vector<1x40xf32>,
    %c2 = arith.constant 2 : index
    %c0_4 = arith.constant 0 : index
    %6 = vector.load %arg1[%c2, %c0_4] : memref<4x40xf32, #tpu.memory_space<vmem>>, vector<2x40xf32>
    %cst_5 = arith.constant dense<0.000000e+00> : vector<40xf32>
    %7 = vector.multi_reduction <add>, %6, %cst_5 [0] : vector<2x40xf32> to vector<40xf32>
    %8 = vector.shape_cast %7 : vector<40xf32> to vector<1x40xf32>
    %cst_6 = arith.constant 2.000000e+00 : f32
    %9 = vector.broadcast %cst_6 : f32 to vector<1x40xf32>
    %10 = arith.divf %8, %9 : vector<1x40xf32>
    %c1 = arith.constant 1 : index
    %c0_7 = arith.constant 0 : index
    %11 = vector.load %arg5[%c1, %c0_7] : memref<2x40xf32, #tpu.memory_space<vmem>>, vector<1x40xf32>
    tpu.vector_store %arg5[%c1, %c0_7], %10 {strides = array<i32>} : memref<2x40xf32, #tpu.memory_space<vmem>>, vector<1x40xf32>,
    %c0_8 = arith.constant 0 : index
    %c0_9 = arith.constant 0 : index
    %12 = vector.load %arg5[%c0_8, %c0_9] : memref<2x40xf32, #tpu.memory_space<vmem>>, vector<2x40xf32>
    %c0_10 = arith.constant 0 : index
    %c0_11 = arith.constant 0 : index
    %13 = vector.load %arg2[%c0_10, %c0_11] : memref<40x5xf32, #tpu.memory_space<vmem>>, vector<40x5xf32>
    %cst_12 = arith.constant dense<0.000000e+00> : vector<2x5xf32>
    %14 = tpu.matmul %12, %13, %cst_12 {dimension_numbers = #tpu.dot_dimension_numbers<[1], [0], [0], [1], [0, 0, 1, 1], [], []>} : vector<2x40xf32>, vector<40x5xf32>, vector<2x5xf32> -> vector<2x5xf32>
    %c0_13 = arith.constant 0 : index
    %c0_14 = arith.constant 0 : index
    %15 = vector.load %arg3[%c0_13, %c0_14] : memref<1x5xf32, #tpu.memory_space<vmem>>, vector<1x5xf32>
    %16 = vector.broadcast %15 : vector<1x5xf32> to vector<2x5xf32>
    %17 = arith.addf %14, %16 : vector<2x5xf32>
    %c0_15 = arith.constant 0 : index
    %c0_16 = arith.constant 0 : index
    %18 = vector.load %arg4[%c0_15, %c0_16] : memref<2x5xf32, #tpu.memory_space<vmem>>, vector<2x5xf32>
    tpu.vector_store %arg4[%c0_15, %c0_16], %17 {strides = array<i32>} : memref<2x5xf32, #tpu.memory_space<vmem>>, vector<2x5xf32>,
    return
  }
  func.func @transform_0(%arg0: i32) -> (i32, i32) {
    %c0_i32 = arith.constant 0 : i32
    %c0_i32_0 = arith.constant 0 : i32
    %c0_i32_1 = arith.constant 0 : i32
    return %c0_i32, %c0_i32_0 : i32, i32
  }
  func.func @transform_1(%arg0: i32) -> (i32, i32) {
    %c0_i32 = arith.constant 0 : i32
    %c0_i32_0 = arith.constant 0 : i32
    %c0_i32_1 = arith.constant 0 : i32
    return %c0_i32, %c0_i32_0 : i32, i32
  }
  func.func @transform_2(%arg0: i32) -> (i32, i32) {
    %c0_i32 = arith.constant 0 : i32
    %c0_i32_0 = arith.constant 0 : i32
    %c0_i32_1 = arith.constant 0 : i32
    return %c0_i32, %c0_i32_0 : i32, i32
  }
  func.func @transform_3(%arg0: i32) -> (i32, i32) {
    %c0_i32 = arith.constant 0 : i32
    %c0_i32_0 = arith.constant 0 : i32
    %c0_i32_1 = arith.constant 0 : i32
    return %c0_i32, %c0_i32_0 : i32, i32
  }
}

</mosaic_0001>

<bundles_post_ra>
// kernel: _lambda_.9
= control target key start
LH: loop header
LB: loop body
LE: loop exit
PB: predicated region body
PF: predicated region fallthrough
CT: control target
= control target key end

     0   :  { %vm46_vm0 = vcmask 516096   ;;  %v723_v0 = vmov 0.0   ;;  %vm51_vm1 = vcmask 523264   ;;  %vm724_vm2 = vmmov 0   ;;  %s960_s1 = inlined_call_operand.vmem [shape: f32[3,64,32], index: 1, kind: input, shape index: {}]   ;;  %s961_s0 = inlined_call_operand.vmem [shape: f32[16,64], index: 0, kind: input, shape index: {}]   ;;  %s962_s3 = inlined_call_operand.vmem [shape: f32[96,48], index: 3, kind: input, shape index: {}]   ;;  %s963_s2 = inlined_call_operand.vmem [shape: f32[1,32], index: 2, kind: input, shape index: {}]   ;;  %s964_s4 = inlined_call_operand.vmem [shape: f32[1,48], index: 4, kind: input, shape index: {}]   ;;  %s965_s5 = inlined_call_operand.vmem [shape: f32[8,48], index: 5, kind: output, shape index: {}]  }
   0x1   :  { %616 = vmatprep.subr.mxu0 %v723_v0  ;;  %v546_v1 = vld [vmem:[%s960_s1 + $0x78] sm:$0xff]  ;;  %641 = vmatprep.subr.mxu1 %v723_v0  ;;  %v545_v3 = vld [vmem:[%s960_s1 + $0x70] sm:$0xff]  ;;  %47 = vst.msk [vmem:[#allocation2] sm:$0x1] %vm46_vm0, %v723_v0  ;;  %48 = vst.msk [vmem:[#allocation2 + $0x9] sm:$0x1] %vm46_vm0, %v723_v0 }
   0x2   :  { %v27_v2 = vld [vmem:[%s960_s1 + $0x38] sm:$0xff]  ;;  %53 = vst.msk [vmem:[#allocation2 + $0xa] sm:$0x1] %vm46_vm0, %v723_v0  ;;  %54 = vst.msk [vmem:[#allocation2 + $0x13] sm:$0x1] %vm46_vm0, %v723_v0  ;;  %617 = vmatpush3.msra.mxu0 %v546_v1  ;;  %v26_v4 = vld [vmem:[%s960_s1 + $0x30] sm:$0xff]  ;;  %632 = vmatprep.mubr.msk.f32.mxu0 %vm724_vm2, %v723_v0 }
   0x3   :  { %642 = vmatpush3.msra.mxu1 %v27_v2  ;;  %618 = vmatprep.subr.mxu0 %v723_v0  ;;  %v544_v5 = vld [vmem:[%s960_s1 + $0x68] sm:$0xff]  ;;  %v543_v7 = vld [vmem:[%s960_s1 + $0x60] sm:$0xff]  ;;  %v542_v10 = vld [vmem:[%s960_s1 + $0x58] sm:$0xff]  ;;  %vm347_vm3 = vcmask 261120   ;;  %vm349_vm4 = vcmask 261122   ;;  %vm351_vm5 = vcmask 254976  }
   0x4   :  { %643 = vmatprep.subr.mxu1 %v723_v0  ;;  %v25_v6 = vld [vmem:[%s960_s1 + $0x28] sm:$0xff]  ;;  %619 = vmatpush3.msra.mxu0 %v545_v3  ;;  %v24_v8 = vld [vmem:[%s960_s1 + $0x20] sm:$0xff]  ;;  %v23_v11 = vld [vmem:[%s960_s1 + $0x18] sm:$0xff]  ;;  %vm533_vm6 = vcmask 392192  }
   0x5   :  { %644 = vmatpush3.msra.mxu1 %v26_v4  ;;  %620 = vmatprep.subr.mxu0 %v723_v0  ;;  %v49_v9 = vld [vmem:[%s961_s0] sm:$0xff]  ;;  %v55_v13 = vld [vmem:[%s961_s0 + $0x8] sm:$0xff]  ;;  %v541_v15 = vld [vmem:[%s960_s1 + $0x50] sm:$0xff] }
   0x6   :  { %645 = vmatprep.subr.mxu1 %v723_v0  ;;  %621 = vmatpush3.msra.mxu0 %v544_v5  ;;  %v50_v12 = vmax.f32 %v49_v9, 0.0  ;;  %v56_v14 = vmax.f32 %v55_v13, 0.0  ;;  %v22_v16 = vld [vmem:[%s960_s1 + $0x10] sm:$0xff]  ;;  %v540_v17 = vld [vmem:[%s960_s1 + $0x48] sm:$0xff]  ;;  %v539_v19 = vld [vmem:[%s960_s1 + $0x40] sm:$0xff] }
   0x7   :  { %646 = vmatpush3.msra.mxu1 %v25_v6  ;;  %622 = vmatprep.subr.mxu0 %v723_v0  ;;  %v21_v18 = vld [vmem:[%s960_s1 + $0x8] sm:$0xff]  ;;  %v20_v20 = vld [vmem:[%s960_s1] sm:$0xff]  ;;  %v554_v23 = vld [vmem:[%s960_s1 + $0xb8] sm:$0xff] }
   0x8   :  { %647 = vmatprep.subr.mxu1 %v723_v0  ;;  %623 = vmatpush3.msra.mxu0 %v543_v7  ;;  %52 = vst.msk [vmem:[#allocation2 + $0x1] sm:$0xff] %vm51_vm1, %v50_v12  ;;  %57 = vst.msk [vmem:[#allocation2 + $0xb] sm:$0xff] %vm51_vm1, %v56_v14  ;;  %v553_v24 = vld [vmem:[%s960_s1 + $0xb0] sm:$0xff]  ;;  %v552_v26 = vld [vmem:[%s960_s1 + $0xa8] sm:$0xff] }
   0x9   :  { %648 = vmatpush3.msra.mxu1 %v24_v8  ;;  %624 = vmatprep.subr.mxu0 %v723_v0  ;;  %v551_v28 = vld [vmem:[%s960_s1 + $0xa0] sm:$0xff]  ;;  %v550_v30 = vld [vmem:[%s960_s1 + $0x98] sm:$0xff]  ;;  %v549_v32 = vld [vmem:[%s960_s1 + $0x90] sm:$0xff] }
   0xa   :  { %649 = vmatprep.subr.mxu1 %v723_v0  ;;  %625 = vmatpush3.msra.mxu0 %v542_v10  ;;  %v548_v33 = vld [vmem:[%s960_s1 + $0x88] sm:$0xff]  ;;  %v547_v34 = vld [vmem:[%s960_s1 + $0x80] sm:$0xff]  ;;  %v378_v38 = vld [vmem:[%s962_s3 + $0x58] sm:$0xff] }
   0xb   :  { %650 = vmatpush3.msra.mxu1 %v23_v11  ;;  %626 = vmatprep.subr.mxu0 %v723_v0  ;;  %v377_v39 = vld [vmem:[%s962_s3 + $0x50] sm:$0xff]  ;;  %v376_v40 = vld [vmem:[%s962_s3 + $0x48] sm:$0xff]  ;;  %v375_v41 = vld [vmem:[%s962_s3 + $0x40] sm:$0xff] }
   0xc   :  { %651 = vmatprep.subr.mxu1 %v723_v0  ;;  %627 = vmatpush3.msra.mxu0 %v541_v15  ;;  %v564_v56 = vld [vmem:[%s963_s2] ss:$0 sm:$0xff]  ;;  %v367_v13 = vld [vmem:[%s962_s3 + $0x38] sm:$0xff]  ;;  %v366_v14 = vld [vmem:[%s962_s3 + $0x30] sm:$0xff] }
   0xd   :  { %652 = vmatpush3.msra.mxu1 %v22_v16  ;;  %628 = vmatprep.subr.mxu0 %v723_v0  ;;  %v353_v15 = vld [vmem:[%s961_s0] ss:$2 sm:$0xff]  ;;  %v565_v16 = vld [vmem:[%s961_s0 + $0x1] ss:$2 sm:$0xff] }
   0xe   :  { %653 = vmatprep.subr.mxu1 %v723_v0  ;;  %629 = vmatpush3.msra.mxu0 %v540_v17  ;;  %v365_v17 = vld [vmem:[%s962_s3 + $0x28] sm:$0xff] }
   0xf   :  { %654 = vmatpush3.msra.mxu1 %v21_v18  ;;  %630 = vmatprep.subr.mxu0 %v723_v0  ;;  %v61_v21 = vld [vmem:[#allocation2 + $0x1] sm:$0xff]  ;;  %v62_v25 = vld [vmem:[#allocation2 + $0x9] sm:$0xff]  ;;  %v63_v29 = vld [vmem:[#allocation2 + $0x11] sm:$0x3] }
  0x10   :  { %631 = vmatpush3.msra.mxu0 %v539_v19  ;;  %655 = vmatprep.subr.mxu1 %v723_v0  ;;  %v58_v22 = vld [vmem:[#allocation2] sm:$0xff]  ;;  %v59_v27 = vld [vmem:[#allocation2 + $0x8] sm:$0xff]  ;;  %v60_v31 = vld [vmem:[#allocation2 + $0x10] sm:$0x3]  ;;  %v354_v19 = vmax.f32 %v353_v15, 0.0 }
  0x11   :  { %633 = vmatmul.mubr.msk.f32.vlgmr.msra.gmra.mxu0 %vm51_vm1, %v61_v21  ;;  %656 = vmatpush3.msra.mxu1 %v20_v20  ;;  %v242_v35 = vld [vmem:[#allocation2 + $0x2] sm:$0xff]  ;;  %v243_v36 = vld [vmem:[#allocation2 + $0xa] sm:$0xff]  ;;  %v244_v37 = vld [vmem:[#allocation2 + $0x12] sm:$0x3]  ;;  %v357_v20 = vmax.f32 %v565_v16, 0.0 }
  0x12   :  { %657 = vmatprep.mubr.msk.f32.mxu1 %vm724_vm2, %v723_v0  ;;  %666 = vmatprep.subr.mxu0 %v723_v0  ;;  %v364_v18 = vld [vmem:[%s962_s3 + $0x20] sm:$0xff]  ;;  %v363_v21 = vld [vmem:[%s962_s3 + $0x18] sm:$0xff] }
  0x13   :  { %658 = vmatmul.mubr.msk.f32.vlgmr.msra.gmra.mxu1 %vm51_vm1, %v58_v22  ;;  %667 = vmatpush3.msra.mxu0 %v554_v23  ;;  %v362_v22 = vld [vmem:[%s962_s3 + $0x10] sm:$0xff]  ;;  %v358_v23 = vadd.f32 %v357_v20, %v354_v19 }
  0x14   :  { %668 = vmatprep.subr.mxu0 %v723_v0  ;;  %635 = vmatprep.mubr.msk.f32.mxu0 %vm724_vm2, %v723_v0 }
  0x15   :  { %669 = vmatpush3.msra.mxu0 %v553_v24  ;;  %660 = vmatprep.mubr.msk.f32.mxu1 %vm724_vm2, %v723_v0  ;;  %v361_v24 = vld [vmem:[%s962_s3 + $0x8] sm:$0xff] }
  0x16   :  { %670 = vmatprep.subr.mxu0 %v723_v0  ;;  %636 = vmatmul.mubr.msk.f32.gmra.mxu0 %vm51_vm1, %v62_v25  ;;  %v360_v25 = vld [vmem:[%s962_s3] sm:$0xff] }
  0x17   :  { %671 = vmatpush3.msra.mxu0 %v552_v26  ;;  %661 = vmatmul.mubr.msk.f32.gmra.mxu1 %vm51_vm1, %v59_v27  ;;  %v359_v26 = vmul.f32 0.5, %v358_v23 }
  0x18   :  { %672 = vmatprep.subr.mxu0 %v723_v0  ;;  %638 = vmatprep.mubr.msk.f32.mxu0 %vm724_vm2, %v723_v0 }
  0x19   :  { %673 = vmatpush3.msra.mxu0 %v551_v28  ;;  %663 = vmatprep.mubr.msk.f32.mxu1 %vm724_vm2, %v723_v0 }
  0x1a   :  { %674 = vmatprep.subr.mxu0 %v723_v0  ;;  %639 = vmatmul.mubr.msk.f32.gmra.mxu0 %vm51_vm1, %v63_v29 }
  0x1b   :  { %675 = vmatpush3.msra.mxu0 %v550_v30  ;;  %664 = vmatmul.mubr.msk.f32.gmra.mxu1 %vm51_vm1, %v60_v31  ;;  %v568_v30 = vld [vmem:[%s964_s4] ss:$0 sm:$0xff] }
  0x1c   :  { %676 = vmatprep.subr.mxu0 %v723_v0  ;;  %682 = vmatprep.mubr.msk.f32.mxu0 %vm724_vm2, %v723_v0 }
  0x1d   :  { %677 = vmatpush3.msra.mxu0 %v549_v32  ;;  %691 = vmatprep.subr.mxu1 %v723_v0 }
  0x1e   :  { %678 = vmatprep.subr.mxu0 %v723_v0  ;;  %699 = vmatprep.mubr.msk.f32.mxu1 %vm724_vm2, %v723_v0 }
  0x1f   :  { %679 = vmatpush3.msra.mxu0 %v548_v33  ;;  %692 = vmatpush3.msra.mxu1 %v378_v38 }
  0x20   :  { %680 = vmatprep.subr.mxu0 %v723_v0  ;;  %693 = vmatprep.subr.mxu1 %v723_v0 }
  0x21   :  { %681 = vmatpush3.msra.mxu0 %v547_v34  ;;  %694 = vmatpush3.msra.mxu1 %v377_v39 }
  0x22   :  { %683 = vmatmul.mubr.msk.f32.vlgmr.msra.gmra.mxu0 %vm51_vm1, %v242_v35  ;;  %695 = vmatprep.subr.mxu1 %v723_v0 }
  0x23   :  { %685 = vmatprep.mubr.msk.f32.mxu0 %vm724_vm2, %v723_v0  ;;  %696 = vmatpush3.msra.mxu1 %v376_v40 }
  0x24   :  { %697 = vmatprep.subr.mxu1 %v723_v0 }
  0x25   :  { %698 = vmatpush3.msra.mxu1 %v375_v41 }
  0x26   :  { %686 = vmatmul.mubr.msk.f32.gmra.mxu0 %vm51_vm1, %v243_v36  ;;  %702 = vmatprep.subr.mxu1 %v723_v0 }
  0x27   :  { %688 = vmatprep.mubr.msk.f32.mxu0 %vm724_vm2, %v723_v0 }
  0x2a   :  { %689 = vmatmul.mubr.msk.f32.gmra.mxu0 %vm51_vm1, %v244_v37 }
  0xd1   :  { %v139_v42 = vpop.f32.mrf.mxu0 }
  0xd3   :  { %v228_v43 = vpop.f32.mrf.mxu1  ;;  %v634_v44 = vpop.f32.mrf.mxu0 }
  0xd4   :  { %v229_v54 = vadd.f32 %v228_v43, %v139_v42 }
  0xd5   :  { %v659_v45 = vpop.f32.mrf.mxu1 }
  0xd6   :  { %v144_v46 = vpop.f32.mrf.mxu0 }
  0xd7   :  { %v233_v47 = vpop.f32.mrf.mxu1 }
  0xd8   :  { %v637_v48 = vpop.f32.mrf.mxu0  ;;  %v234_v59 = vadd.f32 %v233_v47, %v144_v46 }
  0xd9   :  { %v662_v49 = vpop.f32.mrf.mxu1 }
  0xda   :  { %v149_v50 = vpop.f32.mrf.mxu0 }
  0xdb   :  { %v238_v51 = vpop.f32.mrf.mxu1 }
  0xdc   :  { %v640_v52 = vpop.f32.mrf.mxu0  ;;  %v239_v1 = vadd.f32 %v238_v51, %v149_v50 }
  0xdd   :  { %v665_v53 = vpop.f32.mrf.mxu1 }
  0xe2   :  { %v320_v55 = vpop.f32.mrf.mxu0 }
  0xe3   :  { %v334_v57 = vadd.f32 %v320_v55, %v229_v54 }
  0xe4   :  { %v684_v58 = vpop.f32.mrf.mxu0 }
  0xe5   :  { %v344_v60 = vadd.f32 %v564_v56, %v334_v57 }
  0xe6   :  { %v325_v61 = vpop.f32.mrf.mxu0 }
  0xe7   :  { %348 = vst.msk [vmem:[#allocation3] sm:$0xff] %vm347_vm3, %v344_v60  ;;  %v335_v62 = vadd.f32 %v325_v61, %v234_v59 }
  0xe8   :  { %v687_v63 = vpop.f32.mrf.mxu0 }
  0xe9   :  { %v345_v2 = vadd.f32 %v564_v56, %v335_v62 }
  0xea   :  { %v330_v3 = vpop.f32.mrf.mxu0 }
  0xeb   :  { %350 = vst.msk [vmem:[#allocation3 + $0x6] sm:$0xfc] %vm349_vm4, %v345_v2  ;;  %v336_v4 = vadd.f32 %v330_v3, %v239_v1 }
  0xec   :  { %v690_v5 = vpop.f32.mrf.mxu0 }
  0xed   :  { %v346_v6 = vadd.f32 %v564_v56, %v336_v4 }
  0xef   :  { %352 = vst.msk [vmem:[#allocation3 + $0xe] sm:$0x3] %vm351_vm5, %v346_v6 }
  0xf6   :  { %v368_v7 = vld [vmem:[#allocation3] ss:$2 sm:$0xff]  ;;  %v371_v8 = vld [vmem:[#allocation3 + $0x1] ss:$2 sm:$0xff] }
  0xf7   :  { %v369_v9 = vmax.f32 %v368_v7, 0.0  ;;  %v372_v10 = vmax.f32 %v371_v8, 0.0 }
  0xf9   :  { %v373_v11 = vadd.f32 %v372_v10, %v369_v9 }
  0xfb   :  { %v374_v12 = vmul.f32 0.5, %v373_v11 }
  0xfd   :  { %700 = vmatmul.mubr.msk.f32.vlgmr.msra.gmra.mxu1 %vm347_vm3, %v374_v12 }
  0xfe   :  { %703 = vmatpush3.msra.mxu1 %v367_v13  ;;  %718 = vmatprep.mubr.msk.f32.mxu1 %vm724_vm2, %v723_v0 }
  0xff   :  { %704 = vmatprep.subr.mxu1 %v723_v0 }
 0x100   :  { %705 = vmatpush3.msra.mxu1 %v366_v14 }
 0x101   :  { %706 = vmatprep.subr.mxu1 %v723_v0 }
 0x102   :  { %707 = vmatpush3.msra.mxu1 %v365_v17 }
 0x103   :  { %708 = vmatprep.subr.mxu1 %v723_v0 }
 0x104   :  { %709 = vmatpush3.msra.mxu1 %v364_v18 }
 0x105   :  { %710 = vmatprep.subr.mxu1 %v723_v0 }
 0x106   :  { %711 = vmatpush3.msra.mxu1 %v363_v21 }
 0x107   :  { %712 = vmatprep.subr.mxu1 %v723_v0 }
 0x108   :  { %713 = vmatpush3.msra.mxu1 %v362_v22 }
 0x109   :  { %714 = vmatprep.subr.mxu1 %v723_v0 }
 0x10a   :  { %715 = vmatpush3.msra.mxu1 %v361_v24 }
 0x10b   :  { %716 = vmatprep.subr.mxu1 %v723_v0 }
 0x10c   :  { %717 = vmatpush3.msra.mxu1 %v360_v25 }
 0x10d   :  { %719 = vmatmul.mubr.msk.f32.vlgmr.msra.gmra.mxu1 %vm51_vm1, %v359_v26 }
 0x1bd   :  { %v448_v27 = vpop.f32.mrf.mxu1 }
 0x1bf   :  { %v701_v28 = vpop.f32.mrf.mxu1 }
 0x1cd   :  { %v521_v29 = vpop.f32.mrf.mxu1 }
 0x1ce   :  { %v522_v31 = vadd.f32 %v521_v29, %v448_v27 }
 0x1cf   :  { %v720_v32 = vpop.f32.mrf.mxu1 }
 0x1d0   :  { %v532_v33 = vadd.f32 %v568_v30, %v522_v31 }
 0x1d2   :  { %534 = vst.msk [vmem:[%s965_s5] sm:$0xff] %vm533_vm6, %v532_v33 }

// kernel: _lambda_.6
= control target key start
LH: loop header
LB: loop body
LE: loop exit
PB: predicated region body
PF: predicated region fallthrough
CT: control target
= control target key end

     0   :  { %vm84_vm0 = vcmask 1043456   ;;  %vm14_vm1 = vcmask 26624   ;;  %v1583_v0 = vmov 0.0   ;;  %vm20_vm2 = vcmask 31744   ;;  %s1980_s1 = inlined_call_operand.vmem [shape: f32[7,4,64], index: 1, kind: input, shape index: {}]   ;;  %s1981_s0 = inlined_call_operand.vmem [shape: f32[64,4], index: 0, kind: input, shape index: {}]   ;;  %s1982_s2 = inlined_call_operand.vmem [shape: f32[1,64], index: 2, kind: input, shape index: {}]   ;;  %s1983_s3 = inlined_call_operand.vmem [shape: f32[64,64], index: 3, kind: output, shape index: {}]  }
   0x1   :  { %1375 = vmatprep.subr.mxu0 %v1583_v0  ;;  %1578 = vmatprep.subr.mxu1 %v1583_v0  ;;  %v1228_v1 = vld [vmem:[%s1980_s1 + $0x4] sm:$0xf]  ;;  %15 = vst.msk [vmem:[#allocation2] sm:$0x7] %vm14_vm1, %v1583_v0  ;;  %25 = vst.msk [vmem:[#allocation2 + $0x23] sm:$0x7] %vm14_vm1, %v1583_v0 }
   0x2   :  { %v16_v2 = vld [vmem:[%s1981_s0] sm:$0xff]  ;;  %26 = vst.msk [vmem:[#allocation2 + $0x26] sm:$0x7] %vm14_vm1, %v1583_v0  ;;  %35 = vst.msk [vmem:[#allocation2 + $0x49] sm:$0x7] %vm14_vm1, %v1583_v0  ;;  %1376 = vmatpush3.msk.msra.mxu0 %vm84_vm0, %v1228_v1  ;;  %1579 = vmatpush3.msk.msra.mxu1 %vm84_vm0, %v1228_v1  ;;  %v17_v4 = vld [vmem:[%s1981_s0 + $0x8] sm:$0xff] }
   0x3   :  { %v27_v3 = vld [vmem:[%s1981_s0 + $0x20] sm:$0xff]  ;;  %21 = vst.msk [vmem:[#allocation2 + $0x3] sm:$0xff] %vm20_vm2, %v16_v2  ;;  %vm1584_vm3 = vmmov 0   ;;  %22 = vst.msk [vmem:[#allocation2 + $0xb] sm:$0xff] %vm20_vm2, %v17_v4  ;;  %v28_v5 = vld [vmem:[%s1981_s0 + $0x28] sm:$0xff]  ;;  %1433 = vmatprep.subr.mxu0 %v1583_v0  ;;  %1404 = vmatprep.subr.mxu1 %v1583_v0  ;;  %vm1154_vm4 = vcmask 523264  }
   0x4   :  { %31 = vst.msk [vmem:[#allocation2 + $0x29] sm:$0xff] %vm20_vm2, %v27_v3  ;;  %1377 = vmatprep.mubr.msk.f32.mxu0 %vm1584_vm3, %v1583_v0  ;;  %1392 = vmatprep.mubr.msk.f32.mxu1 %vm1584_vm3, %v1583_v0  ;;  %v18_v6 = vld [vmem:[%s1981_s0 + $0x10] sm:$0xff]  ;;  %32 = vst.msk [vmem:[#allocation2 + $0x31] sm:$0xff] %vm20_vm2, %v28_v5  ;;  %v19_v8 = vld [vmem:[%s1981_s0 + $0x18] sm:$0xff]  ;;  %vm1163_vm5 = vcmask 519168   ;;  %vm1169_vm6 = vcmask 523270  }
   0x5   :  { %v29_v7 = vld [vmem:[%s1981_s0 + $0x30] sm:$0xff]  ;;  %23 = vst.msk [vmem:[#allocation2 + $0x13] sm:$0xff] %vm20_vm2, %v18_v6  ;;  %v30_v9 = vld [vmem:[%s1981_s0 + $0x38] sm:$0xff]  ;;  %24 = vst.msk [vmem:[#allocation2 + $0x1b] sm:$0xff] %vm20_vm2, %v19_v8  ;;  %vm1174_vm7 = vcmask 521216  }
   0x6   :  { %33 = vst.msk [vmem:[#allocation2 + $0x39] sm:$0xff] %vm20_vm2, %v29_v7  ;;  %34 = vst.msk [vmem:[#allocation2 + $0x41] sm:$0xff] %vm20_vm2, %v30_v9  ;;  %v1249_v10 = vld [vmem:[%s1980_s1 + $0x8] sm:$0xf]  ;;  %v45_v11 = vld [vmem:[%s1980_s1] sm:$0xf] }
   0x7   :  { %v1260_v22 = vld [vmem:[%s1980_s1 + $0xc] sm:$0xf]  ;;  %v1271_v25 = vld [vmem:[%s1980_s1 + $0x10] sm:$0xf]  ;;  %v1282_v42 = vld [vmem:[%s1980_s1 + $0x14] sm:$0xf] }
   0x8   :  { %v1293_v45 = vld [vmem:[%s1980_s1 + $0x18] sm:$0xf] }
   0xa   :  { %v46_v12 = vld [vmem:[#allocation2 + $0x1] sm:$0xff]  ;;  %v47_v14 = vld [vmem:[#allocation2 + $0x9] sm:$0xff] }
   0xb   :  { %v51_v13 = vld [vmem:[#allocation2 + $0x29] sm:$0xff]  ;;  %1378 = vmatmul.mubr.msk.f32.vlgmr.msra.gmra.mxu0 %vm20_vm2, %v46_v12  ;;  %v52_v15 = vld [vmem:[#allocation2 + $0x31] sm:$0xff]  ;;  %v36_v21 = vld [vmem:[#allocation2] sm:$0xff] }
   0xc   :  { %1393 = vmatmul.mubr.msk.f32.vlgmr.msra.gmra.mxu1 %vm20_vm2, %v51_v13  ;;  %1434 = vmatpush3.msk.msra.mxu0 %vm84_vm0, %v1249_v10  ;;  %v48_v16 = vld [vmem:[#allocation2 + $0x11] sm:$0xff]  ;;  %v49_v18 = vld [vmem:[#allocation2 + $0x19] sm:$0xff]  ;;  %v50_v20 = vld [vmem:[#allocation2 + $0x21] sm:$0xff] }
   0xd   :  { %1405 = vmatpush3.msk.msra.mxu1 %vm84_vm0, %v45_v11  ;;  %1380 = vmatprep.mubr.msk.f32.mxu0 %vm1584_vm3, %v1583_v0  ;;  %v53_v17 = vld [vmem:[#allocation2 + $0x39] sm:$0xff]  ;;  %v54_v19 = vld [vmem:[#allocation2 + $0x41] sm:$0x3f]  ;;  %v37_v23 = vld [vmem:[#allocation2 + $0x8] sm:$0xff] }
   0xe   :  { %1395 = vmatprep.mubr.msk.f32.mxu1 %vm1584_vm3, %v1583_v0  ;;  %1462 = vmatprep.subr.mxu1 %v1583_v0  ;;  %v338_v24 = vld [vmem:[#allocation2 + $0x2] sm:$0xff]  ;;  %v38_v26 = vld [vmem:[#allocation2 + $0x10] sm:$0xff]  ;;  %v39_v28 = vld [vmem:[#allocation2 + $0x18] sm:$0xff] }
   0xf   :  { %1491 = vmatprep.subr.mxu0 %v1583_v0  ;;  %1381 = vmatmul.mubr.msk.f32.gmra.mxu0 %vm20_vm2, %v47_v14  ;;  %v339_v27 = vld [vmem:[#allocation2 + $0xa] sm:$0xff]  ;;  %v340_v29 = vld [vmem:[#allocation2 + $0x12] sm:$0xff]  ;;  %v40_v30 = vld [vmem:[#allocation2 + $0x20] sm:$0xff] }
  0x10   :  { %1396 = vmatmul.mubr.msk.f32.gmra.mxu1 %vm20_vm2, %v52_v15  ;;  %1383 = vmatprep.mubr.msk.f32.mxu0 %vm1584_vm3, %v1583_v0  ;;  %v341_v31 = vld [vmem:[#allocation2 + $0x1a] sm:$0xff]  ;;  %v41_v32 = vld [vmem:[#allocation2 + $0x28] sm:$0xff]  ;;  %v42_v34 = vld [vmem:[#allocation2 + $0x30] sm:$0xff] }
  0x11   :  { %1398 = vmatprep.mubr.msk.f32.mxu1 %vm1584_vm3, %v1583_v0  ;;  %v342_v33 = vld [vmem:[#allocation2 + $0x22] sm:$0xff]  ;;  %v343_v35 = vld [vmem:[#allocation2 + $0x2a] sm:$0xff]  ;;  %v43_v36 = vld [vmem:[#allocation2 + $0x38] sm:$0xff] }
  0x12   :  { %v344_v37 = vld [vmem:[#allocation2 + $0x32] sm:$0xff]  ;;  %v44_v38 = vld [vmem:[#allocation2 + $0x40] sm:$0x3f]  ;;  %v978_v63 = vld [vmem:[#allocation2 + $0x6] sm:$0xff] }
  0x13   :  { %1384 = vmatmul.mubr.msk.f32.gmra.mxu0 %vm20_vm2, %v48_v16  ;;  %v345_v39 = vld [vmem:[#allocation2 + $0x3a] sm:$0xff]  ;;  %v346_v40 = vld [vmem:[#allocation2 + $0x42] sm:$0x3f]  ;;  %v499_v43 = vld [vmem:[#allocation2 + $0xb] sm:$0xff]  ;;  %v1585_v16 = vmov -inf  }
  0x14   :  { %1399 = vmatmul.mubr.msk.f32.gmra.mxu1 %vm20_vm2, %v53_v17  ;;  %1386 = vmatprep.mubr.msk.f32.mxu0 %vm1584_vm3, %v1583_v0  ;;  %v498_v41 = vld [vmem:[#allocation2 + $0x3] sm:$0xff]  ;;  %v500_v46 = vld [vmem:[#allocation2 + $0x13] sm:$0xff]  ;;  %v501_v48 = vld [vmem:[#allocation2 + $0x1b] sm:$0xff]  ;;  %1155 = vst.msk [vmem:[#allocation3] sm:$0xff] %vm1154_vm4, %v1585_v16 }
  0x15   :  { %1401 = vmatprep.mubr.msk.f32.mxu1 %vm1584_vm3, %v1583_v0  ;;  %v658_v44 = vld [vmem:[#allocation2 + $0x4] sm:$0xff]  ;;  %v659_v47 = vld [vmem:[#allocation2 + $0xc] sm:$0xff]  ;;  %v660_v49 = vld [vmem:[#allocation2 + $0x14] sm:$0xff]  ;;  %1156 = vst.msk [vmem:[#allocation3 + $0x8] sm:$0xff] %vm1154_vm4, %v1585_v16 }
  0x16   :  { %v502_v50 = vld [vmem:[#allocation2 + $0x23] sm:$0xff]  ;;  %v503_v52 = vld [vmem:[#allocation2 + $0x2b] sm:$0xff]  ;;  %v504_v54 = vld [vmem:[#allocation2 + $0x33] sm:$0xff]  ;;  %1157 = vst.msk [vmem:[#allocation3 + $0x10] sm:$0xff] %vm1154_vm4, %v1585_v16 }
  0x17   :  { %1387 = vmatmul.mubr.msk.f32.gmra.mxu0 %vm20_vm2, %v49_v18  ;;  %v661_v51 = vld [vmem:[#allocation2 + $0x1c] sm:$0xff]  ;;  %v662_v53 = vld [vmem:[#allocation2 + $0x24] sm:$0xff]  ;;  %v663_v55 = vld [vmem:[#allocation2 + $0x2c] sm:$0xff]  ;;  %1158 = vst.msk [vmem:[#allocation3 + $0x18] sm:$0xff] %vm1154_vm4, %v1585_v16 }
  0x18   :  { %1402 = vmatmul.mubr.msk.f32.gmra.mxu1 %vm20_vm2, %v54_v19  ;;  %1389 = vmatprep.mubr.msk.f32.mxu0 %vm1584_vm3, %v1583_v0  ;;  %v505_v56 = vld [vmem:[#allocation2 + $0x3b] sm:$0xff]  ;;  %v506_v58 = vld [vmem:[#allocation2 + $0x43] sm:$0x3f]  ;;  %v819_v62 = vld [vmem:[#allocation2 + $0xd] sm:$0xff]  ;;  %1159 = vst.msk [vmem:[#allocation3 + $0x20] sm:$0xff] %vm1154_vm4, %v1585_v16 }
  0x19   :  { %1406 = vmatprep.mubr.msk.f32.mxu1 %vm1584_vm3, %v1583_v0  ;;  %v664_v57 = vld [vmem:[#allocation2 + $0x34] sm:$0xff]  ;;  %v665_v59 = vld [vmem:[#allocation2 + $0x3c] sm:$0xff]  ;;  %v666_v60 = vld [vmem:[#allocation2 + $0x44] sm:$0x3f]  ;;  %1160 = vst.msk [vmem:[#allocation3 + $0x28] sm:$0xff] %vm1154_vm4, %v1585_v16 }
  0x1a   :  { %v818_v61 = vld [vmem:[#allocation2 + $0x5] sm:$0xff]  ;;  %v820_v1 = vld [vmem:[#allocation2 + $0x15] sm:$0xff]  ;;  %v821_v3 = vld [vmem:[#allocation2 + $0x1d] sm:$0xff]  ;;  %1161 = vst.msk [vmem:[#allocation3 + $0x30] sm:$0xff] %vm1154_vm4, %v1585_v16 }
  0x1b   :  { %1390 = vmatmul.mubr.msk.f32.gmra.mxu0 %vm20_vm2, %v50_v20  ;;  %v979_v2 = vld [vmem:[#allocation2 + $0xe] sm:$0xff]  ;;  %v980_v4 = vld [vmem:[#allocation2 + $0x16] sm:$0xff]  ;;  %v822_v5 = vld [vmem:[#allocation2 + $0x25] sm:$0xff]  ;;  %1162 = vst.msk [vmem:[#allocation3 + $0x38] sm:$0xff] %vm1154_vm4, %v1585_v16 }
  0x1c   :  { %1407 = vmatmul.mubr.msk.f32.vlgmr.msra.gmra.mxu1 %vm20_vm2, %v36_v21  ;;  %1435 = vmatprep.mubr.msk.f32.mxu0 %vm1584_vm3, %v1583_v0  ;;  %v981_v6 = vld [vmem:[#allocation2 + $0x1e] sm:$0xff]  ;;  %v823_v7 = vld [vmem:[#allocation2 + $0x2d] sm:$0xff]  ;;  %v824_v9 = vld [vmem:[#allocation2 + $0x35] sm:$0xff]  ;;  %1164 = vst.msk [vmem:[#allocation3 + $0x40] sm:$0xf] %vm1163_vm5, %v1585_v16 }
  0x1d   :  { %1463 = vmatpush3.msk.msra.mxu1 %vm84_vm0, %v1260_v22  ;;  %1409 = vmatprep.mubr.msk.f32.mxu1 %vm1584_vm3, %v1583_v0  ;;  %v982_v8 = vld [vmem:[#allocation2 + $0x26] sm:$0xff]  ;;  %v983_v10 = vld [vmem:[#allocation2 + $0x2e] sm:$0xff]  ;;  %v825_v11 = vld [vmem:[#allocation2 + $0x3d] sm:$0xff] }
  0x1e   :  { %1520 = vmatprep.subr.mxu1 %v1583_v0  ;;  %v984_v12 = vld [vmem:[#allocation2 + $0x36] sm:$0xff]  ;;  %v826_v13 = vld [vmem:[#allocation2 + $0x45] sm:$0x3f] }
  0x1f   :  { %1436 = vmatmul.mubr.msk.f32.vlgmr.msra.gmra.mxu0 %vm20_vm2, %v338_v24  ;;  %v985_v14 = vld [vmem:[#allocation2 + $0x3e] sm:$0xff]  ;;  %v986_v15 = vld [vmem:[#allocation2 + $0x46] sm:$0x3f] }
  0x20   :  { %1410 = vmatmul.mubr.msk.f32.gmra.mxu1 %vm20_vm2, %v37_v23  ;;  %1492 = vmatpush3.msk.msra.mxu0 %vm84_vm0, %v1271_v25 }
  0x21   :  { %1412 = vmatprep.mubr.msk.f32.mxu1 %vm1584_vm3, %v1583_v0  ;;  %1438 = vmatprep.mubr.msk.f32.mxu0 %vm1584_vm3, %v1583_v0 }
  0x22   :  { %1549 = vmatprep.subr.mxu0 %v1583_v0 }
  0x23   :  { %1439 = vmatmul.mubr.msk.f32.gmra.mxu0 %vm20_vm2, %v339_v27 }
  0x24   :  { %1413 = vmatmul.mubr.msk.f32.gmra.mxu1 %vm20_vm2, %v38_v26  ;;  %1441 = vmatprep.mubr.msk.f32.mxu0 %vm1584_vm3, %v1583_v0 }
  0x25   :  { %1415 = vmatprep.mubr.msk.f32.mxu1 %vm1584_vm3, %v1583_v0 }
  0x27   :  { %1442 = vmatmul.mubr.msk.f32.gmra.mxu0 %vm20_vm2, %v340_v29 }
  0x28   :  { %1416 = vmatmul.mubr.msk.f32.gmra.mxu1 %vm20_vm2, %v39_v28  ;;  %1444 = vmatprep.mubr.msk.f32.mxu0 %vm1584_vm3, %v1583_v0 }
  0x29   :  { %1418 = vmatprep.mubr.msk.f32.mxu1 %vm1584_vm3, %v1583_v0 }
  0x2b   :  { %1445 = vmatmul.mubr.msk.f32.gmra.mxu0 %vm20_vm2, %v341_v31 }
  0x2c   :  { %1419 = vmatmul.mubr.msk.f32.gmra.mxu1 %vm20_vm2, %v40_v30  ;;  %1447 = vmatprep.mubr.msk.f32.mxu0 %vm1584_vm3, %v1583_v0 }
  0x2d   :  { %1421 = vmatprep.mubr.msk.f32.mxu1 %vm1584_vm3, %v1583_v0 }
  0x2f   :  { %1448 = vmatmul.mubr.msk.f32.gmra.mxu0 %vm20_vm2, %v342_v33 }
  0x30   :  { %1422 = vmatmul.mubr.msk.f32.gmra.mxu1 %vm20_vm2, %v41_v32  ;;  %1450 = vmatprep.mubr.msk.f32.mxu0 %vm1584_vm3, %v1583_v0 }
  0x31   :  { %1424 = vmatprep.mubr.msk.f32.mxu1 %vm1584_vm3, %v1583_v0 }
  0x33   :  { %1451 = vmatmul.mubr.msk.f32.gmra.mxu0 %vm20_vm2, %v343_v35 }
  0x34   :  { %1425 = vmatmul.mubr.msk.f32.gmra.mxu1 %vm20_vm2, %v42_v34  ;;  %1453 = vmatprep.mubr.msk.f32.mxu0 %vm1584_vm3, %v1583_v0 }
  0x35   :  { %1427 = vmatprep.mubr.msk.f32.mxu1 %vm1584_vm3, %v1583_v0 }
  0x37   :  { %1454 = vmatmul.mubr.msk.f32.gmra.mxu0 %vm20_vm2, %v344_v37 }
  0x38   :  { %1428 = vmatmul.mubr.msk.f32.gmra.mxu1 %vm20_vm2, %v43_v36  ;;  %1456 = vmatprep.mubr.msk.f32.mxu0 %vm1584_vm3, %v1583_v0 }
  0x39   :  { %1430 = vmatprep.mubr.msk.f32.mxu1 %vm1584_vm3, %v1583_v0 }
  0x3b   :  { %1457 = vmatmul.mubr.msk.f32.gmra.mxu0 %vm20_vm2, %v345_v39 }
  0x3c   :  { %1431 = vmatmul.mubr.msk.f32.gmra.mxu1 %vm20_vm2, %v44_v38  ;;  %1459 = vmatprep.mubr.msk.f32.mxu0 %vm1584_vm3, %v1583_v0 }
  0x3d   :  { %1464 = vmatprep.mubr.msk.f32.mxu1 %vm1584_vm3, %v1583_v0 }
  0x3f   :  { %1460 = vmatmul.mubr.msk.f32.gmra.mxu0 %vm20_vm2, %v346_v40 }
  0x40   :  { %1465 = vmatmul.mubr.msk.f32.vlgmr.msra.gmra.mxu1 %vm20_vm2, %v498_v41  ;;  %1493 = vmatprep.mubr.msk.f32.mxu0 %vm1584_vm3, %v1583_v0 }
  0x41   :  { %1521 = vmatpush3.msk.msra.mxu1 %vm84_vm0, %v1282_v42  ;;  %1467 = vmatprep.mubr.msk.f32.mxu1 %vm1584_vm3, %v1583_v0 }
  0x43   :  { %1494 = vmatmul.mubr.msk.f32.vlgmr.msra.gmra.mxu0 %vm20_vm2, %v658_v44 }
  0x44   :  { %1468 = vmatmul.mubr.msk.f32.gmra.mxu1 %vm20_vm2, %v499_v43  ;;  %1550 = vmatpush3.msk.msra.mxu0 %vm84_vm0, %v1293_v45 }
  0x45   :  { %1470 = vmatprep.mubr.msk.f32.mxu1 %vm1584_vm3, %v1583_v0  ;;  %1496 = vmatprep.mubr.msk.f32.mxu0 %vm1584_vm3, %v1583_v0 }
  0x47   :  { %1497 = vmatmul.mubr.msk.f32.gmra.mxu0 %vm20_vm2, %v659_v47 }
  0x48   :  { %1471 = vmatmul.mubr.msk.f32.gmra.mxu1 %vm20_vm2, %v500_v46  ;;  %1499 = vmatprep.mubr.msk.f32.mxu0 %vm1584_vm3, %v1583_v0 }
  0x49   :  { %1473 = vmatprep.mubr.msk.f32.mxu1 %vm1584_vm3, %v1583_v0 }
  0x4b   :  { %1500 = vmatmul.mubr.msk.f32.gmra.mxu0 %vm20_vm2, %v660_v49 }
  0x4c   :  { %1474 = vmatmul.mubr.msk.f32.gmra.mxu1 %vm20_vm2, %v501_v48  ;;  %1502 = vmatprep.mubr.msk.f32.mxu0 %vm1584_vm3, %v1583_v0 }
  0x4d   :  { %1476 = vmatprep.mubr.msk.f32.mxu1 %vm1584_vm3, %v1583_v0 }
  0x4f   :  { %1503 = vmatmul.mubr.msk.f32.gmra.mxu0 %vm20_vm2, %v661_v51 }
  0x50   :  { %1477 = vmatmul.mubr.msk.f32.gmra.mxu1 %vm20_vm2, %v502_v50  ;;  %1505 = vmatprep.mubr.msk.f32.mxu0 %vm1584_vm3, %v1583_v0 }
  0x51   :  { %1479 = vmatprep.mubr.msk.f32.mxu1 %vm1584_vm3, %v1583_v0 }
  0x53   :  { %1506 = vmatmul.mubr.msk.f32.gmra.mxu0 %vm20_vm2, %v662_v53 }
  0x54   :  { %1480 = vmatmul.mubr.msk.f32.gmra.mxu1 %vm20_vm2, %v503_v52  ;;  %1508 = vmatprep.mubr.msk.f32.mxu0 %vm1584_vm3, %v1583_v0 }
  0x55   :  { %1482 = vmatprep.mubr.msk.f32.mxu1 %vm1584_vm3, %v1583_v0 }
  0x57   :  { %1509 = vmatmul.mubr.msk.f32.gmra.mxu0 %vm20_vm2, %v663_v55 }
  0x58   :  { %1483 = vmatmul.mubr.msk.f32.gmra.mxu1 %vm20_vm2, %v504_v54  ;;  %1511 = vmatprep.mubr.msk.f32.mxu0 %vm1584_vm3, %v1583_v0 }
  0x59   :  { %1485 = vmatprep.mubr.msk.f32.mxu1 %vm1584_vm3, %v1583_v0 }
  0x5b   :  { %1512 = vmatmul.mubr.msk.f32.gmra.mxu0 %vm20_vm2, %v664_v57 }
  0x5c   :  { %1486 = vmatmul.mubr.msk.f32.gmra.mxu1 %vm20_vm2, %v505_v56  ;;  %1514 = vmatprep.mubr.msk.f32.mxu0 %vm1584_vm3, %v1583_v0 }
  0x5d   :  { %1488 = vmatprep.mubr.msk.f32.mxu1 %vm1584_vm3, %v1583_v0 }
  0x5f   :  { %1515 = vmatmul.mubr.msk.f32.gmra.mxu0 %vm20_vm2, %v665_v59 }
  0x60   :  { %1489 = vmatmul.mubr.msk.f32.gmra.mxu1 %vm20_vm2, %v506_v58  ;;  %1517 = vmatprep.mubr.msk.f32.mxu0 %vm1584_vm3, %v1583_v0 }
  0x61   :  { %1522 = vmatprep.mubr.msk.f32.mxu1 %vm1584_vm3, %v1583_v0 }
  0x63   :  { %1518 = vmatmul.mubr.msk.f32.gmra.mxu0 %vm20_vm2, %v666_v60 }
  0x64   :  { %1523 = vmatmul.mubr.msk.f32.vlgmr.msra.gmra.mxu1 %vm20_vm2, %v818_v61  ;;  %1551 = vmatprep.mubr.msk.f32.mxu0 %vm1584_vm3, %v1583_v0 }
  0x65   :  { %1525 = vmatprep.mubr.msk.f32.mxu1 %vm1584_vm3, %v1583_v0 }
  0x67   :  { %1552 = vmatmul.mubr.msk.f32.vlgmr.msra.gmra.mxu0 %vm20_vm2, %v978_v63 }
  0x68   :  { %1526 = vmatmul.mubr.msk.f32.gmra.mxu1 %vm20_vm2, %v819_v62  ;;  %1554 = vmatprep.mubr.msk.f32.mxu0 %vm1584_vm3, %v1583_v0 }
  0x69   :  { %1528 = vmatprep.mubr.msk.f32.mxu1 %vm1584_vm3, %v1583_v0 }
  0x6b   :  { %1555 = vmatmul.mubr.msk.f32.gmra.mxu0 %vm20_vm2, %v979_v2 }
  0x6c   :  { %1529 = vmatmul.mubr.msk.f32.gmra.mxu1 %vm20_vm2, %v820_v1  ;;  %1557 = vmatprep.mubr.msk.f32.mxu0 %vm1584_vm3, %v1583_v0 }
  0x6d   :  { %1531 = vmatprep.mubr.msk.f32.mxu1 %vm1584_vm3, %v1583_v0 }
  0x6f   :  { %1558 = vmatmul.mubr.msk.f32.gmra.mxu0 %vm20_vm2, %v980_v4 }
  0x70   :  { %1532 = vmatmul.mubr.msk.f32.gmra.mxu1 %vm20_vm2, %v821_v3  ;;  %1560 = vmatprep.mubr.msk.f32.mxu0 %vm1584_vm3, %v1583_v0 }
  0x71   :  { %1534 = vmatprep.mubr.msk.f32.mxu1 %vm1584_vm3, %v1583_v0 }
  0x73   :  { %1561 = vmatmul.mubr.msk.f32.gmra.mxu0 %vm20_vm2, %v981_v6 }
  0x74   :  { %1535 = vmatmul.mubr.msk.f32.gmra.mxu1 %vm20_vm2, %v822_v5  ;;  %1563 = vmatprep.mubr.msk.f32.mxu0 %vm1584_vm3, %v1583_v0 }
  0x75   :  { %1537 = vmatprep.mubr.msk.f32.mxu1 %vm1584_vm3, %v1583_v0 }
  0x77   :  { %1564 = vmatmul.mubr.msk.f32.gmra.mxu0 %vm20_vm2, %v982_v8 }
  0x78   :  { %1538 = vmatmul.mubr.msk.f32.gmra.mxu1 %vm20_vm2, %v823_v7  ;;  %1566 = vmatprep.mubr.msk.f32.mxu0 %vm1584_vm3, %v1583_v0 }
  0x79   :  { %1540 = vmatprep.mubr.msk.f32.mxu1 %vm1584_vm3, %v1583_v0 }
  0x7b   :  { %1567 = vmatmul.mubr.msk.f32.gmra.mxu0 %vm20_vm2, %v983_v10 }
  0x7c   :  { %1541 = vmatmul.mubr.msk.f32.gmra.mxu1 %vm20_vm2, %v824_v9  ;;  %1569 = vmatprep.mubr.msk.f32.mxu0 %vm1584_vm3, %v1583_v0 }
  0x7d   :  { %1543 = vmatprep.mubr.msk.f32.mxu1 %vm1584_vm3, %v1583_v0 }
  0x7f   :  { %1570 = vmatmul.mubr.msk.f32.gmra.mxu0 %vm20_vm2, %v984_v12 }
  0x80   :  { %1544 = vmatmul.mubr.msk.f32.gmra.mxu1 %vm20_vm2, %v825_v11  ;;  %1572 = vmatprep.mubr.msk.f32.mxu0 %vm1584_vm3, %v1583_v0 }
  0x81   :  { %1546 = vmatprep.mubr.msk.f32.mxu1 %vm1584_vm3, %v1583_v0 }
  0x83   :  { %1573 = vmatmul.mubr.msk.f32.gmra.mxu0 %vm20_vm2, %v985_v14 }
  0x84   :  { %1547 = vmatmul.mubr.msk.f32.gmra.mxu1 %vm20_vm2, %v826_v13  ;;  %1575 = vmatprep.mubr.msk.f32.mxu0 %vm1584_vm3, %v1583_v0 }
  0x87   :  { %1576 = vmatmul.mubr.msk.f32.gmra.mxu0 %vm20_vm2, %v986_v15 }
  0xcb   :  { %v154_v0 = vpop.f32.mrf.mxu0 }
  0xcc   :  { %v179_v17 = vpop.f32.mrf.mxu1 }
  0xcd   :  { %v1379_v18 = vpop.f32.mrf.mxu0 }
  0xce   :  { %v1394_v19 = vpop.f32.mrf.mxu1 }
  0xcf   :  { %v159_v20 = vpop.f32.mrf.mxu0 }
  0xd0   :  { %v184_v21 = vpop.f32.mrf.mxu1 }
  0xd1   :  { %v1382_v22 = vpop.f32.mrf.mxu0 }
  0xd2   :  { %v1397_v23 = vpop.f32.mrf.mxu1 }
  0xd3   :  { %v164_v24 = vpop.f32.mrf.mxu0 }
  0xd4   :  { %v189_v25 = vpop.f32.mrf.mxu1 }
  0xd5   :  { %v1385_v26 = vpop.f32.mrf.mxu0 }
  0xd6   :  { %v1400_v27 = vpop.f32.mrf.mxu1 }
  0xd7   :  { %v169_v28 = vpop.f32.mrf.mxu0 }
  0xd8   :  { %v194_v29 = vpop.f32.mrf.mxu1 }
  0xd9   :  { %v1388_v30 = vpop.f32.mrf.mxu0 }
  0xda   :  { %v1403_v31 = vpop.f32.mrf.mxu1 }
  0xdb   :  { %v174_v32 = vpop.f32.mrf.mxu0 }
  0xdc   :  { %v294_v33 = vpop.f32.mrf.mxu1 }
  0xdd   :  { %v295_v34 = vadd.f32 %v294_v33, %v154_v0  ;;  %v1391_v35 = vpop.f32.mrf.mxu0 }
  0xde   :  { %v1408_v36 = vpop.f32.mrf.mxu1 }
  0xdf   :  { %v445_v38 = vpop.f32.mrf.mxu0 }
  0xe0   :  { %v299_v37 = vpop.f32.mrf.mxu1  ;;  %v1876_v40 = vadd.f32 %v445_v38, %v295_v34 }
  0xe1   :  { %v300_v39 = vadd.f32 %v299_v37, %v159_v20  ;;  %v1437_v42 = vpop.f32.mrf.mxu0 }
  0xe2   :  { %v1411_v41 = vpop.f32.mrf.mxu1 }
  0xe3   :  { %v450_v44 = vpop.f32.mrf.mxu0 }
  0xe4   :  { %v304_v43 = vpop.f32.mrf.mxu1  ;;  %v1878_v46 = vadd.f32 %v450_v44, %v300_v39 }
  0xe5   :  { %v305_v45 = vadd.f32 %v304_v43, %v164_v24  ;;  %v1440_v48 = vpop.f32.mrf.mxu0 }
  0xe6   :  { %v1414_v47 = vpop.f32.mrf.mxu1 }
  0xe7   :  { %v455_v50 = vpop.f32.mrf.mxu0 }
  0xe8   :  { %v309_v49 = vpop.f32.mrf.mxu1  ;;  %v1880_v52 = vadd.f32 %v455_v50, %v305_v45 }
  0xe9   :  { %v310_v51 = vadd.f32 %v309_v49, %v169_v28  ;;  %v1443_v54 = vpop.f32.mrf.mxu0 }
  0xea   :  { %v1417_v53 = vpop.f32.mrf.mxu1 }
  0xeb   :  { %v460_v56 = vpop.f32.mrf.mxu0 }
  0xec   :  { %v314_v55 = vpop.f32.mrf.mxu1  ;;  %v1882_v58 = vadd.f32 %v460_v56, %v310_v51 }
  0xed   :  { %v315_v57 = vadd.f32 %v314_v55, %v174_v32  ;;  %v1446_v60 = vpop.f32.mrf.mxu0 }
  0xee   :  { %v1420_v59 = vpop.f32.mrf.mxu1 }
  0xef   :  { %v465_v62 = vpop.f32.mrf.mxu0 }
  0xf0   :  { %v319_v61 = vpop.f32.mrf.mxu1  ;;  %v1884_v1 = vadd.f32 %v465_v62, %v315_v57 }
  0xf1   :  { %v320_v63 = vadd.f32 %v319_v61, %v179_v17  ;;  %v1449_v3 = vpop.f32.mrf.mxu0 }
  0xf2   :  { %v1423_v2 = vpop.f32.mrf.mxu1 }
  0xf3   :  { %v470_v5 = vpop.f32.mrf.mxu0 }
  0xf4   :  { %v324_v4 = vpop.f32.mrf.mxu1  ;;  %v1886_v7 = vadd.f32 %v470_v5, %v320_v63 }
  0xf5   :  { %v325_v6 = vadd.f32 %v324_v4, %v184_v21  ;;  %v1452_v9 = vpop.f32.mrf.mxu0 }
  0xf6   :  { %v1426_v8 = vpop.f32.mrf.mxu1 }
  0xf7   :  { %v475_v11 = vpop.f32.mrf.mxu0 }
  0xf8   :  { %v329_v10 = vpop.f32.mrf.mxu1  ;;  %v1888_v13 = vadd.f32 %v475_v11, %v325_v6  ;;  %v1915_v11 = vld [vmem:[%s1982_s2] ss:$0 sm:$0xff] }
  0xf9   :  { %v330_v12 = vadd.f32 %v329_v10, %v189_v25  ;;  %v1455_v15 = vpop.f32.mrf.mxu0 }
  0xfa   :  { %v1429_v14 = vpop.f32.mrf.mxu1 }
  0xfb   :  { %v480_v0 = vpop.f32.mrf.mxu0 }
  0xfc   :  { %v334_v16 = vpop.f32.mrf.mxu1  ;;  %v1890_v18 = vadd.f32 %v480_v0, %v330_v12 }
  0xfd   :  { %v335_v17 = vadd.f32 %v334_v16, %v194_v29  ;;  %v1458_v20 = vpop.f32.mrf.mxu0 }
  0xfe   :  { %v1432_v19 = vpop.f32.mrf.mxu1 }
  0xff   :  { %v485_v22 = vpop.f32.mrf.mxu0 }
 0x100   :  { %v605_v21 = vpop.f32.mrf.mxu1  ;;  %v1892_v23 = vadd.f32 %v485_v22, %v335_v17 }
 0x101   :  { %v1461_v24 = vpop.f32.mrf.mxu0  ;;  %v649_v62 = vadd.f32 %v605_v21, %v1876_v40 }
 0x102   :  { %v1466_v26 = vpop.f32.mrf.mxu1 }
 0x103   :  { %v765_v28 = vpop.f32.mrf.mxu0 }
 0x104   :  { %v610_v27 = vpop.f32.mrf.mxu1  ;;  %v809_v3 = vadd.f32 %v765_v28, %v649_v62 }
 0x105   :  { %v1495_v30 = vpop.f32.mrf.mxu0  ;;  %v650_v6 = vadd.f32 %v610_v27, %v1878_v46 }
 0x106   :  { %v1469_v25 = vpop.f32.mrf.mxu1 }
 0x107   :  { %v770_v32 = vpop.f32.mrf.mxu0 }
 0x108   :  { %v615_v31 = vpop.f32.mrf.mxu1  ;;  %v810_v12 = vadd.f32 %v770_v32, %v650_v6 }
 0x109   :  { %v1498_v34 = vpop.f32.mrf.mxu0  ;;  %v651_v16 = vadd.f32 %v615_v31, %v1880_v52 }
 0x10a   :  { %v1472_v33 = vpop.f32.mrf.mxu1 }
 0x10b   :  { %v775_v29 = vpop.f32.mrf.mxu0 }
 0x10c   :  { %v620_v35 = vpop.f32.mrf.mxu1  ;;  %v811_v46 = vadd.f32 %v775_v29, %v651_v16 }
 0x10d   :  { %v1501_v37 = vpop.f32.mrf.mxu0  ;;  %v652_v26 = vadd.f32 %v620_v35, %v1882_v58 }
 0x10e   :  { %v1475_v36 = vpop.f32.mrf.mxu1 }
 0x10f   :  { %v780_v39 = vpop.f32.mrf.mxu0 }
 0x110   :  { %v625_v38 = vpop.f32.mrf.mxu1  ;;  %v812_v32 = vadd.f32 %v780_v39, %v652_v26 }
 0x111   :  { %v1504_v42 = vpop.f32.mrf.mxu0  ;;  %v653_v34 = vadd.f32 %v625_v38, %v1884_v1 }
 0x112   :  { %v1478_v41 = vpop.f32.mrf.mxu1 }
 0x113   :  { %v785_v44 = vpop.f32.mrf.mxu0 }
 0x114   :  { %v1894_v43 = vpop.f32.mrf.mxu1  ;;  %v813_v35 = vadd.f32 %v785_v44, %v653_v34 }
 0x115   :  { %v1507_v47 = vpop.f32.mrf.mxu0 }
 0x116   :  { %v1481_v45 = vpop.f32.mrf.mxu1 }
 0x117   :  { %v1898_v49 = vpop.f32.mrf.mxu0 }
 0x118   :  { %v1896_v48 = vpop.f32.mrf.mxu1 }
 0x119   :  { %v1510_v51 = vpop.f32.mrf.mxu0 }
 0x11a   :  { %v1484_v50 = vpop.f32.mrf.mxu1 }
 0x11b   :  { %v1902_v54 = vpop.f32.mrf.mxu0  ;;  %v654_v50 = vadd.f32 %v1894_v43, %v1886_v7  ;;  %v655_v7 = vadd.f32 %v1896_v48, %v1888_v13 }
 0x11c   :  { %v1900_v53 = vpop.f32.mrf.mxu1 }
 0x11d   :  { %v1513_v56 = vpop.f32.mrf.mxu0 }
 0x11e   :  { %v1487_v55 = vpop.f32.mrf.mxu1 }
 0x11f   :  { %v1906_v59 = vpop.f32.mrf.mxu0 }
 0x120   :  { %v1904_v57 = vpop.f32.mrf.mxu1 }
 0x121   :  { %v1516_v61 = vpop.f32.mrf.mxu0 }
 0x122   :  { %v1490_v60 = vpop.f32.mrf.mxu1 }
 0x123   :  { %v1909_v63 = vpop.f32.mrf.mxu0 }
 0x124   :  { %v925_v2 = vpop.f32.mrf.mxu1 }
 0x125   :  { %v1519_v4 = vpop.f32.mrf.mxu0  ;;  %v969_v8 = vadd.f32 %v925_v2, %v809_v3  ;;  %v814_v2 = vadd.f32 %v1898_v49, %v654_v50 }
 0x126   :  { %v1524_v5 = vpop.f32.mrf.mxu1 }
 0x127   :  { %v1085_v10 = vpop.f32.mrf.mxu0 }
 0x128   :  { %v930_v9 = vpop.f32.mrf.mxu1  ;;  %v1129_v14 = vadd.f32 %v1085_v10, %v969_v8 }
 0x129   :  { %v1553_v40 = vpop.f32.mrf.mxu0  ;;  %v970_v0 = vadd.f32 %v930_v9, %v810_v12 }
 0x12a   :  { %v1527_v15 = vpop.f32.mrf.mxu1  ;;  %v1145_v17 = vadd.f32 %v1915_v11, %v1129_v14 }
 0x12b   :  { %v1090_v20 = vpop.f32.mrf.mxu0  ;;  %v815_v15 = vadd.f32 %v1902_v54, %v655_v7 }
 0x12c   :  { %v935_v19 = vpop.f32.mrf.mxu1  ;;  %1165 = vst.msk [vmem:[#allocation3 + $0x1] sm:$0xff] %vm1154_vm4, %v1145_v17  ;;  %v1130_v22 = vadd.f32 %v1090_v20, %v970_v0  ;;  %v656_v0 = vadd.f32 %v1900_v53, %v1890_v18 }
 0x12d   :  { %v1556_v24 = vpop.f32.mrf.mxu0  ;;  %v971_v27 = vadd.f32 %v935_v19, %v811_v46 }
 0x12e   :  { %v1530_v21 = vpop.f32.mrf.mxu1  ;;  %v1146_v28 = vadd.f32 %v1915_v11, %v1130_v22  ;;  %v816_v26 = vadd.f32 %v1906_v59, %v656_v0 }
 0x12f   :  { %v1095_v30 = vpop.f32.mrf.mxu0 }
 0x130   :  { %v940_v25 = vpop.f32.mrf.mxu1  ;;  %1166 = vst.msk [vmem:[#allocation3 + $0x9] sm:$0xff] %vm1154_vm4, %v1146_v28  ;;  %v1131_v52 = vadd.f32 %v1095_v30, %v971_v27 }
 0x131   :  { %v1559_v33 = vpop.f32.mrf.mxu0  ;;  %v972_v29 = vadd.f32 %v940_v25, %v812_v32  ;;  %v657_v32 = vadd.f32 %v1904_v57, %v1892_v23 }
 0x132   :  { %v1533_v31 = vpop.f32.mrf.mxu1  ;;  %v1147_v36 = vadd.f32 %v1915_v11, %v1131_v52 }
 0x133   :  { %v1176_v37 = vld [vmem:[#allocation3] sm:$0xff]  ;;  %v1100_v58 = vpop.f32.mrf.mxu0 }
 0x134   :  { %v1180_v41 = vld [vmem:[#allocation3 + $0x1] sm:$0xff]  ;;  %v945_v42 = vpop.f32.mrf.mxu1  ;;  %1167 = vst.msk [vmem:[#allocation3 + $0x11] sm:$0xff] %vm1154_vm4, %v1147_v36  ;;  %v1132_v45 = vadd.f32 %v1100_v58, %v972_v29  ;;  %v817_v29 = vadd.f32 %v1909_v63, %v657_v32 }
 0x135   :  { %v1562_v39 = vpop.f32.mrf.mxu0  ;;  %v1184_v51 = vmax.f32 %v1176_v37, %v1180_v41  ;;  %v973_v55 = vadd.f32 %v945_v42, %v813_v35 }
 0x136   :  { %v1536_v47 = vpop.f32.mrf.mxu1  ;;  %v1148_v1 = vadd.f32 %v1915_v11, %v1132_v45 }
 0x137   :  { %v1177_v38 = vld [vmem:[#allocation3 + $0x8] sm:$0xff]  ;;  %v1105_v62 = vpop.f32.mrf.mxu0 }
 0x138   :  { %v1181_v56 = vld [vmem:[#allocation3 + $0x9] sm:$0xff]  ;;  %v950_v61 = vpop.f32.mrf.mxu1  ;;  %1168 = vst.msk [vmem:[#allocation3 + $0x19] sm:$0xff] %vm1154_vm4, %v1148_v1  ;;  %v1133_v3 = vadd.f32 %v1105_v62, %v973_v55 }
 0x139   :  { %v1188_v60 = vld [vmem:[#allocation3 + $0x2] sm:$0xff]  ;;  %v1565_v5 = vpop.f32.mrf.mxu0  ;;  %v1185_v43 = vmax.f32 %v1177_v38, %v1181_v56  ;;  %v974_v6 = vadd.f32 %v950_v61, %v814_v2 }
 0x13a   :  { %v1192_v44 = vmax.f32 %v1184_v51, %v1188_v60  ;;  %v1539_v4 = vpop.f32.mrf.mxu1  ;;  %v1149_v8 = vadd.f32 %v1915_v11, %v1133_v3 }
 0x13b   :  { %v1178_v49 = vld [vmem:[#allocation3 + $0x10] sm:$0xff]  ;;  %v1110_v14 = vpop.f32.mrf.mxu0 }
 0x13c   :  { %1196 = vst.msk [vmem:[%s1983_s3] sm:$0xff] %vm1154_vm4, %v1192_v44  ;;  %v1182_v9 = vld [vmem:[#allocation3 + $0x11] sm:$0xff]  ;;  %v955_v12 = vpop.f32.mrf.mxu1  ;;  %v1134_v16 = vadd.f32 %v1110_v14, %v974_v6 }
 0x13d   :  { %v1189_v10 = vld [vmem:[#allocation3 + $0xa] sm:$0xff]  ;;  %1170 = vst.msk [vmem:[#allocation3 + $0x1d] sm:$0xc0] %vm1169_vm6, %v1149_v8  ;;  %v1568_v48 = vpop.f32.mrf.mxu0  ;;  %v1186_v17 = vmax.f32 %v1178_v49, %v1182_v9  ;;  %v975_v19 = vadd.f32 %v955_v12, %v815_v15 }
 0x13e   :  { %v1193_v40 = vmax.f32 %v1185_v43, %v1189_v10  ;;  %v1542_v13 = vpop.f32.mrf.mxu1  ;;  %v1150_v20 = vadd.f32 %v1915_v11, %v1134_v16 }
 0x13f   :  { %v1179_v46 = vld [vmem:[#allocation3 + $0x18] sm:$0xff]  ;;  %v1115_v24 = vpop.f32.mrf.mxu0 }
 0x140   :  { %1197 = vst.msk [vmem:[%s1983_s3 + $0x8] sm:$0xff] %vm1154_vm4, %v1193_v40  ;;  %v1183_v22 = vld [vmem:[#allocation3 + $0x19] sm:$0xff]  ;;  %v960_v21 = vpop.f32.mrf.mxu1  ;;  %1171 = vst.msk [vmem:[#allocation3 + $0x25] sm:$0xff] %vm1154_vm4, %v1150_v20  ;;  %v1135_v18 = vadd.f32 %v1115_v24, %v975_v19 }
 0x141   :  { %v1190_v54 = vld [vmem:[#allocation3 + $0x12] sm:$0xff]  ;;  %v1187_v27 = vmax.f32 %v1179_v46, %v1183_v22  ;;  %v1191_v53 = vld [vmem:[#allocation3 + $0x1a] sm:$0xff]  ;;  %v1571_v30 = vpop.f32.mrf.mxu0  ;;  %v976_v31 = vadd.f32 %v960_v21, %v816_v26 }
 0x142   :  { %v1194_v28 = vmax.f32 %v1186_v17, %v1190_v54  ;;  %v1545_v25 = vpop.f32.mrf.mxu1  ;;  %v1151_v59 = vadd.f32 %v1915_v11, %v1135_v18 }
 0x143   :  { %v1195_v52 = vmax.f32 %v1187_v27, %v1191_v53  ;;  %v1120_v34 = vpop.f32.mrf.mxu0 }
 0x144   :  { %1198 = vst.msk [vmem:[%s1983_s3 + $0x10] sm:$0xff] %vm1154_vm4, %v1194_v28  ;;  %v965_v33 = vpop.f32.mrf.mxu1  ;;  %1172 = vst.msk [vmem:[#allocation3 + $0x2d] sm:$0xff] %vm1154_vm4, %v1151_v59  ;;  %v1136_v23 = vadd.f32 %v1120_v34, %v976_v31 }
 0x145   :  { %1199 = vst.msk [vmem:[%s1983_s3 + $0x18] sm:$0xff] %vm1154_vm4, %v1195_v52  ;;  %v1574_v36 = vpop.f32.mrf.mxu0  ;;  %v977_v37 = vadd.f32 %v965_v33, %v817_v29 }
 0x146   :  { %v1548_v57 = vpop.f32.mrf.mxu1  ;;  %v1152_v41 = vadd.f32 %v1915_v11, %v1136_v23 }
 0x147   :  { %v1200_v42 = vld [vmem:[#allocation3 + $0x22] sm:$0xff]  ;;  %v1125_v35 = vpop.f32.mrf.mxu0 }
 0x148   :  { %v1204_v58 = vld [vmem:[#allocation3 + $0x23] sm:$0xff]  ;;  %1173 = vst.msk [vmem:[#allocation3 + $0x35] sm:$0xff] %vm1154_vm4, %v1152_v41  ;;  %v1137_v63 = vadd.f32 %v1125_v35, %v977_v37 }
 0x149   :  { %v1208_v45 = vmax.f32 %v1200_v42, %v1204_v58  ;;  %v1212_v47 = vld [vmem:[#allocation3 + $0x24] sm:$0xff]  ;;  %v1577_v39 = vpop.f32.mrf.mxu0 }
 0x14a   :  { %v1153_v51 = vadd.f32 %v1915_v11, %v1137_v63 }
 0x14b   :  { %v1216_v50 = vmax.f32 %v1208_v45, %v1212_v47  ;;  %v1201_v55 = vld [vmem:[#allocation3 + $0x2a] sm:$0xff] }
 0x14c   :  { %v1205_v1 = vld [vmem:[#allocation3 + $0x2b] sm:$0xff]  ;;  %1175 = vst.msk [vmem:[#allocation3 + $0x3d] sm:$0x3f] %vm1174_vm7, %v1153_v51 }
 0x14d   :  { %1220 = vst.msk [vmem:[%s1983_s3 + $0x20] sm:$0xff] %vm1154_vm4, %v1216_v50  ;;  %v1209_v38 = vmax.f32 %v1201_v55, %v1205_v1  ;;  %v1213_v56 = vld [vmem:[#allocation3 + $0x2c] sm:$0xff] }
 0x14f   :  { %v1217_v60 = vmax.f32 %v1209_v38, %v1213_v56  ;;  %v1202_v61 = vld [vmem:[#allocation3 + $0x32] sm:$0xff] }
 0x150   :  { %v1206_v62 = vld [vmem:[#allocation3 + $0x33] sm:$0xff] }
 0x151   :  { %1221 = vst.msk [vmem:[%s1983_s3 + $0x28] sm:$0xff] %vm1154_vm4, %v1217_v60  ;;  %v1210_v2 = vmax.f32 %v1202_v61, %v1206_v62  ;;  %v1214_v11 = vld [vmem:[#allocation3 + $0x34] sm:$0xff] }
 0x153   :  { %v1218_v44 = vmax.f32 %v1210_v2, %v1214_v11  ;;  %v1203_v3 = vld [vmem:[#allocation3 + $0x3a] sm:$0xff] }
 0x154   :  { %v1207_v4 = vld [vmem:[#allocation3 + $0x3b] sm:$0xff] }
 0x155   :  { %1222 = vst.msk [vmem:[%s1983_s3 + $0x30] sm:$0xff] %vm1154_vm4, %v1218_v44  ;;  %v1211_v5 = vmax.f32 %v1203_v3, %v1207_v4  ;;  %v1215_v7 = vld [vmem:[#allocation3 + $0x3c] sm:$0xff] }
 0x157   :  { %v1219_v43 = vmax.f32 %v1211_v5, %v1215_v7 }
 0x159   :  { %1223 = vst.msk [vmem:[%s1983_s3 + $0x38] sm:$0xff] %vm1154_vm4, %v1219_v43 }

// kernel: _lambda_.8
= control target key start
LH: loop header
LB: loop body
LE: loop exit
PB: predicated region body
PF: predicated region fallthrough
CT: control target
= control target key end

     0   :  { %vm59_vm0 = vcmask 523264   ;;  %vm52_vm1 = vcmask 516096   ;;  %v2028_v0 = vmov 0.0   ;;  %vm2029_vm2 = vmmov 0   ;;  %s2531_s1 = inlined_call_operand.vmem [shape: f32[3,64,32], index: 1, kind: input, shape index: {}]   ;;  %s2532_s0 = inlined_call_operand.vmem [shape: f32[32,64], index: 0, kind: input, shape index: {}]   ;;  %s2533_s3 = inlined_call_operand.vmem [shape: f32[3,96,32], index: 3, kind: input, shape index: {}]   ;;  %s2534_s5 = inlined_call_operand.vmem [shape: f32[128,64], index: 5, kind: input, shape index: {}]   ;;  %s2535_s2 = inlined_call_operand.vmem [shape: f32[1,32], index: 2, kind: input, shape index: {}, may-alias: {2,4}]   ;;  %s2536_s4 = inlined_call_operand.vmem [shape: f32[1,32], index: 4, kind: input, shape index: {}, may-alias: {2,4}]   ;;  %s2537_s6 = inlined_call_operand.vmem [shape: f32[1,64], index: 6, kind: input, shape index: {}]   ;;  %s2538_s7 = inlined_call_operand.vmem [shape: f32[16,64], index: 7, kind: output, shape index: {}]  }
   0x1   :  { %1766 = vmatprep.subr.mxu0 %v2028_v0  ;;  %v1537_v1 = vld [vmem:[%s2531_s1 + $0x78] sm:$0xff]  ;;  %1797 = vmatprep.subr.mxu1 %v2028_v0  ;;  %v1536_v3 = vld [vmem:[%s2531_s1 + $0x70] sm:$0xff]  ;;  %472 = vst.msk [vmem:[#allocation2 + $0x38] sm:$0xff] %vm59_vm0, %v2028_v0  ;;  %v1535_v5 = vld [vmem:[%s2531_s1 + $0x68] sm:$0xff]  ;;  %vm417_vm3 = vcmask 261120   ;;  %vm420_vm4 = vcmask 261122  }
   0x2   :  { %v33_v2 = vld [vmem:[%s2531_s1 + $0x38] sm:$0xff]  ;;  %53 = vst.msk [vmem:[#allocation2] sm:$0x1] %vm52_vm1, %v2028_v0  ;;  %54 = vst.msk [vmem:[#allocation2 + $0x11] sm:$0x1] %vm52_vm1, %v2028_v0  ;;  %1767 = vmatpush3.msra.mxu0 %v1537_v1  ;;  %v32_v4 = vld [vmem:[%s2531_s1 + $0x30] sm:$0xff]  ;;  %1782 = vmatprep.mubr.msk.f32.mxu0 %vm2029_vm2, %v2028_v0 }
   0x3   :  { %62 = vst.msk [vmem:[#allocation2 + $0x12] sm:$0x1] %vm52_vm1, %v2028_v0  ;;  %63 = vst.msk [vmem:[#allocation2 + $0x23] sm:$0x1] %vm52_vm1, %v2028_v0  ;;  %1798 = vmatpush3.msra.mxu1 %v33_v2  ;;  %1768 = vmatprep.subr.mxu0 %v2028_v0  ;;  %v31_v6 = vld [vmem:[%s2531_s1 + $0x28] sm:$0xff]  ;;  %v1534_v7 = vld [vmem:[%s2531_s1 + $0x60] sm:$0xff] }
   0x4   :  { %1799 = vmatprep.subr.mxu1 %v2028_v0  ;;  %1769 = vmatpush3.msra.mxu0 %v1536_v3  ;;  %v30_v8 = vld [vmem:[%s2531_s1 + $0x20] sm:$0xff]  ;;  %v1533_v10 = vld [vmem:[%s2531_s1 + $0x58] sm:$0xff]  ;;  %v2123_v13 = vld [vmem:[%s2532_s0 + $0x8] sm:$0xff]  ;;  %vm423_vm5 = vcmask 254976  }
   0x5   :  { %1800 = vmatpush3.msra.mxu1 %v32_v4  ;;  %1770 = vmatprep.subr.mxu0 %v2028_v0  ;;  %v2109_v9 = vld [vmem:[%s2532_s0] sm:$0xff]  ;;  %v29_v11 = vld [vmem:[%s2531_s1 + $0x18] sm:$0xff]  ;;  %v58_v14 = vmax.f32 %v2123_v13, 0.0  ;;  %v64_v15 = vld [vmem:[%s2532_s0 + $0x10] sm:$0xff] }
   0x6   :  { %1801 = vmatprep.subr.mxu1 %v2028_v0  ;;  %1771 = vmatpush3.msra.mxu0 %v1535_v5  ;;  %v57_v12 = vmax.f32 %v2109_v9, 0.0  ;;  %v1532_v16 = vld [vmem:[%s2531_s1 + $0x50] sm:$0xff]  ;;  %v66_v18 = vmax.f32 %v64_v15, 0.0  ;;  %v65_v19 = vld [vmem:[%s2532_s0 + $0x18] sm:$0xff]  ;;  %v1531_v21 = vld [vmem:[%s2531_s1 + $0x48] sm:$0xff] }
   0x7   :  { %1802 = vmatpush3.msra.mxu1 %v31_v6  ;;  %1772 = vmatprep.subr.mxu0 %v2028_v0  ;;  %v28_v17 = vld [vmem:[%s2531_s1 + $0x10] sm:$0xff]  ;;  %61 = vst.msk [vmem:[#allocation2 + $0x9] sm:$0xff] %vm59_vm0, %v58_v14  ;;  %v67_v20 = vmax.f32 %v65_v19, 0.0  ;;  %v27_v22 = vld [vmem:[%s2531_s1 + $0x8] sm:$0xff]  ;;  %v1530_v23 = vld [vmem:[%s2531_s1 + $0x40] sm:$0xff] }
   0x8   :  { %1803 = vmatprep.subr.mxu1 %v2028_v0  ;;  %1773 = vmatpush3.msra.mxu0 %v1534_v7  ;;  %60 = vst.msk [vmem:[#allocation2 + $0x1] sm:$0xff] %vm59_vm0, %v57_v12  ;;  %68 = vst.msk [vmem:[#allocation2 + $0x13] sm:$0xff] %vm59_vm0, %v66_v18  ;;  %v26_v24 = vld [vmem:[%s2531_s1] sm:$0xff]  ;;  %v1545_v27 = vld [vmem:[%s2531_s1 + $0xb8] sm:$0xff] }
   0x9   :  { %1804 = vmatpush3.msra.mxu1 %v30_v8  ;;  %1774 = vmatprep.subr.mxu0 %v2028_v0  ;;  %477 = vst.msk [vmem:[#allocation2 + $0x28] sm:$0xff] %vm59_vm0, %v66_v18  ;;  %69 = vst.msk [vmem:[#allocation2 + $0x1b] sm:$0xff] %vm59_vm0, %v67_v20  ;;  %v1544_v28 = vld [vmem:[%s2531_s1 + $0xb0] sm:$0xff]  ;;  %v1543_v33 = vld [vmem:[%s2531_s1 + $0xa8] sm:$0xff] }
   0xa   :  { %1805 = vmatprep.subr.mxu1 %v2028_v0  ;;  %1775 = vmatpush3.msra.mxu0 %v1533_v10  ;;  %478 = vst.msk [vmem:[#allocation2 + $0x30] sm:$0xff] %vm59_vm0, %v67_v20  ;;  %v1542_v43 = vld [vmem:[%s2531_s1 + $0xa0] sm:$0xff]  ;;  %v1541_v44 = vld [vmem:[%s2531_s1 + $0x98] sm:$0xff]  ;;  %v1540_v45 = vld [vmem:[%s2531_s1 + $0x90] sm:$0xff] }
   0xb   :  { %1806 = vmatpush3.msra.mxu1 %v29_v11  ;;  %1776 = vmatprep.subr.mxu0 %v2028_v0  ;;  %v1539_v46 = vld [vmem:[%s2531_s1 + $0x88] sm:$0xff]  ;;  %v1538_v47 = vld [vmem:[%s2531_s1 + $0x80] sm:$0xff]  ;;  %v1569_v48 = vld [vmem:[%s2533_s3 + $0x98] sm:$0xff] }
   0xc   :  { %1807 = vmatprep.subr.mxu1 %v2028_v0  ;;  %1777 = vmatpush3.msra.mxu0 %v1532_v16  ;;  %v1568_v49 = vld [vmem:[%s2533_s3 + $0x90] sm:$0xff]  ;;  %v1567_v50 = vld [vmem:[%s2533_s3 + $0x88] sm:$0xff]  ;;  %v1566_v51 = vld [vmem:[%s2533_s3 + $0x80] sm:$0xff] }
   0xd   :  { %1808 = vmatpush3.msra.mxu1 %v28_v17  ;;  %1778 = vmatprep.subr.mxu0 %v2028_v0  ;;  %v1565_v52 = vld [vmem:[%s2533_s3 + $0x78] sm:$0xff]  ;;  %v1564_v53 = vld [vmem:[%s2533_s3 + $0x70] sm:$0xff]  ;;  %v1563_v54 = vld [vmem:[%s2533_s3 + $0x68] sm:$0xff] }
   0xe   :  { %1809 = vmatprep.subr.mxu1 %v2028_v0  ;;  %1779 = vmatpush3.msra.mxu0 %v1531_v21  ;;  %v76_v30 = vld [vmem:[#allocation2 + $0x9] sm:$0xff]  ;;  %v1562_v55 = vld [vmem:[%s2533_s3 + $0x60] sm:$0xff]  ;;  %v432_v57 = vld [vmem:[%s2533_s3 + $0x38] sm:$0xff] }
   0xf   :  { %1810 = vmatpush3.msra.mxu1 %v27_v22  ;;  %1780 = vmatprep.subr.mxu0 %v2028_v0  ;;  %v75_v25 = vld [vmem:[#allocation2 + $0x1] sm:$0xff]  ;;  %v2182_v32 = vld [vmem:[#allocation2 + $0xa] sm:$0xff]  ;;  %v2192_v38 = vld [vmem:[#allocation2 + $0x12] sm:$0xff] }
  0x10   :  { %1781 = vmatpush3.msra.mxu0 %v1530_v23  ;;  %1811 = vmatprep.subr.mxu1 %v2028_v0  ;;  %v70_v26 = vld [vmem:[#allocation2] sm:$0xff]  ;;  %v71_v31 = vld [vmem:[#allocation2 + $0x8] sm:$0xff]  ;;  %v77_v34 = vld [vmem:[#allocation2 + $0x11] sm:$0xff] }
  0x11   :  { %1783 = vmatmul.mubr.msk.f32.vlgmr.msra.gmra.mxu0 %vm59_vm0, %v75_v25  ;;  %1812 = vmatpush3.msra.mxu1 %v26_v24  ;;  %v2175_v29 = vld [vmem:[#allocation2 + $0x2] sm:$0xff]  ;;  %v72_v35 = vld [vmem:[#allocation2 + $0x10] sm:$0xff]  ;;  %v78_v36 = vld [vmem:[#allocation2 + $0x19] sm:$0xff] }
  0x12   :  { %1813 = vmatprep.mubr.msk.f32.mxu1 %vm2029_vm2, %v2028_v0  ;;  %1828 = vmatprep.subr.mxu0 %v2028_v0  ;;  %463 = vst.msk [vmem:[#allocation2] sm:$0xff] %vm59_vm0, %v2028_v0  ;;  %469 = vst.msk [vmem:[#allocation2 + $0x8] sm:$0xff] %vm59_vm0, %v57_v12  ;;  %v73_v37 = vld [vmem:[#allocation2 + $0x18] sm:$0xff]  ;;  %v79_v40 = vld [vmem:[#allocation2 + $0x21] sm:$0x3] }
  0x13   :  { %1814 = vmatmul.mubr.msk.f32.vlgmr.msra.gmra.mxu1 %vm59_vm0, %v70_v26  ;;  %1829 = vmatpush3.msra.mxu0 %v1545_v27  ;;  %v2194_v39 = vld [vmem:[#allocation2 + $0x1a] sm:$0xff]  ;;  %470 = vst.msk [vmem:[#allocation2 + $0x10] sm:$0xff] %vm59_vm0, %v58_v14  ;;  %v2204_v42 = vld [vmem:[#allocation2 + $0x22] sm:$0x3]  ;;  %v431_v59 = vld [vmem:[%s2533_s3 + $0x30] sm:$0xff] }
  0x14   :  { %1785 = vmatprep.mubr.msk.f32.mxu0 %vm2029_vm2, %v2028_v0  ;;  %1830 = vmatprep.subr.mxu0 %v2028_v0  ;;  %v74_v41 = vld [vmem:[#allocation2 + $0x20] sm:$0x3]  ;;  %464 = vst.msk [vmem:[#allocation2 + $0x18] sm:$0xff] %vm59_vm0, %v2028_v0  ;;  %v1581_v60 = vld [vmem:[%s2533_s3 + $0xf8] sm:$0xff]  ;;  %v430_v61 = vld [vmem:[%s2533_s3 + $0x28] sm:$0xff] }
  0x15   :  { %1786 = vmatmul.mubr.msk.f32.gmra.mxu0 %vm59_vm0, %v76_v30  ;;  %1816 = vmatprep.mubr.msk.f32.mxu1 %vm2029_vm2, %v2028_v0  ;;  %471 = vst.msk [vmem:[#allocation2 + $0x20] sm:$0xff] %vm59_vm0, %v2028_v0  ;;  %v1580_v62 = vld [vmem:[%s2533_s3 + $0xf0] sm:$0xff]  ;;  %v429_v63 = vld [vmem:[%s2533_s3 + $0x20] sm:$0xff]  ;;  %v1579_v1 = vld [vmem:[%s2533_s3 + $0xe8] sm:$0xff] }
  0x16   :  { %1831 = vmatpush3.msra.mxu0 %v1544_v28  ;;  %1788 = vmatprep.mubr.msk.f32.mxu0 %vm2029_vm2, %v2028_v0  ;;  %v428_v4 = vld [vmem:[%s2533_s3 + $0x18] sm:$0xff]  ;;  %v1578_v5 = vld [vmem:[%s2533_s3 + $0xe0] sm:$0xff]  ;;  %v427_v6 = vld [vmem:[%s2533_s3 + $0x10] sm:$0xff] }
  0x17   :  { %1817 = vmatmul.mubr.msk.f32.gmra.mxu1 %vm59_vm0, %v71_v31  ;;  %1832 = vmatprep.subr.mxu0 %v2028_v0  ;;  %v1577_v7 = vld [vmem:[%s2533_s3 + $0xd8] sm:$0xff]  ;;  %v484_v8 = vld [vmem:[#allocation2 + $0x28] sm:$0xff]  ;;  %v485_v9 = vld [vmem:[#allocation2 + $0x30] sm:$0xff] }
  0x18   :  { %1833 = vmatpush3.msra.mxu0 %v1543_v33  ;;  %1819 = vmatprep.mubr.msk.f32.mxu1 %vm2029_vm2, %v2028_v0  ;;  %v426_v10 = vld [vmem:[%s2533_s3 + $0x8] sm:$0xff]  ;;  %v1576_v11 = vld [vmem:[%s2533_s3 + $0xd0] sm:$0xff]  ;;  %v425_v12 = vld [vmem:[%s2533_s3] sm:$0xff] }
  0x19   :  { %1789 = vmatmul.mubr.msk.f32.gmra.mxu0 %vm59_vm0, %v77_v34  ;;  %1834 = vmatprep.subr.mxu0 %v2028_v0  ;;  %v2292_v56 = vld [vmem:[#allocation2 + $0x8] sm:$0xff]  ;;  %v479_v14 = vld [vmem:[#allocation2] sm:$0xff]  ;;  %v698_v16 = vld [vmem:[#allocation2 + $0x38] sm:$0xff] }
  0x1a   :  { %1835 = vmatpush3.msra.mxu0 %v1542_v43  ;;  %1791 = vmatprep.mubr.msk.f32.mxu0 %vm2029_vm2, %v2028_v0  ;;  %v2299_v58 = vld [vmem:[#allocation2 + $0x10] sm:$0xff]  ;;  %v1575_v13 = vld [vmem:[%s2533_s3 + $0xc8] sm:$0xff]  ;;  %814 = vst.msk [vmem:[#allocation2] sm:$0xff] %vm417_vm3, %v2028_v0  ;;  %v1574_v15 = vld [vmem:[%s2533_s3 + $0xc0] sm:$0xff] }
  0x1b   :  { %1820 = vmatmul.mubr.msk.f32.gmra.mxu1 %vm59_vm0, %v72_v35  ;;  %1836 = vmatprep.subr.mxu0 %v2028_v0  ;;  %v482_v2 = vld [vmem:[#allocation2 + $0x18] sm:$0xff]  ;;  %823 = vst.msk [vmem:[#allocation2 + $0x38] sm:$0xff] %vm417_vm3, %v2028_v0  ;;  %v435_v18 = vld [vmem:[%s2533_s3 + $0x50] sm:$0xff]  ;;  %v434_v19 = vld [vmem:[%s2533_s3 + $0x48] sm:$0xff] }
  0x1c   :  { %1837 = vmatpush3.msra.mxu0 %v1541_v44  ;;  %1822 = vmatprep.mubr.msk.f32.mxu1 %vm2029_vm2, %v2028_v0  ;;  %v483_v3 = vld [vmem:[#allocation2 + $0x20] sm:$0xff]  ;;  %815 = vst.msk [vmem:[#allocation2 + $0x18] sm:$0xff] %vm417_vm3, %v2028_v0  ;;  %v436_v17 = vld [vmem:[%s2533_s3 + $0x58] sm:$0xff]  ;;  %v1572_v21 = vld [vmem:[%s2533_s3 + $0xb0] sm:$0xff] }
  0x1d   :  { %1792 = vmatmul.mubr.msk.f32.gmra.mxu0 %vm59_vm0, %v78_v36  ;;  %1838 = vmatprep.subr.mxu0 %v2028_v0  ;;  %822 = vst.msk [vmem:[#allocation2 + $0x20] sm:$0xff] %vm417_vm3, %v2028_v0  ;;  %v433_v20 = vld [vmem:[%s2533_s3 + $0x40] sm:$0xff]  ;;  %v1571_v23 = vld [vmem:[%s2533_s3 + $0xa8] sm:$0xff]  ;;  %v2403_v25 = vld [vmem:[%s2533_s3 + $0x118] sm:$0xff] }
  0x1e   :  { %1839 = vmatpush3.msra.mxu0 %v1540_v45  ;;  %1794 = vmatprep.mubr.msk.f32.mxu0 %vm2029_vm2, %v2028_v0  ;;  %v1570_v24 = vld [vmem:[%s2533_s3 + $0xa0] sm:$0xff]  ;;  %v2409_v26 = vld [vmem:[%s2534_s5 + $0x58] sm:$0xff] }
  0x1f   :  { %1823 = vmatmul.mubr.msk.f32.gmra.mxu1 %vm59_vm0, %v73_v37  ;;  %1840 = vmatprep.subr.mxu0 %v2028_v0 }
  0x20   :  { %1825 = vmatprep.mubr.msk.f32.mxu1 %vm2029_vm2, %v2028_v0  ;;  %1841 = vmatpush3.msra.mxu0 %v1539_v46 }
  0x21   :  { %1795 = vmatmul.mubr.msk.f32.gmra.mxu0 %vm59_vm0, %v79_v40  ;;  %1842 = vmatprep.subr.mxu0 %v2028_v0  ;;  %v830_v22 = vld [vmem:[#allocation2] sm:$0xff] }
  0x22   :  { %1843 = vmatpush3.msra.mxu0 %v1538_v47  ;;  %1844 = vmatprep.mubr.msk.f32.mxu0 %vm2029_vm2, %v2028_v0 }
  0x23   :  { %1826 = vmatmul.mubr.msk.f32.gmra.mxu1 %vm59_vm0, %v74_v41  ;;  %1859 = vmatprep.subr.mxu1 %v1569_v48 }
  0x24   :  { %1860 = vmatpush3.msra.mxu1 %v1569_v48  ;;  %1875 = vmatprep.mubr.msk.f32.mxu1 %vm59_vm0, %v2292_v56  ;;  %v1561_v48 = vld [vmem:[%s2535_s2] ss:$0 sm:$0xff] }
  0x25   :  { %1845 = vmatmul.mubr.msk.f32.vlgmr.msra.gmra.mxu0 %vm59_vm0, %v2175_v29  ;;  %1861 = vmatprep.subr.mxu1 %v1568_v49 }
  0x26   :  { %1847 = vmatprep.mubr.msk.f32.mxu0 %vm2029_vm2, %v2028_v0  ;;  %1862 = vmatpush3.msra.mxu1 %v1568_v49 }
  0x27   :  { %1863 = vmatprep.subr.mxu1 %v1567_v50  ;;  %1909 = vmatprep.subr.mxu0 %v1581_v60 }
  0x28   :  { %1864 = vmatpush3.msra.mxu1 %v1567_v50  ;;  %1910 = vmatpush3.msra.mxu0 %v1581_v60 }
  0x29   :  { %1848 = vmatmul.mubr.msk.f32.gmra.mxu0 %vm59_vm0, %v2182_v32  ;;  %1865 = vmatprep.subr.mxu1 %v1566_v51 }
  0x2a   :  { %1850 = vmatprep.mubr.msk.f32.mxu0 %vm2029_vm2, %v2028_v0  ;;  %1866 = vmatpush3.msra.mxu1 %v1566_v51 }
  0x2b   :  { %1867 = vmatprep.subr.mxu1 %v1565_v52  ;;  %1911 = vmatprep.subr.mxu0 %v1580_v62 }
  0x2c   :  { %1868 = vmatpush3.msra.mxu1 %v1565_v52  ;;  %1912 = vmatpush3.msra.mxu0 %v1580_v62 }
  0x2d   :  { %1851 = vmatmul.mubr.msk.f32.gmra.mxu0 %vm59_vm0, %v2192_v38  ;;  %1869 = vmatprep.subr.mxu1 %v1564_v53 }
  0x2e   :  { %1853 = vmatprep.mubr.msk.f32.mxu0 %vm2029_vm2, %v2028_v0  ;;  %1870 = vmatpush3.msra.mxu1 %v1564_v53 }
  0x2f   :  { %1871 = vmatprep.subr.mxu1 %v1563_v54  ;;  %1913 = vmatprep.subr.mxu0 %v1579_v1 }
  0x30   :  { %1872 = vmatpush3.msra.mxu1 %v1563_v54  ;;  %1914 = vmatpush3.msra.mxu0 %v1579_v1 }
  0x31   :  { %1854 = vmatmul.mubr.msk.f32.gmra.mxu0 %vm59_vm0, %v2194_v39  ;;  %1873 = vmatprep.subr.mxu1 %v1562_v55 }
  0x32   :  { %1856 = vmatprep.mubr.msk.f32.mxu0 %vm2029_vm2, %v2028_v0  ;;  %1874 = vmatpush3.msra.mxu1 %v1562_v55  ;;  %v1573_v0 = vld [vmem:[%s2533_s3 + $0xb8] sm:$0xff] }
  0x33   :  { %1884 = vmatprep.subr.mxu1 %v432_v57  ;;  %1876 = vmatmul.mubr.msk.f32.vlgmr.msra.gmra.mxu1 %vm59_vm0, %v2299_v58 }
  0x34   :  { %1885 = vmatpush3.msra.mxu1 %v432_v57  ;;  %1878 = vmatprep.mubr.msk.f32.mxu1 %vm59_vm0, %v482_v2 }
  0x35   :  { %1857 = vmatmul.mubr.msk.f32.gmra.mxu0 %vm59_vm0, %v2204_v42  ;;  %1886 = vmatprep.subr.mxu1 %v431_v59 }
  0x36   :  { %1925 = vmatprep.mubr.msk.f32.mxu0 %vm59_vm0, %v2299_v58  ;;  %1887 = vmatpush3.msra.mxu1 %v431_v59 }
  0x37   :  { %1888 = vmatprep.subr.mxu1 %v430_v61  ;;  %1879 = vmatmul.mubr.msk.f32.gmra.mxu1 %vm59_vm0, %v483_v3 }
  0x38   :  { %1889 = vmatpush3.msra.mxu1 %v430_v61  ;;  %1915 = vmatprep.subr.mxu0 %v1578_v5 }
  0x39   :  { %1890 = vmatprep.subr.mxu1 %v429_v63  ;;  %1916 = vmatpush3.msra.mxu0 %v1578_v5 }
  0x3a   :  { %1891 = vmatpush3.msra.mxu1 %v429_v63  ;;  %1917 = vmatprep.subr.mxu0 %v1577_v7 }
  0x3b   :  { %1892 = vmatprep.subr.mxu1 %v428_v4  ;;  %1881 = vmatprep.mubr.msk.f32.mxu1 %vm59_vm0, %v484_v8 }
  0x3c   :  { %1893 = vmatpush3.msra.mxu1 %v428_v4  ;;  %1918 = vmatpush3.msra.mxu0 %v1577_v7 }
  0x3d   :  { %1894 = vmatprep.subr.mxu1 %v427_v6  ;;  %1882 = vmatmul.mubr.msk.f32.gmra.mxu1 %vm59_vm0, %v485_v9 }
  0x3e   :  { %1895 = vmatpush3.msra.mxu1 %v427_v6  ;;  %1919 = vmatprep.subr.mxu0 %v1576_v11 }
  0x3f   :  { %1896 = vmatprep.subr.mxu1 %v426_v10  ;;  %1920 = vmatpush3.msra.mxu0 %v1576_v11 }
  0x40   :  { %1897 = vmatpush3.msra.mxu1 %v426_v10  ;;  %1921 = vmatprep.subr.mxu0 %v1575_v13 }
  0x41   :  { %1898 = vmatprep.subr.mxu1 %v425_v12  ;;  %1900 = vmatprep.mubr.msk.f32.mxu1 %vm59_vm0, %v479_v14 }
  0x42   :  { %1899 = vmatpush3.msra.mxu1 %v425_v12  ;;  %1922 = vmatpush3.msra.mxu0 %v1575_v13 }
  0x43   :  { %1901 = vmatmul.mubr.msk.f32.vlgmr.msra.gmra.mxu1 %vm59_vm0, %v2292_v56  ;;  %1923 = vmatprep.subr.mxu0 %v1574_v15 }
  0x44   :  { %1924 = vmatpush3.msra.mxu0 %v1574_v15  ;;  %1903 = vmatprep.mubr.msk.f32.mxu1 %vm59_vm0, %v2299_v58  ;;  %v1584_v15 = vld [vmem:[%s2533_s3 + $0x110] sm:$0xff] }
  0x45   :  { %1926 = vmatmul.mubr.msk.f32.vlgmr.msra.gmra.mxu0 %vm59_vm0, %v482_v2  ;;  %1934 = vmatprep.subr.mxu1 %v436_v17 }
  0x46   :  { %1928 = vmatprep.mubr.msk.f32.mxu0 %vm59_vm0, %v483_v3  ;;  %1935 = vmatpush3.msra.mxu1 %v436_v17 }
  0x47   :  { %1904 = vmatmul.mubr.msk.f32.gmra.mxu1 %vm59_vm0, %v482_v2  ;;  %1936 = vmatprep.subr.mxu1 %v435_v18 }
  0x48   :  { %1906 = vmatprep.mubr.msk.f32.mxu1 %vm59_vm0, %v483_v3  ;;  %1937 = vmatpush3.msra.mxu1 %v435_v18  ;;  %v833_v18 = vld [vmem:[#allocation2 + $0x18] sm:$0xff] }
  0x49   :  { %1929 = vmatmul.mubr.msk.f32.gmra.mxu0 %vm59_vm0, %v484_v8  ;;  %1938 = vmatprep.subr.mxu1 %v434_v19 }
  0x4a   :  { %1931 = vmatprep.mubr.msk.f32.mxu0 %vm59_vm0, %v485_v9  ;;  %1951 = vmatprep.subr.mxu0 %v1573_v0 }
  0x4b   :  { %1907 = vmatmul.mubr.msk.f32.gmra.mxu1 %vm59_vm0, %v484_v8  ;;  %1952 = vmatpush3.msra.mxu0 %v1573_v0  ;;  %v1583_v0 = vld [vmem:[%s2533_s3 + $0x108] sm:$0xff] }
  0x4c   :  { %1939 = vmatpush3.msra.mxu1 %v434_v19  ;;  %1953 = vmatprep.subr.mxu0 %v1572_v21 }
  0x4d   :  { %1932 = vmatmul.mubr.msk.f32.gmra.mxu0 %vm59_vm0, %v698_v16  ;;  %1940 = vmatprep.subr.mxu1 %v433_v20 }
  0x4e   :  { %1941 = vmatpush3.msra.mxu1 %v433_v20  ;;  %1942 = vmatprep.mubr.msk.f32.mxu1 %vm417_vm3, %v830_v22  ;;  %v834_v20 = vld [vmem:[#allocation2 + $0x20] sm:$0xff] }
  0x4f   :  { %1954 = vmatpush3.msra.mxu0 %v1572_v21  ;;  %1968 = vmatprep.subr.mxu1 %v2403_v25 }
  0x50   :  { %1955 = vmatprep.subr.mxu0 %v1571_v23 }
  0x51   :  { %1956 = vmatpush3.msra.mxu0 %v1571_v23 }
  0x52   :  { %1957 = vmatprep.subr.mxu0 %v1570_v24 }
  0x53   :  { %1958 = vmatpush3.msra.mxu0 %v1570_v24  ;;  %v1582_v24 = vld [vmem:[%s2533_s3 + $0x100] sm:$0xff] }
  0x54   :  { %1985 = vmatprep.subr.mxu0 %v2409_v26 }
  0xd1   :  { %v161_v27 = vpop.f32.mrf.mxu0 }
  0xd3   :  { %v266_v28 = vpop.f32.mrf.mxu1  ;;  %v1784_v29 = vpop.f32.mrf.mxu0 }
  0xd4   :  { %v267_v46 = vadd.f32 %v266_v28, %v161_v27  ;;  %v1248_v27 = vld [vmem:[%s2534_s5 + $0x50] sm:$0xff]  ;;  %v1230_v28 = vld [vmem:[%s2534_s5 + $0x38] sm:$0xff] }
  0xd5   :  { %v1815_v30 = vpop.f32.mrf.mxu1  ;;  %v166_v31 = vpop.f32.mrf.mxu0 }
  0xd7   :  { %v271_v32 = vpop.f32.mrf.mxu1  ;;  %v1787_v33 = vpop.f32.mrf.mxu0 }
  0xd8   :  { %v272_v52 = vadd.f32 %v271_v32, %v166_v31  ;;  %v1247_v31 = vld [vmem:[%s2534_s5 + $0x48] sm:$0xff] }
  0xd9   :  { %v1818_v34 = vpop.f32.mrf.mxu1  ;;  %v171_v35 = vpop.f32.mrf.mxu0 }
  0xda   :  { %v1624_v34 = vld [vmem:[%s2532_s0 + $0x1] ss:$2 sm:$0xff] }
  0xdb   :  { %v276_v36 = vpop.f32.mrf.mxu1  ;;  %v1790_v37 = vpop.f32.mrf.mxu0 }
  0xdc   :  { %v277_v57 = vadd.f32 %v276_v36, %v171_v35  ;;  %v1246_v37 = vld [vmem:[%s2534_s5 + $0x40] sm:$0xff] }
  0xdd   :  { %v1821_v38 = vpop.f32.mrf.mxu1  ;;  %v176_v39 = vpop.f32.mrf.mxu0 }
  0xdf   :  { %v281_v40 = vpop.f32.mrf.mxu1  ;;  %v1793_v41 = vpop.f32.mrf.mxu0 }
  0xe0   :  { %v282_v62 = vadd.f32 %v281_v40, %v176_v39  ;;  %v1217_v41 = vmax.f32 %v1624_v34, 0.0 }
  0xe1   :  { %v1824_v42 = vpop.f32.mrf.mxu1  ;;  %v181_v43 = vpop.f32.mrf.mxu0 }
  0xe3   :  { %v286_v44 = vpop.f32.mrf.mxu1  ;;  %v1796_v45 = vpop.f32.mrf.mxu0 }
  0xe4   :  { %v287_v6 = vadd.f32 %v286_v44, %v181_v43  ;;  %v1229_v44 = vld [vmem:[%s2534_s5 + $0x30] sm:$0xff] }
  0xe5   :  { %v376_v47 = vpop.f32.mrf.mxu0  ;;  %v1827_v49 = vpop.f32.mrf.mxu1 }
  0xe6   :  { %v400_v50 = vadd.f32 %v376_v47, %v267_v46  ;;  %v1228_v46 = vld [vmem:[%s2534_s5 + $0x28] sm:$0xff]  ;;  %v1625_v49 = vld [vmem:[%s2532_s0 + $0x11] ss:$2 sm:$0xff] }
  0xe7   :  { %v1846_v51 = vpop.f32.mrf.mxu0 }
  0xe8   :  { %v412_v53 = vadd.f32 %v1561_v48, %v400_v50  ;;  %v1227_v51 = vld [vmem:[%s2534_s5 + $0x20] sm:$0xff] }
  0xe9   :  { %v381_v54 = vpop.f32.mrf.mxu0 }
  0xea   :  { %418 = vst.msk [vmem:[#allocation3] sm:$0xff] %vm417_vm3, %v412_v53  ;;  %v401_v55 = vadd.f32 %v381_v54, %v272_v52  ;;  %v1218_v53 = vmax.f32 %v1625_v49, 0.0  ;;  %v1226_v54 = vld [vmem:[%s2534_s5 + $0x18] sm:$0xff] }
  0xeb   :  { %v1849_v56 = vpop.f32.mrf.mxu0 }
  0xec   :  { %v413_v58 = vadd.f32 %v1561_v48, %v401_v55  ;;  %v1077_v55 = vld [vmem:[#allocation2 + $0x38] sm:$0xff] }
  0xed   :  { %v386_v59 = vpop.f32.mrf.mxu0 }
  0xee   :  { %419 = vst.msk [vmem:[#allocation3 + $0x8] sm:$0xff] %vm417_vm3, %v413_v58  ;;  %v402_v60 = vadd.f32 %v386_v59, %v277_v57  ;;  %v1225_v57 = vld [vmem:[%s2534_s5 + $0x10] sm:$0xff]  ;;  %v1224_v59 = vld [vmem:[%s2534_s5 + $0x8] sm:$0xff] }
  0xef   :  { %v1852_v61 = vpop.f32.mrf.mxu0 }
  0xf0   :  { %v414_v63 = vadd.f32 %v1561_v48, %v402_v60  ;;  %v1223_v61 = vld [vmem:[%s2534_s5] sm:$0xff] }
  0xf1   :  { %v816_v1 = vld [vmem:[#allocation3] sm:$0xff]  ;;  %v391_v2 = vpop.f32.mrf.mxu0 }
  0xf2   :  { %v818_v3 = vmax.f32 %v816_v1, 0.0  ;;  %421 = vst.msk [vmem:[#allocation3 + $0xe] sm:$0xfc] %vm420_vm4, %v414_v63  ;;  %v403_v4 = vadd.f32 %v391_v2, %v282_v62 }
  0xf3   :  { %v1855_v5 = vpop.f32.mrf.mxu0  ;;  %v1877_v60 = vpop.f32.mrf.mxu1 }
  0xf4   :  { %820 = vst.msk [vmem:[#allocation2 + $0x8] sm:$0xff] %vm417_vm3, %v818_v3  ;;  %v415_v7 = vadd.f32 %v1561_v48, %v403_v4 }
  0xf5   :  { %v817_v8 = vld [vmem:[#allocation3 + $0x8] sm:$0xff]  ;;  %v396_v9 = vpop.f32.mrf.mxu0  ;;  %v570_v63 = vpop.f32.mrf.mxu1 }
  0xf6   :  { %v819_v10 = vmax.f32 %v817_v8, 0.0  ;;  %422 = vst.msk [vmem:[#allocation3 + $0x16] sm:$0xff] %vm417_vm3, %v415_v7  ;;  %v404_v11 = vadd.f32 %v396_v9, %v287_v6  ;;  %v1231_v21 = vld [vmem:[#allocation3] ss:$2 sm:$0xff]  ;;  %v1237_v22 = vld [vmem:[#allocation3 + $0x1] ss:$2 sm:$0xff] }
  0xf7   :  { %v1858_v12 = vpop.f32.mrf.mxu0  ;;  %v1234_v29 = vmax.f32 %v1231_v21, 0.0  ;;  %v1240_v30 = vmax.f32 %v1237_v22, 0.0  ;;  %v1880_v1 = vpop.f32.mrf.mxu1 }
  0xf8   :  { %821 = vst.msk [vmem:[#allocation2 + $0x10] sm:$0xff] %vm417_vm3, %v819_v10  ;;  %v416_v13 = vadd.f32 %v1561_v48, %v404_v11  ;;  %v1623_v48 = vld [vmem:[%s2532_s0 + $0x10] ss:$2 sm:$0xff] }
  0xf9   :  { %v1242_v36 = vadd.f32 %v1240_v30, %v1234_v29  ;;  %v1212_v52 = vmax.f32 %v1623_v48, 0.0  ;;  %v580_v2 = vpop.f32.mrf.mxu1 }
  0xfa   :  { %424 = vst.msk [vmem:[#allocation3 + $0x1e] sm:$0x3] %vm423_vm5, %v416_v13 }
  0xfb   :  { %v831_v14 = vld [vmem:[#allocation2 + $0x8] sm:$0xff]  ;;  %v1244_v43 = vmul.f32 0.5, %v1242_v36  ;;  %v1220_v58 = vadd.f32 %v1218_v53, %v1212_v52 }
  0xfc   :  { %1943 = vmatmul.mubr.msk.f32.vlgmr.msra.gmra.mxu1 %vm417_vm3, %v831_v14  ;;  %1959 = vmatprep.mubr.msk.f32.mxu0 %vm417_vm3, %v831_v14 }
  0xfd   :  { %v824_v16 = vld [vmem:[#allocation3 + $0x10] sm:$0xff]  ;;  %1969 = vmatpush3.msra.mxu1 %v2403_v25  ;;  %v1222_v62 = vmul.f32 0.5, %v1220_v58  ;;  %v1883_v3 = vpop.f32.mrf.mxu1 }
  0xfe   :  { %v826_v17 = vmax.f32 %v824_v16, 0.0  ;;  %1970 = vmatprep.subr.mxu1 %v1584_v15 }
  0xff   :  { %v832_v19 = vld [vmem:[#allocation2 + $0x10] sm:$0xff]  ;;  %1971 = vmatpush3.msra.mxu1 %v1584_v15  ;;  %v588_v4 = vpop.f32.mrf.mxu1 }
 0x100   :  { %828 = vst.msk [vmem:[#allocation2 + $0x28] sm:$0xff] %vm417_vm3, %v826_v17  ;;  %1945 = vmatprep.mubr.msk.f32.mxu1 %vm417_vm3, %v832_v19  ;;  %1960 = vmatmul.mubr.msk.f32.vlgmr.msra.gmra.mxu0 %vm417_vm3, %v832_v19  ;;  %v1431_v17 = vld [vmem:[%s2534_s5 + $0x78] sm:$0xff] }
 0x101   :  { %v825_v23 = vld [vmem:[#allocation3 + $0x18] sm:$0xff]  ;;  %1946 = vmatmul.mubr.msk.f32.gmra.mxu1 %vm417_vm3, %v833_v18  ;;  %1962 = vmatprep.mubr.msk.f32.mxu0 %vm417_vm3, %v833_v18 }
 0x102   :  { %v827_v25 = vmax.f32 %v825_v23, 0.0  ;;  %1972 = vmatprep.subr.mxu1 %v1583_v0  ;;  %1948 = vmatprep.mubr.msk.f32.mxu1 %vm417_vm3, %v834_v20  ;;  %v1233_v32 = vld [vmem:[#allocation3 + $0x10] ss:$2 sm:$0xff]  ;;  %v1239_v33 = vld [vmem:[#allocation3 + $0x11] ss:$2 sm:$0xff] }
 0x103   :  { %1973 = vmatpush3.msra.mxu1 %v1583_v0  ;;  %1986 = vmatpush3.msra.mxu0 %v2409_v26  ;;  %v1208_v26 = vld [vmem:[%s2532_s0] ss:$2 sm:$0xff]  ;;  %v1235_v38 = vmax.f32 %v1233_v32, 0.0  ;;  %v1241_v39 = vmax.f32 %v1239_v33, 0.0  ;;  %v1902_v5 = vpop.f32.mrf.mxu1 }
 0x104   :  { %829 = vst.msk [vmem:[#allocation2 + $0x30] sm:$0xff] %vm417_vm3, %v827_v25  ;;  %1963 = vmatmul.mubr.msk.f32.gmra.mxu0 %vm417_vm3, %v834_v20  ;;  %1974 = vmatprep.subr.mxu1 %v1582_v24  ;;  %v1211_v40 = vmax.f32 %v1208_v26, 0.0  ;;  %v672_v6 = vadd.f32 %v1902_v5, %v1877_v60  ;;  %v1428_v0 = vld [vmem:[%s2534_s5 + $0x60] sm:$0xff] }
 0x105   :  { %1975 = vmatpush3.msra.mxu1 %v1582_v24  ;;  %1987 = vmatprep.subr.mxu0 %v1248_v27  ;;  %v1243_v45 = vadd.f32 %v1241_v39, %v1235_v38  ;;  %v666_v7 = vpop.f32.mrf.mxu1  ;;  %v1927_v8 = vpop.f32.mrf.mxu0  ;;  %v1622_v39 = vld [vmem:[%s2536_s4] ss:$0 sm:$0xff] }
 0x106   :  { %1988 = vmatpush3.msra.mxu0 %v1248_v27  ;;  %1996 = vmatprep.subr.mxu1 %v1230_v28  ;;  %v1219_v47 = vadd.f32 %v1217_v41, %v1211_v40  ;;  %v667_v9 = vadd.f32 %v666_v7, %v570_v63  ;;  %v811_v10 = vadd.f32 %v1927_v8, %v672_v6 }
 0x107   :  { %v835_v35 = vld [vmem:[#allocation2 + $0x28] sm:$0xff]  ;;  %1989 = vmatprep.subr.mxu0 %v1247_v31  ;;  %v1245_v50 = vmul.f32 0.5, %v1243_v45  ;;  %v783_v11 = vpop.f32.mrf.mxu0  ;;  %v1905_v12 = vpop.f32.mrf.mxu1 }
 0x108   :  { %1949 = vmatmul.mubr.msk.f32.gmra.mxu1 %vm417_vm3, %v835_v35  ;;  %1965 = vmatprep.mubr.msk.f32.mxu0 %vm417_vm3, %v835_v35  ;;  %v1221_v56 = vmul.f32 0.5, %v1219_v47  ;;  %v810_v13 = vadd.f32 %v783_v11, %v667_v9 }
 0x109   :  { %1976 = vmatprep.mubr.msk.f32.mxu1 %vm417_vm3, %v832_v19  ;;  %1990 = vmatpush3.msra.mxu0 %v1247_v31  ;;  %v676_v14 = vpop.f32.mrf.mxu1  ;;  %v1930_v15 = vpop.f32.mrf.mxu0  ;;  %v1429_v19 = vld [vmem:[%s2534_s5 + $0x68] sm:$0xff] }
 0x10a   :  { %1991 = vmatprep.subr.mxu0 %v1246_v37 }
 0x10b   :  { %v956_v42 = vld [vmem:[#allocation2 + $0x30] sm:$0xff]  ;;  %1992 = vmatpush3.msra.mxu0 %v1246_v37  ;;  %v793_v16 = vpop.f32.mrf.mxu0 }
 0x10c   :  { %1966 = vmatmul.mubr.msk.f32.gmra.mxu0 %vm417_vm3, %v956_v42  ;;  %1977 = vmatmul.mubr.msk.f32.vlgmr.msra.gmra.mxu1 %vm417_vm3, %v833_v18  ;;  %v1430_v18 = vld [vmem:[%s2534_s5 + $0x70] sm:$0xff] }
 0x10d   :  { %1997 = vmatpush3.msra.mxu1 %v1230_v28  ;;  %1993 = vmatprep.mubr.msk.f32.mxu0 %vm417_vm3, %v1244_v43  ;;  %v1933_v22 = vpop.f32.mrf.mxu0 }
 0x10e   :  { %1998 = vmatprep.subr.mxu1 %v1229_v44  ;;  %1979 = vmatprep.mubr.msk.f32.mxu1 %vm417_vm3, %v834_v20  ;;  %v1908_v20 = vpop.f32.mrf.mxu1 }
 0x10f   :  { %1999 = vmatpush3.msra.mxu1 %v1229_v44  ;;  %2015 = vmatprep.subr.mxu0 %v1431_v17  ;;  %v801_v24 = vpop.f32.mrf.mxu0 }
 0x110   :  { %2000 = vmatprep.subr.mxu1 %v1228_v46  ;;  %1980 = vmatmul.mubr.msk.f32.gmra.mxu1 %vm417_vm3, %v835_v35  ;;  %v684_v21 = vpop.f32.mrf.mxu1  ;;  %v690_v35 = vadd.f32 %v1908_v20, %v1883_v3 }
 0x111   :  { %1994 = vmatmul.mubr.msk.f32.vlgmr.msra.gmra.mxu0 %vm417_vm3, %v1245_v50  ;;  %2001 = vmatpush3.msra.mxu1 %v1228_v46  ;;  %v685_v40 = vadd.f32 %v684_v21, %v588_v4 }
 0x112   :  { %1982 = vmatprep.mubr.msk.f32.mxu1 %vm417_vm3, %v956_v42  ;;  %2002 = vmatprep.subr.mxu1 %v1227_v51  ;;  %v813_v45 = vadd.f32 %v1933_v22, %v690_v35 }
 0x113   :  { %2003 = vmatpush3.msra.mxu1 %v1227_v51  ;;  %2016 = vmatpush3.msra.mxu0 %v1431_v17  ;;  %v812_v49 = vadd.f32 %v801_v24, %v685_v40 }
 0x114   :  { %2004 = vmatprep.subr.mxu1 %v1226_v54  ;;  %1983 = vmatmul.mubr.msk.f32.gmra.mxu1 %vm417_vm3, %v1077_v55 }
 0x115   :  { %2005 = vmatpush3.msra.mxu1 %v1226_v54  ;;  %2012 = vmatprep.mubr.msk.f32.mxu1 %vm59_vm0, %v1221_v56 }
 0x116   :  { %2006 = vmatprep.subr.mxu1 %v1225_v57  ;;  %2017 = vmatprep.subr.mxu0 %v1430_v18 }
 0x117   :  { %2007 = vmatpush3.msra.mxu1 %v1225_v57  ;;  %2018 = vmatpush3.msra.mxu0 %v1430_v18  ;;  %v1632_v18 = vld [vmem:[%s2537_s6] ss:$0 sm:$0xff] }
 0x118   :  { %2008 = vmatprep.subr.mxu1 %v1224_v59  ;;  %2019 = vmatprep.subr.mxu0 %v1429_v19 }
 0x119   :  { %2009 = vmatpush3.msra.mxu1 %v1224_v59  ;;  %2020 = vmatpush3.msra.mxu0 %v1429_v19 }
 0x11a   :  { %2010 = vmatprep.subr.mxu1 %v1223_v61  ;;  %2021 = vmatprep.subr.mxu0 %v1428_v0 }
 0x11b   :  { %2011 = vmatpush3.msra.mxu1 %v1223_v61  ;;  %2022 = vmatpush3.msra.mxu0 %v1428_v0 }
 0x11c   :  { %2013 = vmatmul.mubr.msk.f32.vlgmr.msra.gmra.mxu1 %vm59_vm0, %v1222_v62 }
 0x1bc   :  { %v1944_v23 = vpop.f32.mrf.mxu1 }
 0x1bd   :  { %v948_v26 = vadd.f32 %v1944_v23, %v811_v10 }
 0x1be   :  { %v920_v25 = vpop.f32.mrf.mxu1 }
 0x1bf   :  { %v947_v36 = vadd.f32 %v920_v25, %v810_v13 }
 0x1c0   :  { %v1961_v27 = vpop.f32.mrf.mxu0 }
 0x1c1   :  { %v1947_v28 = vpop.f32.mrf.mxu1  ;;  %v1069_v37 = vadd.f32 %v1961_v27, %v948_v26 }
 0x1c2   :  { %v1041_v29 = vpop.f32.mrf.mxu0 }
 0x1c3   :  { %v930_v30 = vpop.f32.mrf.mxu1  ;;  %v1068_v41 = vadd.f32 %v1041_v29, %v947_v36 }
 0x1c4   :  { %v1964_v31 = vpop.f32.mrf.mxu0 }
 0x1c6   :  { %v1051_v32 = vpop.f32.mrf.mxu0 }
 0x1c8   :  { %v1950_v33 = vpop.f32.mrf.mxu1 }
 0x1c9   :  { %v950_v50 = vadd.f32 %v1950_v33, %v813_v45 }
 0x1ca   :  { %v938_v34 = vpop.f32.mrf.mxu1 }
 0x1cb   :  { %v949_v54 = vadd.f32 %v938_v34, %v812_v49 }
 0x1cc   :  { %v1978_v38 = vpop.f32.mrf.mxu1  ;;  %v1967_v43 = vpop.f32.mrf.mxu0 }
 0x1cd   :  { %v1190_v42 = vadd.f32 %v1978_v38, %v1069_v37  ;;  %v1071_v55 = vadd.f32 %v1967_v43, %v950_v50 }
 0x1ce   :  { %v1162_v44 = vpop.f32.mrf.mxu1  ;;  %v1059_v52 = vpop.f32.mrf.mxu0 }
 0x1cf   :  { %v1201_v46 = vadd.f32 %v1622_v39, %v1190_v42  ;;  %v1189_v47 = vadd.f32 %v1162_v44, %v1068_v41  ;;  %v1070_v57 = vadd.f32 %v1059_v52, %v949_v54 }
 0x1d0   :  { %v1981_v48 = vpop.f32.mrf.mxu1 }
 0x1d1   :  { %1205 = vst.msk [vmem:[#allocation3 + $0x28] sm:$0xff] %vm417_vm3, %v1201_v46  ;;  %v1200_v51 = vadd.f32 %v1622_v39, %v1189_v47  ;;  %v1995_v12 = vpop.f32.mrf.mxu0 }
 0x1d2   :  { %v1172_v53 = vpop.f32.mrf.mxu1 }
 0x1d3   :  { %1204 = vst.msk [vmem:[#allocation3 + $0x20] sm:$0xff] %vm417_vm3, %v1200_v51  ;;  %v1322_v14 = vpop.f32.mrf.mxu0 }
 0x1d4   :  { %v1984_v56 = vpop.f32.mrf.mxu1 }
 0x1d5   :  { %v1192_v58 = vadd.f32 %v1984_v56, %v1071_v55 }
 0x1d6   :  { %v1180_v59 = vpop.f32.mrf.mxu1 }
 0x1d7   :  { %v1203_v60 = vadd.f32 %v1622_v39, %v1192_v58  ;;  %v1191_v61 = vadd.f32 %v1180_v59, %v1070_v57 }
 0x1d9   :  { %1207 = vst.msk [vmem:[#allocation3 + $0x38] sm:$0xff] %vm417_vm3, %v1203_v60  ;;  %v1202_v62 = vadd.f32 %v1622_v39, %v1191_v61 }
 0x1da   :  { %v1413_v63 = vld [vmem:[#allocation3 + $0x20] ss:$2 sm:$0xff]  ;;  %v1419_v1 = vld [vmem:[#allocation3 + $0x21] ss:$2 sm:$0xff] }
 0x1db   :  { %1206 = vst.msk [vmem:[#allocation3 + $0x30] sm:$0xff] %vm417_vm3, %v1202_v62  ;;  %v1416_v2 = vmax.f32 %v1413_v63, 0.0  ;;  %v1422_v3 = vmax.f32 %v1419_v1, 0.0 }
 0x1dc   :  { %v2014_v13 = vpop.f32.mrf.mxu1 }
 0x1dd   :  { %v1424_v4 = vadd.f32 %v1422_v3, %v1416_v2  ;;  %v1409_v16 = vadd.f32 %v2014_v13, %v1995_v12 }
 0x1de   :  { %v1403_v15 = vpop.f32.mrf.mxu1 }
 0x1df   :  { %v1426_v5 = vmul.f32 0.5, %v1424_v4  ;;  %v1404_v19 = vadd.f32 %v1403_v15, %v1322_v14 }
 0x1e1   :  { %2023 = vmatprep.mubr.msk.f32.mxu0 %vm417_vm3, %v1426_v5 }
 0x1e2   :  { %v1415_v6 = vld [vmem:[#allocation3 + $0x30] ss:$2 sm:$0xff]  ;;  %v1421_v7 = vld [vmem:[#allocation3 + $0x31] ss:$2 sm:$0xff] }
 0x1e3   :  { %v1417_v8 = vmax.f32 %v1415_v6, 0.0  ;;  %v1423_v9 = vmax.f32 %v1421_v7, 0.0 }
 0x1e5   :  { %v1425_v10 = vadd.f32 %v1423_v9, %v1417_v8 }
 0x1e7   :  { %v1427_v11 = vmul.f32 0.5, %v1425_v10 }
 0x1e9   :  { %2024 = vmatmul.mubr.msk.f32.vlgmr.msra.gmra.mxu0 %vm417_vm3, %v1427_v11 }
 0x2a9   :  { %v2025_v17 = vpop.f32.mrf.mxu0 }
 0x2aa   :  { %v1514_v0 = vadd.f32 %v2025_v17, %v1409_v16 }
 0x2ab   :  { %v1504_v20 = vpop.f32.mrf.mxu0 }
 0x2ac   :  { %v1523_v21 = vadd.f32 %v1632_v18, %v1514_v0  ;;  %v1513_v22 = vadd.f32 %v1504_v20, %v1404_v19 }
 0x2ae   :  { %1525 = vst.msk [vmem:[%s2538_s7 + $0x8] sm:$0xff] %vm59_vm0, %v1523_v21  ;;  %v1522_v23 = vadd.f32 %v1632_v18, %v1513_v22 }
 0x2b0   :  { %1524 = vst.msk [vmem:[%s2538_s7] sm:$0xff] %vm59_vm0, %v1522_v23 }

// kernel: _lambda_.7
= control target key start
LH: loop header
LB: loop body
LE: loop exit
PB: predicated region body
PF: predicated region fallthrough
CT: control target
= control target key end

     0   :  { %12 = vsyncpa [#allocation5], 0  ;;  %s3392_s0 = inlined_call_operand.vmem [shape: f32[64,64], index: 0, kind: input, shape index: {}]   ;;  %s3393_s1 = inlined_call_operand.vmem [shape: f32[3,64,32], index: 1, kind: input, shape index: {}]   ;;  %s3394_s2 = inlined_call_operand.vmem [shape: f32[1,32], index: 2, kind: input, shape index: {}, may-alias: {2,4}]   ;;  %s3395_s3 = inlined_call_operand.hbm [shape: f32[3,96,32], index: 3, kind: input, shape index: {}]   ;;  %s3396_s4 = inlined_call_operand.vmem [shape: f32[1,32], index: 4, kind: input, shape index: {}, may-alias: {2,4}]   ;;  %s3397_s5 = inlined_call_operand.hbm [shape: f32[128,64], index: 5, kind: input, shape index: {}]   ;;  %s3398_s6 = inlined_call_operand.vmem [shape: f32[1,64], index: 6, kind: input, shape index: {}]   ;;  %s3399_s7 = inlined_call_operand.vmem [shape: f32[32,64], index: 7, kind: output, shape index: {}]  }
   0x1   :  { %13 = vsyncpa [#allocation7], 0  ;;  %s2733_s24 = smov [#allocation4]  }
   0x2   :  { %s25_s25 = sshll.u32 %s2733_s24, 4  ;;  %s26_s25 = int_to_ptr.vmem [resolvable:$true] %s25_s25 }
   0x3   :  { %s2697_s26 = scalar_lea.vmem %s26_s25, 4608  ;;  %p2702_p1 = scmp.lt.s32.totalorder %s26_s25, %s26_s25 }
   0x4   :  { %p2698_p0 = scmp.ne.s32.totalorder %s26_s25, %s2697_s26  ;;  %p2703_p2 = scmp.lt.s32.totalorder %s2697_s26, %s2697_s26 }
   0x6   :  { %p2704_p3 = por %p2703_p2, %p2702_p1 }
   0x8   :  { %p2705_p4 = pnand %p2704_p3, %p2698_p0 }
   0xa   :  { %2708 = shalt.err (!%p2705_p4)
}
   0xb   :  { %s2734_s27 = smov 128   ;;  %s2735_s28 = smov 8  }
   0xc   :  { %31 = dma.hbm_to_vmem [thread:$0]  %s3395_s3, 4608, %s26_s25, [#allocation5], %s2734_s27, %s2734_s27, %s2735_s28  }
   0xd   :  { %s2736_s8 = smov [#allocation6]  }
   0xe   :  { %s39_s9 = sshll.u32 %s2736_s8, 4  ;;  %s40_s9 = int_to_ptr.vmem [resolvable:$true] %s39_s9 }
   0xf   :  { %s2717_s10 = scalar_lea.vmem %s40_s9, 2048  ;;  %p2722_p6 = scmp.lt.s32.totalorder %s40_s9, %s40_s9 }
  0x10   :  { %p2718_p5 = scmp.ne.s32.totalorder %s40_s9, %s2717_s10  ;;  %p2723_p7 = scmp.lt.s32.totalorder %s2717_s10, %s2717_s10 }
  0x12   :  { %p2724_p8 = por %p2723_p7, %p2722_p6 }
  0x14   :  { %p2725_p9 = pnand %p2724_p8, %p2718_p5 }
  0x16   :  { %2728 = shalt.err (!%p2725_p9)
}
  0x17   :  { %45 = dma.hbm_to_vmem [thread:$0]  %s3397_s5, 2048, %s40_s9, [#allocation7], %s2734_s27, %s2734_s27, %s2735_s28  }
  0x18   :  { %2729 = dma.done.wait [#allocation5], 4608  }
  0x19   :  { %2730 = vsyncadd [#allocation5], 4294962688 }
  0x1a   :  { %2731 = dma.done.wait [#allocation7], 2048  }
  0x1b   :  { %2732 = vsyncadd [#allocation7], 4294965248  ;;  %vm91_vm0 = vcmask 523264   ;;  %vm80_vm1 = vcmask 516096   ;;  %v2737_v0 = vmov 0.0   ;;  %vm2738_vm2 = vmmov 0  }
  0x1c   :  { %2342 = vmatprep.subr.mxu0 %v2737_v0  ;;  %2385 = vmatprep.subr.mxu1 %v2737_v0  ;;  %638 = vst.msk [vmem:[#allocation2 + $0x58] sm:$0xff] %vm91_vm0, %v2737_v0  ;;  %v2049_v1 = vld [vmem:[%s3393_s1 + $0x78] sm:$0xff]  ;;  %v2048_v3 = vld [vmem:[%s3393_s1 + $0x70] sm:$0xff]  ;;  %v2047_v5 = vld [vmem:[%s3393_s1 + $0x68] sm:$0xff]  ;;  %vm573_vm3 = vcmask 261120   ;;  %vm578_vm4 = vcmask 261122  }
  0x1d   :  { %81 = vst.msk [vmem:[#allocation2] sm:$0x1] %vm80_vm1, %v2737_v0  ;;  %82 = vst.msk [vmem:[#allocation2 + $0x21] sm:$0x1] %vm80_vm1, %v2737_v0  ;;  %2358 = vmatprep.mubr.msk.f32.mxu0 %vm2738_vm2, %v2737_v0  ;;  %2401 = vmatprep.mubr.msk.f32.mxu1 %vm2738_vm2, %v2737_v0  ;;  %v61_v2 = vld [vmem:[%s3393_s1 + $0x38] sm:$0xff]  ;;  %v60_v4 = vld [vmem:[%s3393_s1 + $0x30] sm:$0xff] }
  0x1e   :  { %96 = vst.msk [vmem:[#allocation2 + $0x22] sm:$0x1] %vm80_vm1, %v2737_v0  ;;  %97 = vst.msk [vmem:[#allocation2 + $0x43] sm:$0x1] %vm80_vm1, %v2737_v0  ;;  %2343 = vmatpush3.msra.mxu0 %v2049_v1  ;;  %2386 = vmatpush3.msra.mxu1 %v61_v2  ;;  %v59_v6 = vld [vmem:[%s3393_s1 + $0x28] sm:$0xff]  ;;  %v2046_v7 = vld [vmem:[%s3393_s1 + $0x60] sm:$0xff] }
  0x1f   :  { %2344 = vmatprep.subr.mxu0 %v2737_v0  ;;  %2387 = vmatprep.subr.mxu1 %v2737_v0  ;;  %v58_v8 = vld [vmem:[%s3393_s1 + $0x20] sm:$0xff]  ;;  %v2045_v9 = vld [vmem:[%s3393_s1 + $0x58] sm:$0xff]  ;;  %v2842_v13 = vld [vmem:[%s3392_s0 + $0x8] sm:$0xff]  ;;  %vm583_vm5 = vcmask 254976  }
  0x20   :  { %2345 = vmatpush3.msra.mxu0 %v2048_v3  ;;  %2388 = vmatpush3.msra.mxu1 %v60_v4  ;;  %v2831_v10 = vld [vmem:[%s3392_s0] sm:$0xff]  ;;  %v57_v11 = vld [vmem:[%s3393_s1 + $0x18] sm:$0xff]  ;;  %v2847_v14 = vld [vmem:[%s3392_s0 + $0x10] sm:$0xff]  ;;  %v88_v16 = vmax.f32 %v2842_v13, 0.0 }
  0x21   :  { %2346 = vmatprep.subr.mxu0 %v2737_v0  ;;  %2389 = vmatprep.subr.mxu1 %v2737_v0  ;;  %v87_v12 = vmax.f32 %v2831_v10, 0.0  ;;  %v2044_v15 = vld [vmem:[%s3393_s1 + $0x50] sm:$0xff]  ;;  %v89_v17 = vmax.f32 %v2847_v14, 0.0  ;;  %v2857_v18 = vld [vmem:[%s3392_s0 + $0x18] sm:$0xff]  ;;  %v2871_v21 = vld [vmem:[%s3392_s0 + $0x20] sm:$0xff] }
  0x22   :  { %2347 = vmatpush3.msra.mxu0 %v2047_v5  ;;  %2390 = vmatpush3.msra.mxu1 %v59_v6  ;;  %v56_v19 = vld [vmem:[%s3393_s1 + $0x10] sm:$0xff]  ;;  %v90_v20 = vmax.f32 %v2857_v18, 0.0  ;;  %v2876_v22 = vld [vmem:[%s3392_s0 + $0x28] sm:$0xff]  ;;  %93 = vst.msk [vmem:[#allocation2 + $0x9] sm:$0xff] %vm91_vm0, %v88_v16  ;;  %v102_v23 = vmax.f32 %v2871_v21, 0.0  ;;  %v101_v26 = vld [vmem:[%s3392_s0 + $0x38] sm:$0xff] }
  0x23   :  { %2348 = vmatprep.subr.mxu0 %v2737_v0  ;;  %2391 = vmatprep.subr.mxu1 %v2737_v0  ;;  %92 = vst.msk [vmem:[#allocation2 + $0x1] sm:$0xff] %vm91_vm0, %v87_v12  ;;  %94 = vst.msk [vmem:[#allocation2 + $0x11] sm:$0xff] %vm91_vm0, %v89_v17  ;;  %v103_v24 = vmax.f32 %v2876_v22, 0.0  ;;  %v100_v25 = vld [vmem:[%s3392_s0 + $0x30] sm:$0xff]  ;;  %v2043_v27 = vld [vmem:[%s3393_s1 + $0x48] sm:$0xff]  ;;  %v105_v30 = vmax.f32 %v101_v26, 0.0 }
  0x24   :  { %2349 = vmatpush3.msra.mxu0 %v2046_v7  ;;  %2392 = vmatpush3.msra.mxu1 %v58_v8  ;;  %v55_v28 = vld [vmem:[%s3393_s1 + $0x8] sm:$0xff]  ;;  %95 = vst.msk [vmem:[#allocation2 + $0x19] sm:$0xff] %vm91_vm0, %v90_v20  ;;  %v104_v29 = vmax.f32 %v100_v25, 0.0  ;;  %106 = vst.msk [vmem:[#allocation2 + $0x23] sm:$0xff] %vm91_vm0, %v102_v23  ;;  %v2042_v31 = vld [vmem:[%s3393_s1 + $0x40] sm:$0xff] }
  0x25   :  { %2350 = vmatprep.subr.mxu0 %v2737_v0  ;;  %2393 = vmatprep.subr.mxu1 %v2737_v0  ;;  %107 = vst.msk [vmem:[#allocation2 + $0x2b] sm:$0xff] %vm91_vm0, %v103_v24  ;;  %v54_v32 = vld [vmem:[%s3393_s1] sm:$0xff]  ;;  %109 = vst.msk [vmem:[#allocation2 + $0x3b] sm:$0xff] %vm91_vm0, %v105_v30  ;;  %v2057_v33 = vld [vmem:[%s3393_s1 + $0xb8] sm:$0xff] }
  0x26   :  { %2351 = vmatpush3.msra.mxu0 %v2045_v9  ;;  %2394 = vmatpush3.msra.mxu1 %v57_v11  ;;  %108 = vst.msk [vmem:[#allocation2 + $0x33] sm:$0xff] %vm91_vm0, %v104_v29  ;;  %649 = vst.msk [vmem:[#allocation2 + $0x48] sm:$0xff] %vm91_vm0, %v104_v29  ;;  %v605_v36 = vld [vmem:[#allocation4 + $0x98] sm:$0xff]  ;;  %v2056_v39 = vld [vmem:[%s3393_s1 + $0xb0] sm:$0xff] }
  0x27   :  { %2352 = vmatprep.subr.mxu0 %v2737_v0  ;;  %2395 = vmatprep.subr.mxu1 %v2737_v0  ;;  %650 = vst.msk [vmem:[#allocation2 + $0x50] sm:$0xff] %vm91_vm0, %v105_v30  ;;  %v604_v41 = vld [vmem:[#allocation4 + $0x90] sm:$0xff]  ;;  %v2055_v43 = vld [vmem:[%s3393_s1 + $0xa8] sm:$0xff]  ;;  %v2054_v3 = vld [vmem:[%s3393_s1 + $0xa0] sm:$0xff] }
  0x28   :  { %2353 = vmatpush3.msra.mxu0 %v2044_v15  ;;  %2396 = vmatpush3.msra.mxu1 %v56_v19  ;;  %v603_v59 = vld [vmem:[#allocation4 + $0x88] sm:$0xff]  ;;  %v2053_v4 = vld [vmem:[%s3393_s1 + $0x98] sm:$0xff]  ;;  %v2052_v5 = vld [vmem:[%s3393_s1 + $0x90] sm:$0xff] }
  0x29   :  { %2354 = vmatprep.subr.mxu0 %v2737_v0  ;;  %2397 = vmatprep.subr.mxu1 %v2737_v0  ;;  %v120_v37 = vld [vmem:[#allocation2 + $0x9] sm:$0xff]  ;;  %v2050_v7 = vld [vmem:[%s3393_s1 + $0x80] sm:$0xff]  ;;  %v601_v9 = vld [vmem:[#allocation4 + $0x78] sm:$0xff] }
  0x2a   :  { %2355 = vmatpush3.msra.mxu0 %v2043_v27  ;;  %2398 = vmatpush3.msra.mxu1 %v55_v28  ;;  %v119_v34 = vld [vmem:[#allocation2 + $0x1] sm:$0xff]  ;;  %v121_v40 = vld [vmem:[#allocation2 + $0x11] sm:$0xff] }
  0x2b   :  { %2356 = vmatprep.subr.mxu0 %v2737_v0  ;;  %2399 = vmatprep.subr.mxu1 %v2737_v0  ;;  %v110_v35 = vld [vmem:[#allocation2] sm:$0xff]  ;;  %v111_v38 = vld [vmem:[#allocation2 + $0x8] sm:$0xff]  ;;  %v112_v42 = vld [vmem:[#allocation2 + $0x10] sm:$0xff] }
  0x2c   :  { %2357 = vmatpush3.msra.mxu0 %v2042_v31  ;;  %2400 = vmatpush3.msra.mxu1 %v54_v32  ;;  %v122_v44 = vld [vmem:[#allocation2 + $0x19] sm:$0xff]  ;;  %v123_v46 = vld [vmem:[#allocation2 + $0x21] sm:$0xff]  ;;  %v124_v48 = vld [vmem:[#allocation2 + $0x29] sm:$0xff] }
  0x2d   :  { %2359 = vmatmul.mubr.msk.f32.vlgmr.msra.gmra.mxu0 %vm91_vm0, %v119_v34  ;;  %2428 = vmatprep.subr.mxu0 %v2737_v0  ;;  %v113_v45 = vld [vmem:[#allocation2 + $0x18] sm:$0xff]  ;;  %v114_v47 = vld [vmem:[#allocation2 + $0x20] sm:$0xff]  ;;  %v115_v49 = vld [vmem:[#allocation2 + $0x28] sm:$0xff] }
  0x2e   :  { %2402 = vmatmul.mubr.msk.f32.vlgmr.msra.gmra.mxu1 %vm91_vm0, %v110_v35  ;;  %2429 = vmatpush3.msra.mxu0 %v2057_v33  ;;  %v125_v50 = vld [vmem:[#allocation2 + $0x31] sm:$0xff]  ;;  %v2942_v52 = vld [vmem:[#allocation2 + $0x39] sm:$0xff]  ;;  %v2946_v54 = vld [vmem:[#allocation2 + $0x2] sm:$0xff] }
  0x2f   :  { %2361 = vmatprep.mubr.msk.f32.mxu0 %vm2738_vm2, %v2737_v0  ;;  %2404 = vmatprep.mubr.msk.f32.mxu1 %vm2738_vm2, %v2737_v0  ;;  %v116_v51 = vld [vmem:[#allocation2 + $0x30] sm:$0xff]  ;;  %v2944_v53 = vld [vmem:[#allocation2 + $0x38] sm:$0xff]  ;;  %623 = vst.msk [vmem:[#allocation2] sm:$0xff] %vm91_vm0, %v2737_v0  ;;  %v2963_v58 = vld [vmem:[#allocation2 + $0x22] sm:$0xff] }
  0x30   :  { %2430 = vmatprep.subr.mxu0 %v2737_v0  ;;  %2471 = vmatprep.subr.mxu1 %v605_v36  ;;  %v2948_v55 = vld [vmem:[#allocation2 + $0xa] sm:$0xff]  ;;  %v2959_v56 = vld [vmem:[#allocation2 + $0x12] sm:$0xff]  ;;  %v2961_v57 = vld [vmem:[#allocation2 + $0x1a] sm:$0xff] }
  0x31   :  { %2362 = vmatmul.mubr.msk.f32.gmra.mxu0 %vm91_vm0, %v120_v37  ;;  %2472 = vmatpush3.msra.mxu1 %v605_v36  ;;  %633 = vst.msk [vmem:[#allocation2 + $0x8] sm:$0xff] %vm91_vm0, %v87_v12  ;;  %634 = vst.msk [vmem:[#allocation2 + $0x10] sm:$0xff] %vm91_vm0, %v88_v16  ;;  %v2972_v60 = vld [vmem:[#allocation2 + $0x2a] sm:$0xff]  ;;  %v2974_v61 = vld [vmem:[#allocation2 + $0x32] sm:$0xff] }
  0x32   :  { %2405 = vmatmul.mubr.msk.f32.gmra.mxu1 %vm91_vm0, %v111_v38  ;;  %2431 = vmatpush3.msra.mxu0 %v2056_v39  ;;  %635 = vst.msk [vmem:[#allocation2 + $0x18] sm:$0xff] %vm91_vm0, %v89_v17  ;;  %v2976_v62 = vld [vmem:[#allocation2 + $0x3a] sm:$0xff]  ;;  %636 = vst.msk [vmem:[#allocation2 + $0x20] sm:$0xff] %vm91_vm0, %v90_v20  ;;  %v2989_v2 = vld [vmem:[#allocation2 + $0x42] sm:$0x3] }
  0x33   :  { %2364 = vmatprep.mubr.msk.f32.mxu0 %vm2738_vm2, %v2737_v0  ;;  %2407 = vmatprep.mubr.msk.f32.mxu1 %vm2738_vm2, %v2737_v0  ;;  %v127_v63 = vld [vmem:[#allocation2 + $0x41] sm:$0x3]  ;;  %624 = vst.msk [vmem:[#allocation2 + $0x28] sm:$0xff] %vm91_vm0, %v2737_v0  ;;  %637 = vst.msk [vmem:[#allocation2 + $0x30] sm:$0xff] %vm91_vm0, %v2737_v0  ;;  %v2051_v6 = vld [vmem:[%s3393_s1 + $0x88] sm:$0xff] }
  0x34   :  { %2432 = vmatprep.subr.mxu0 %v2737_v0  ;;  %2473 = vmatprep.subr.mxu1 %v604_v41  ;;  %v118_v1 = vld [vmem:[#allocation2 + $0x40] sm:$0x3]  ;;  %647 = vst.msk [vmem:[#allocation2 + $0x38] sm:$0xff] %vm91_vm0, %v102_v23  ;;  %v600_v10 = vld [vmem:[#allocation4 + $0x70] sm:$0xff]  ;;  %v599_v11 = vld [vmem:[#allocation4 + $0x68] sm:$0xff] }
  0x35   :  { %2365 = vmatmul.mubr.msk.f32.gmra.mxu0 %vm91_vm0, %v121_v40  ;;  %2474 = vmatpush3.msra.mxu1 %v604_v41  ;;  %648 = vst.msk [vmem:[#allocation2 + $0x40] sm:$0xff] %vm91_vm0, %v103_v24  ;;  %v602_v8 = vld [vmem:[#allocation4 + $0x80] sm:$0xff]  ;;  %v592_v17 = vld [vmem:[#allocation4 + $0x38] sm:$0xff]  ;;  %v591_v18 = vld [vmem:[#allocation4 + $0x30] sm:$0xff] }
  0x36   :  { %2408 = vmatmul.mubr.msk.f32.gmra.mxu1 %vm91_vm0, %v112_v42  ;;  %2433 = vmatpush3.msra.mxu0 %v2055_v43  ;;  %v598_v12 = vld [vmem:[#allocation4 + $0x60] sm:$0xff]  ;;  %v618_v19 = vld [vmem:[#allocation4 + $0xf8] sm:$0xff]  ;;  %v590_v22 = vld [vmem:[#allocation4 + $0x28] sm:$0xff] }
  0x37   :  { %2367 = vmatprep.mubr.msk.f32.mxu0 %vm2738_vm2, %v2737_v0  ;;  %2410 = vmatprep.mubr.msk.f32.mxu1 %vm2738_vm2, %v2737_v0  ;;  %v617_v23 = vld [vmem:[#allocation4 + $0xf0] sm:$0xff]  ;;  %v589_v24 = vld [vmem:[#allocation4 + $0x20] sm:$0xff]  ;;  %v616_v25 = vld [vmem:[#allocation4 + $0xe8] sm:$0xff] }
  0x38   :  { %2434 = vmatprep.subr.mxu0 %v2737_v0  ;;  %2475 = vmatprep.subr.mxu1 %v603_v59  ;;  %v3089_v13 = vld [vmem:[#allocation2 + $0x8] sm:$0xff]  ;;  %v3093_v14 = vld [vmem:[#allocation2 + $0x10] sm:$0xff]  ;;  %v588_v28 = vld [vmem:[#allocation4 + $0x18] sm:$0xff] }
  0x39   :  { %2368 = vmatmul.mubr.msk.f32.gmra.mxu0 %vm91_vm0, %v122_v44  ;;  %2476 = vmatpush3.msra.mxu1 %v603_v59  ;;  %v3099_v15 = vld [vmem:[#allocation2 + $0x18] sm:$0xff]  ;;  %v3103_v16 = vld [vmem:[#allocation2 + $0x20] sm:$0xff]  ;;  %v587_v30 = vld [vmem:[#allocation4 + $0x10] sm:$0xff] }
  0x3a   :  { %2411 = vmatmul.mubr.msk.f32.gmra.mxu1 %vm91_vm0, %v113_v45  ;;  %2370 = vmatprep.mubr.msk.f32.mxu0 %vm2738_vm2, %v2737_v0  ;;  %v3107_v20 = vld [vmem:[#allocation2 + $0x28] sm:$0xff]  ;;  %v3111_v21 = vld [vmem:[#allocation2 + $0x30] sm:$0xff]  ;;  %v615_v29 = vld [vmem:[#allocation4 + $0xe0] sm:$0xff] }
  0x3b   :  { %2435 = vmatpush3.msra.mxu0 %v2054_v3  ;;  %2413 = vmatprep.mubr.msk.f32.mxu1 %vm2738_vm2, %v2737_v0  ;;  %v658_v26 = vld [vmem:[#allocation2 + $0x38] sm:$0xff]  ;;  %v660_v32 = vld [vmem:[#allocation2 + $0x48] sm:$0xff]  ;;  %v661_v33 = vld [vmem:[#allocation2 + $0x50] sm:$0xff]  ;;  %1083 = vst.msk [vmem:[#allocation2 + $0x28] sm:$0xff] %vm573_vm3, %v2737_v0 }
  0x3c   :  { %2436 = vmatprep.subr.mxu0 %v2737_v0  ;;  %2477 = vmatprep.subr.mxu1 %v602_v8  ;;  %v659_v27 = vld [vmem:[#allocation2 + $0x40] sm:$0xff]  ;;  %v614_v31 = vld [vmem:[#allocation4 + $0xd8] sm:$0xff]  ;;  %v586_v34 = vld [vmem:[#allocation4 + $0x8] sm:$0xff]  ;;  %1096 = vst.msk [vmem:[#allocation2 + $0x30] sm:$0xff] %vm573_vm3, %v2737_v0 }
  0x3d   :  { %2371 = vmatmul.mubr.msk.f32.gmra.mxu0 %vm91_vm0, %v123_v46  ;;  %2478 = vmatpush3.msra.mxu1 %v602_v8  ;;  %v613_v35 = vld [vmem:[#allocation4 + $0xd0] sm:$0xff]  ;;  %v585_v36 = vld [vmem:[#allocation4] sm:$0xff]  ;;  %v612_v37 = vld [vmem:[#allocation4 + $0xc8] sm:$0xff] }
  0x3e   :  { %2414 = vmatmul.mubr.msk.f32.gmra.mxu1 %vm91_vm0, %v114_v47  ;;  %2373 = vmatprep.mubr.msk.f32.mxu0 %vm2738_vm2, %v2737_v0  ;;  %v651_v38 = vld [vmem:[#allocation2] sm:$0xff]  ;;  %v930_v40 = vld [vmem:[#allocation2 + $0x58] sm:$0xff]  ;;  %v595_v42 = vld [vmem:[#allocation4 + $0x50] sm:$0xff] }
  0x3f   :  { %2437 = vmatpush3.msra.mxu0 %v2053_v4  ;;  %2416 = vmatprep.mubr.msk.f32.mxu1 %vm2738_vm2, %v2737_v0  ;;  %1082 = vst.msk [vmem:[#allocation2] sm:$0xff] %vm573_vm3, %v2737_v0  ;;  %v611_v39 = vld [vmem:[#allocation4 + $0xc0] sm:$0xff]  ;;  %1097 = vst.msk [vmem:[#allocation2 + $0x58] sm:$0xff] %vm573_vm3, %v2737_v0  ;;  %v596_v41 = vld [vmem:[#allocation4 + $0x58] sm:$0xff] }
  0x40   :  { %2438 = vmatprep.subr.mxu0 %v2737_v0  ;;  %2479 = vmatprep.subr.mxu1 %v601_v9  ;;  %v594_v43 = vld [vmem:[#allocation4 + $0x48] sm:$0xff]  ;;  %v609_v44 = vld [vmem:[#allocation4 + $0xb8] sm:$0xff]  ;;  %v593_v45 = vld [vmem:[#allocation4 + $0x40] sm:$0xff] }
  0x41   :  { %2374 = vmatmul.mubr.msk.f32.gmra.mxu0 %vm91_vm0, %v124_v48  ;;  %2480 = vmatpush3.msra.mxu1 %v601_v9  ;;  %v607_v47 = vld [vmem:[#allocation4 + $0xa8] sm:$0xff]  ;;  %v606_v48 = vld [vmem:[#allocation4 + $0xa0] sm:$0xff] }
  0x42   :  { %2417 = vmatmul.mubr.msk.f32.gmra.mxu1 %vm91_vm0, %v115_v49  ;;  %2376 = vmatprep.mubr.msk.f32.mxu0 %vm2738_vm2, %v2737_v0  ;;  %v3157_v49 = vld [vmem:[#allocation4 + $0x118] sm:$0xff] }
  0x43   :  { %2419 = vmatprep.mubr.msk.f32.mxu1 %vm2738_vm2, %v2737_v0  ;;  %2439 = vmatpush3.msra.mxu0 %v2052_v5 }
  0x44   :  { %2440 = vmatprep.subr.mxu0 %v2737_v0  ;;  %2481 = vmatprep.subr.mxu1 %v600_v10 }
  0x45   :  { %2377 = vmatmul.mubr.msk.f32.gmra.mxu0 %vm91_vm0, %v125_v50  ;;  %2482 = vmatpush3.msra.mxu1 %v600_v10  ;;  %v3160_v50 = vld [vmem:[#allocation6 + $0x58] sm:$0xff] }
  0x46   :  { %2420 = vmatmul.mubr.msk.f32.gmra.mxu1 %vm91_vm0, %v116_v51  ;;  %2379 = vmatprep.mubr.msk.f32.mxu0 %vm2738_vm2, %v2737_v0  ;;  %v1110_v46 = vld [vmem:[#allocation2] sm:$0xff] }
  0x47   :  { %2422 = vmatprep.mubr.msk.f32.mxu1 %vm2738_vm2, %v2737_v0  ;;  %2441 = vmatpush3.msra.mxu0 %v2051_v6 }
  0x48   :  { %2442 = vmatprep.subr.mxu0 %v2737_v0  ;;  %2483 = vmatprep.subr.mxu1 %v599_v11 }
  0x49   :  { %2380 = vmatmul.mubr.msk.f32.gmra.mxu0 %vm91_vm0, %v2942_v52  ;;  %2484 = vmatpush3.msra.mxu1 %v599_v11 }
  0x4a   :  { %2423 = vmatmul.mubr.msk.f32.gmra.mxu1 %vm91_vm0, %v2944_v53  ;;  %2382 = vmatprep.mubr.msk.f32.mxu0 %vm2738_vm2, %v2737_v0 }
  0x4b   :  { %2425 = vmatprep.mubr.msk.f32.mxu1 %vm2738_vm2, %v2737_v0  ;;  %2443 = vmatpush3.msra.mxu0 %v2050_v7 }
  0x4c   :  { %2485 = vmatprep.subr.mxu1 %v598_v12  ;;  %2533 = vmatprep.subr.mxu0 %v618_v19 }
  0x4d   :  { %2383 = vmatmul.mubr.msk.f32.gmra.mxu0 %vm91_vm0, %v127_v63  ;;  %2486 = vmatpush3.msra.mxu1 %v598_v12 }
  0x4e   :  { %2426 = vmatmul.mubr.msk.f32.gmra.mxu1 %vm91_vm0, %v118_v1  ;;  %2444 = vmatprep.mubr.msk.f32.mxu0 %vm2738_vm2, %v2737_v0 }
  0x4f   :  { %2487 = vmatprep.mubr.msk.f32.mxu1 %vm91_vm0, %v3089_v13  ;;  %2502 = vmatprep.subr.mxu1 %v592_v17 }
  0x51   :  { %2445 = vmatmul.mubr.msk.f32.vlgmr.msra.gmra.mxu0 %vm91_vm0, %v2946_v54 }
  0x52   :  { %2447 = vmatprep.mubr.msk.f32.mxu0 %vm2738_vm2, %v2737_v0  ;;  %2488 = vmatmul.mubr.msk.f32.vlgmr.msra.gmra.mxu1 %vm91_vm0, %v3093_v14 }
  0x53   :  { %2490 = vmatprep.mubr.msk.f32.mxu1 %vm91_vm0, %v3099_v15  ;;  %2503 = vmatpush3.msra.mxu1 %v592_v17 }
  0x54   :  { %2504 = vmatprep.subr.mxu1 %v591_v18  ;;  %2534 = vmatpush3.msra.mxu0 %v618_v19 }
  0x55   :  { %2448 = vmatmul.mubr.msk.f32.gmra.mxu0 %vm91_vm0, %v2948_v55  ;;  %2505 = vmatpush3.msra.mxu1 %v591_v18 }
  0x56   :  { %2450 = vmatprep.mubr.msk.f32.mxu0 %vm2738_vm2, %v2737_v0  ;;  %2491 = vmatmul.mubr.msk.f32.gmra.mxu1 %vm91_vm0, %v3103_v16 }
  0x57   :  { %2493 = vmatprep.mubr.msk.f32.mxu1 %vm91_vm0, %v3107_v20  ;;  %2506 = vmatprep.subr.mxu1 %v590_v22 }
  0x58   :  { %2535 = vmatprep.subr.mxu0 %v617_v23  ;;  %2507 = vmatpush3.msra.mxu1 %v590_v22 }
  0x59   :  { %2451 = vmatmul.mubr.msk.f32.gmra.mxu0 %vm91_vm0, %v2959_v56  ;;  %2508 = vmatprep.subr.mxu1 %v589_v24 }
  0x5a   :  { %2453 = vmatprep.mubr.msk.f32.mxu0 %vm2738_vm2, %v2737_v0  ;;  %2494 = vmatmul.mubr.msk.f32.gmra.mxu1 %vm91_vm0, %v3111_v21 }
  0x5b   :  { %2536 = vmatpush3.msra.mxu0 %v617_v23  ;;  %2496 = vmatprep.mubr.msk.f32.mxu1 %vm91_vm0, %v658_v26 }
  0x5c   :  { %2537 = vmatprep.subr.mxu0 %v616_v25  ;;  %2509 = vmatpush3.msra.mxu1 %v589_v24 }
  0x5d   :  { %2454 = vmatmul.mubr.msk.f32.gmra.mxu0 %vm91_vm0, %v2961_v57  ;;  %2510 = vmatprep.subr.mxu1 %v588_v28 }
  0x5e   :  { %2456 = vmatprep.mubr.msk.f32.mxu0 %vm2738_vm2, %v2737_v0  ;;  %2538 = vmatpush3.msra.mxu0 %v616_v25 }
  0x5f   :  { %2497 = vmatmul.mubr.msk.f32.gmra.mxu1 %vm91_vm0, %v659_v27  ;;  %2539 = vmatprep.subr.mxu0 %v615_v29 }
  0x60   :  { %2511 = vmatpush3.msra.mxu1 %v588_v28  ;;  %2540 = vmatpush3.msra.mxu0 %v615_v29 }
  0x61   :  { %2457 = vmatmul.mubr.msk.f32.gmra.mxu0 %vm91_vm0, %v2963_v58  ;;  %2512 = vmatprep.subr.mxu1 %v587_v30 }
  0x62   :  { %2459 = vmatprep.mubr.msk.f32.mxu0 %vm2738_vm2, %v2737_v0  ;;  %2541 = vmatprep.subr.mxu0 %v614_v31 }
  0x63   :  { %2499 = vmatprep.mubr.msk.f32.mxu1 %vm91_vm0, %v660_v32  ;;  %2513 = vmatpush3.msra.mxu1 %v587_v30 }
  0x64   :  { %2542 = vmatpush3.msra.mxu0 %v614_v31  ;;  %2500 = vmatmul.mubr.msk.f32.gmra.mxu1 %vm91_vm0, %v661_v33 }
  0x65   :  { %2460 = vmatmul.mubr.msk.f32.gmra.mxu0 %vm91_vm0, %v2972_v60  ;;  %2514 = vmatprep.subr.mxu1 %v586_v34 }
  0x66   :  { %2462 = vmatprep.mubr.msk.f32.mxu0 %vm2738_vm2, %v2737_v0  ;;  %2543 = vmatprep.subr.mxu0 %v613_v35 }
  0x67   :  { %2515 = vmatpush3.msra.mxu1 %v586_v34  ;;  %2544 = vmatpush3.msra.mxu0 %v613_v35 }
  0x68   :  { %2516 = vmatprep.subr.mxu1 %v585_v36  ;;  %2545 = vmatprep.subr.mxu0 %v612_v37 }
  0x69   :  { %2463 = vmatmul.mubr.msk.f32.gmra.mxu0 %vm91_vm0, %v2974_v61  ;;  %2517 = vmatpush3.msra.mxu1 %v585_v36 }
  0x6a   :  { %2465 = vmatprep.mubr.msk.f32.mxu0 %vm2738_vm2, %v2737_v0  ;;  %2518 = vmatprep.mubr.msk.f32.mxu1 %vm91_vm0, %v651_v38 }
  0x6b   :  { %2546 = vmatpush3.msra.mxu0 %v612_v37  ;;  %2519 = vmatmul.mubr.msk.f32.vlgmr.msra.gmra.mxu1 %vm91_vm0, %v3089_v13 }
  0x6c   :  { %2547 = vmatprep.subr.mxu0 %v611_v39  ;;  %2521 = vmatprep.mubr.msk.f32.mxu1 %vm91_vm0, %v3093_v14 }
  0x6d   :  { %2466 = vmatmul.mubr.msk.f32.gmra.mxu0 %vm91_vm0, %v2976_v62  ;;  %2564 = vmatprep.subr.mxu1 %v596_v41 }
  0x6e   :  { %2468 = vmatprep.mubr.msk.f32.mxu0 %vm2738_vm2, %v2737_v0  ;;  %2548 = vmatpush3.msra.mxu0 %v611_v39  ;;  %v608_v0 = vld [vmem:[#allocation4 + $0xb0] sm:$0xff] }
  0x6f   :  { %2522 = vmatmul.mubr.msk.f32.gmra.mxu1 %vm91_vm0, %v3099_v15  ;;  %2587 = vmatprep.subr.mxu0 %v609_v44 }
  0x70   :  { %2524 = vmatprep.mubr.msk.f32.mxu1 %vm91_vm0, %v3103_v16  ;;  %2565 = vmatpush3.msra.mxu1 %v596_v41 }
  0x71   :  { %2469 = vmatmul.mubr.msk.f32.gmra.mxu0 %vm91_vm0, %v2989_v2  ;;  %2566 = vmatprep.subr.mxu1 %v595_v42 }
  0x72   :  { %2549 = vmatprep.mubr.msk.f32.mxu0 %vm91_vm0, %v3093_v14  ;;  %2567 = vmatpush3.msra.mxu1 %v595_v42 }
  0x73   :  { %2525 = vmatmul.mubr.msk.f32.gmra.mxu1 %vm91_vm0, %v3107_v20  ;;  %2568 = vmatprep.subr.mxu1 %v594_v43 }
  0x74   :  { %2527 = vmatprep.mubr.msk.f32.mxu1 %vm91_vm0, %v3111_v21  ;;  %2569 = vmatpush3.msra.mxu1 %v594_v43 }
  0x75   :  { %2550 = vmatmul.mubr.msk.f32.vlgmr.msra.gmra.mxu0 %vm91_vm0, %v3099_v15  ;;  %2570 = vmatprep.subr.mxu1 %v593_v45 }
  0x76   :  { %2552 = vmatprep.mubr.msk.f32.mxu0 %vm91_vm0, %v3103_v16  ;;  %2588 = vmatpush3.msra.mxu0 %v609_v44 }
  0x77   :  { %2528 = vmatmul.mubr.msk.f32.gmra.mxu1 %vm91_vm0, %v658_v26  ;;  %2589 = vmatprep.subr.mxu0 %v608_v0 }
  0x78   :  { %2530 = vmatprep.mubr.msk.f32.mxu1 %vm91_vm0, %v659_v27  ;;  %2571 = vmatpush3.msra.mxu1 %v593_v45 }
  0x79   :  { %2553 = vmatmul.mubr.msk.f32.gmra.mxu0 %vm91_vm0, %v3107_v20  ;;  %2610 = vmatprep.subr.mxu1 %v3157_v49 }
  0x7a   :  { %2555 = vmatprep.mubr.msk.f32.mxu0 %vm91_vm0, %v3111_v21  ;;  %2590 = vmatpush3.msra.mxu0 %v608_v0 }
  0x7b   :  { %2531 = vmatmul.mubr.msk.f32.gmra.mxu1 %vm91_vm0, %v660_v32  ;;  %2591 = vmatprep.subr.mxu0 %v607_v47 }
  0x7c   :  { %2572 = vmatprep.mubr.msk.f32.mxu1 %vm573_vm3, %v1110_v46  ;;  %2592 = vmatpush3.msra.mxu0 %v607_v47 }
  0x7d   :  { %2556 = vmatmul.mubr.msk.f32.gmra.mxu0 %vm91_vm0, %v658_v26  ;;  %2593 = vmatprep.subr.mxu0 %v606_v48  ;;  %v3174_v26 = vld [vmem:[%s3394_s2] ss:$0 sm:$0xff] }
  0x7e   :  { %2558 = vmatprep.mubr.msk.f32.mxu0 %vm91_vm0, %v659_v27  ;;  %2594 = vmatpush3.msra.mxu0 %v606_v48 }
  0x7f   :  { %2633 = vmatprep.subr.mxu0 %v3160_v50 }
  0x81   :  { %2559 = vmatmul.mubr.msk.f32.gmra.mxu0 %vm91_vm0, %v660_v32 }
  0x82   :  { %2561 = vmatprep.mubr.msk.f32.mxu0 %vm91_vm0, %v661_v33 }
  0x85   :  { %2562 = vmatmul.mubr.msk.f32.gmra.mxu0 %vm91_vm0, %v930_v40 }
  0xed   :  { %v221_v51 = vpop.f32.mrf.mxu0 }
  0xee   :  { %v358_v52 = vpop.f32.mrf.mxu1 }
  0xef   :  { %v2360_v53 = vpop.f32.mrf.mxu0  ;;  %v359_v23 = vadd.f32 %v358_v52, %v221_v51 }
  0xf0   :  { %v2403_v54 = vpop.f32.mrf.mxu1 }
  0xf1   :  { %v226_v55 = vpop.f32.mrf.mxu0 }
  0xf2   :  { %v363_v56 = vpop.f32.mrf.mxu1 }
  0xf3   :  { %v2363_v57 = vpop.f32.mrf.mxu0  ;;  %v364_v29 = vadd.f32 %v363_v56, %v226_v55 }
  0xf4   :  { %v2406_v58 = vpop.f32.mrf.mxu1 }
  0xf5   :  { %v231_v59 = vpop.f32.mrf.mxu0 }
  0xf6   :  { %v368_v60 = vpop.f32.mrf.mxu1 }
  0xf7   :  { %v2366_v61 = vpop.f32.mrf.mxu0  ;;  %v369_v34 = vadd.f32 %v368_v60, %v231_v59 }
  0xf8   :  { %v2409_v62 = vpop.f32.mrf.mxu1 }
  0xf9   :  { %v236_v63 = vpop.f32.mrf.mxu0  ;;  %v621_v62 = vld [vmem:[#allocation4 + $0x110] sm:$0xff] }
  0xfa   :  { %v373_v1 = vpop.f32.mrf.mxu1 }
  0xfb   :  { %v2369_v2 = vpop.f32.mrf.mxu0  ;;  %v374_v39 = vadd.f32 %v373_v1, %v236_v63 }
  0xfc   :  { %v2412_v3 = vpop.f32.mrf.mxu1 }
  0xfd   :  { %v241_v4 = vpop.f32.mrf.mxu0 }
  0xfe   :  { %v378_v5 = vpop.f32.mrf.mxu1 }
  0xff   :  { %v2372_v6 = vpop.f32.mrf.mxu0  ;;  %v379_v0 = vadd.f32 %v378_v5, %v241_v4 }
 0x100   :  { %v2415_v7 = vpop.f32.mrf.mxu1  ;;  %v620_v6 = vld [vmem:[#allocation4 + $0x108] sm:$0xff] }
 0x101   :  { %v246_v8 = vpop.f32.mrf.mxu0 }
 0x102   :  { %v383_v9 = vpop.f32.mrf.mxu1 }
 0x103   :  { %v2375_v10 = vpop.f32.mrf.mxu0  ;;  %v384_v54 = vadd.f32 %v383_v9, %v246_v8  ;;  %v1688_v9 = vld [vmem:[#allocation6 + $0x50] sm:$0xff] }
 0x104   :  { %v2418_v11 = vpop.f32.mrf.mxu1 }
 0x105   :  { %v251_v12 = vpop.f32.mrf.mxu0 }
 0x106   :  { %v388_v13 = vpop.f32.mrf.mxu1 }
 0x107   :  { %v2378_v14 = vpop.f32.mrf.mxu0  ;;  %v389_v63 = vadd.f32 %v388_v13, %v251_v12 }
 0x108   :  { %v2421_v15 = vpop.f32.mrf.mxu1  ;;  %v1687_v14 = vld [vmem:[#allocation6 + $0x48] sm:$0xff] }
 0x109   :  { %v3163_v16 = vpop.f32.mrf.mxu0 }
 0x10a   :  { %v3165_v17 = vpop.f32.mrf.mxu1 }
 0x10b   :  { %v2381_v18 = vpop.f32.mrf.mxu0  ;;  %v394_v10 = vadd.f32 %v3165_v17, %v3163_v16  ;;  %v3207_v17 = vld [vmem:[#allocation6 + $0x38] sm:$0xff] }
 0x10c   :  { %v2424_v19 = vpop.f32.mrf.mxu1 }
 0x10d   :  { %v3167_v20 = vpop.f32.mrf.mxu0 }
 0x10e   :  { %v3169_v21 = vpop.f32.mrf.mxu1 }
 0x10f   :  { %v2384_v22 = vpop.f32.mrf.mxu0  ;;  %v399_v18 = vadd.f32 %v3169_v21, %v3167_v20  ;;  %v3222_v21 = vld [vmem:[#allocation2 + $0x30] sm:$0xff] }
 0x110   :  { %v2427_v24 = vpop.f32.mrf.mxu1 }
 0x111   :  { %v504_v25 = vpop.f32.mrf.mxu0 }
 0x112   :  { %v548_v27 = vadd.f32 %v504_v25, %v359_v23 }
 0x113   :  { %v2446_v28 = vpop.f32.mrf.mxu0 }
 0x114   :  { %v564_v30 = vadd.f32 %v3174_v26, %v548_v27  ;;  %v3217_v27 = vld [vmem:[#allocation2 + $0x28] sm:$0xff] }
 0x115   :  { %v509_v31 = vpop.f32.mrf.mxu0 }
 0x116   :  { %574 = vst.msk [vmem:[#allocation3] sm:$0xff] %vm573_vm3, %v564_v30  ;;  %v549_v32 = vadd.f32 %v509_v31, %v364_v29 }
 0x117   :  { %v2449_v33 = vpop.f32.mrf.mxu0 }
 0x118   :  { %v565_v35 = vadd.f32 %v3174_v26, %v549_v32 }
 0x119   :  { %v514_v36 = vpop.f32.mrf.mxu0 }
 0x11a   :  { %575 = vst.msk [vmem:[#allocation3 + $0x8] sm:$0xff] %vm573_vm3, %v565_v35  ;;  %v550_v37 = vadd.f32 %v514_v36, %v369_v34 }
 0x11b   :  { %v2452_v38 = vpop.f32.mrf.mxu0 }
 0x11c   :  { %v566_v40 = vadd.f32 %v3174_v26, %v550_v37 }
 0x11d   :  { %v1084_v41 = vld [vmem:[#allocation3] sm:$0xff]  ;;  %v519_v42 = vpop.f32.mrf.mxu0 }
 0x11e   :  { %v1088_v43 = vmax.f32 %v1084_v41, 0.0  ;;  %576 = vst.msk [vmem:[#allocation3 + $0x10] sm:$0xff] %vm573_vm3, %v566_v40  ;;  %v551_v44 = vadd.f32 %v519_v42, %v374_v39 }
 0x11f   :  { %v2455_v45 = vpop.f32.mrf.mxu0 }
 0x120   :  { %1092 = vst.msk [vmem:[#allocation2 + $0x8] sm:$0xff] %vm573_vm3, %v1088_v43  ;;  %v567_v46 = vadd.f32 %v3174_v26, %v551_v44 }
 0x121   :  { %v1085_v47 = vld [vmem:[#allocation3 + $0x8] sm:$0xff]  ;;  %v524_v48 = vpop.f32.mrf.mxu0 }
 0x122   :  { %v1089_v51 = vmax.f32 %v1085_v47, 0.0  ;;  %577 = vst.msk [vmem:[#allocation3 + $0x18] sm:$0xff] %vm573_vm3, %v567_v46  ;;  %v552_v52 = vadd.f32 %v524_v48, %v379_v0  ;;  %v1655_v36 = vld [vmem:[#allocation3] ss:$2 sm:$0xff]  ;;  %v1667_v38 = vld [vmem:[#allocation3 + $0x1] ss:$2 sm:$0xff] }
 0x123   :  { %v2458_v53 = vpop.f32.mrf.mxu0  ;;  %v1662_v42 = vmax.f32 %v1655_v36, 0.0  ;;  %v1674_v45 = vmax.f32 %v1667_v38, 0.0  ;;  %v1649_v36 = vld [vmem:[#allocation6 + $0x10] sm:$0xff] }
 0x124   :  { %1093 = vst.msk [vmem:[#allocation2 + $0x10] sm:$0xff] %vm573_vm3, %v1089_v51  ;;  %v568_v55 = vadd.f32 %v3174_v26, %v552_v52 }
 0x125   :  { %v1086_v56 = vld [vmem:[#allocation3 + $0x10] sm:$0xff]  ;;  %v529_v57 = vpop.f32.mrf.mxu0 }
 0x126   :  { %v1090_v58 = vmax.f32 %v1086_v56, 0.0  ;;  %579 = vst.msk [vmem:[#allocation3 + $0x1e] sm:$0xfc] %vm578_vm4, %v568_v55  ;;  %v553_v59 = vadd.f32 %v529_v57, %v384_v54  ;;  %v1678_v56 = vadd.f32 %v1674_v45, %v1662_v42  ;;  %v1441_v45 = vld [vmem:[#allocation2 + $0x58] sm:$0xff] }
 0x127   :  { %v2461_v60 = vpop.f32.mrf.mxu0  ;;  %v1111_v61 = vld [vmem:[#allocation2 + $0x8] sm:$0xff] }
 0x128   :  { %1094 = vst.msk [vmem:[#allocation2 + $0x18] sm:$0xff] %vm573_vm3, %v1090_v58  ;;  %v569_v1 = vadd.f32 %v3174_v26, %v553_v59  ;;  %2573 = vmatmul.mubr.msk.f32.vlgmr.msra.gmra.mxu1 %vm573_vm3, %v1111_v61  ;;  %2595 = vmatprep.mubr.msk.f32.mxu0 %vm573_vm3, %v1111_v61 }
 0x129   :  { %v1087_v2 = vld [vmem:[#allocation3 + $0x18] sm:$0xff]  ;;  %v534_v3 = vpop.f32.mrf.mxu0  ;;  %2611 = vmatpush3.msra.mxu1 %v3157_v49  ;;  %v619_v49 = vld [vmem:[#allocation4 + $0x100] sm:$0xff] }
 0x12a   :  { %v1091_v4 = vmax.f32 %v1087_v2, 0.0  ;;  %580 = vst.msk [vmem:[#allocation3 + $0x26] sm:$0xff] %vm573_vm3, %v569_v1  ;;  %v554_v5 = vadd.f32 %v534_v3, %v389_v63  ;;  %2612 = vmatprep.subr.mxu1 %v621_v62  ;;  %v1657_v43 = vld [vmem:[#allocation3 + $0x10] ss:$2 sm:$0xff]  ;;  %v1669_v0 = vld [vmem:[#allocation3 + $0x11] ss:$2 sm:$0xff] }
 0x12b   :  { %v2464_v7 = vpop.f32.mrf.mxu0  ;;  %v3193_v8 = vld [vmem:[#allocation2 + $0x10] sm:$0xff]  ;;  %2613 = vmatpush3.msra.mxu1 %v621_v62  ;;  %v1663_v52 = vmax.f32 %v1657_v43, 0.0  ;;  %v1675_v53 = vmax.f32 %v1669_v0, 0.0  ;;  %v1682_v3 = vmul.f32 0.5, %v1678_v56  ;;  %v1648_v0 = vld [vmem:[#allocation6 + $0x8] sm:$0xff] }
 0x12c   :  { %1095 = vst.msk [vmem:[#allocation2 + $0x20] sm:$0xff] %vm573_vm3, %v1091_v4  ;;  %v570_v11 = vadd.f32 %v3174_v26, %v554_v5  ;;  %2575 = vmatprep.mubr.msk.f32.mxu1 %vm573_vm3, %v3193_v8  ;;  %2596 = vmatmul.mubr.msk.f32.vlgmr.msra.gmra.mxu0 %vm573_vm3, %v3193_v8  ;;  %v1653_v5 = vld [vmem:[#allocation6 + $0x30] sm:$0xff] }
 0x12d   :  { %v539_v12 = vpop.f32.mrf.mxu0  ;;  %2614 = vmatprep.subr.mxu1 %v620_v6  ;;  %2634 = vmatpush3.msra.mxu0 %v3160_v50  ;;  %v1686_v50 = vld [vmem:[#allocation6 + $0x40] sm:$0xff]  ;;  %v1679_v61 = vadd.f32 %v1675_v53, %v1663_v52 }
 0x12e   :  { %581 = vst.msk [vmem:[#allocation3 + $0x2e] sm:$0xff] %vm573_vm3, %v570_v11  ;;  %v555_v13 = vadd.f32 %v539_v12, %v394_v10  ;;  %2615 = vmatpush3.msra.mxu1 %v620_v6  ;;  %2635 = vmatprep.subr.mxu0 %v1688_v9  ;;  %v2150_v10 = vld [vmem:[%s3392_s0 + $0x1] ss:$2 sm:$0xff] }
 0x12f   :  { %v2467_v15 = vpop.f32.mrf.mxu0  ;;  %v3205_v16 = vld [vmem:[#allocation2 + $0x18] sm:$0xff]  ;;  %2616 = vmatprep.subr.mxu1 %v619_v49  ;;  %2636 = vmatpush3.msra.mxu0 %v1688_v9  ;;  %v1683_v7 = vmul.f32 0.5, %v1679_v61  ;;  %v1616_v9 = vld [vmem:[%s3392_s0] ss:$2 sm:$0xff] }
 0x130   :  { %v571_v19 = vadd.f32 %v3174_v26, %v555_v13  ;;  %2576 = vmatmul.mubr.msk.f32.gmra.mxu1 %vm573_vm3, %v3205_v16  ;;  %2598 = vmatprep.mubr.msk.f32.mxu0 %vm573_vm3, %v3205_v16  ;;  %v1652_v12 = vld [vmem:[#allocation6 + $0x28] sm:$0xff]  ;;  %v1623_v13 = vmax.f32 %v1616_v9, 0.0  ;;  %v2147_v15 = vld [vmem:[%s3392_s0 + $0x10] ss:$2 sm:$0xff]  ;;  %v1647_v53 = vld [vmem:[#allocation6] sm:$0xff] }
 0x131   :  { %v1098_v22 = vld [vmem:[#allocation3 + $0x20] sm:$0xff]  ;;  %v544_v23 = vpop.f32.mrf.mxu0  ;;  %2617 = vmatpush3.msra.mxu1 %v619_v49  ;;  %2637 = vmatprep.subr.mxu0 %v1687_v14 }
 0x132   :  { %v1102_v24 = vmax.f32 %v1098_v22, 0.0  ;;  %582 = vst.msk [vmem:[#allocation3 + $0x36] sm:$0xff] %vm573_vm3, %v571_v19  ;;  %v556_v25 = vadd.f32 %v544_v23, %v399_v18  ;;  %2638 = vmatpush3.msra.mxu0 %v1687_v14  ;;  %2647 = vmatprep.subr.mxu1 %v3207_v17  ;;  %v1635_v14 = vmax.f32 %v2150_v10, 0.0  ;;  %v2148_v18 = vld [vmem:[%s3392_s0 + $0x20] ss:$2 sm:$0xff] }
 0x133   :  { %v3220_v20 = vld [vmem:[#allocation2 + $0x20] sm:$0xff]  ;;  %v2470_v28 = vpop.f32.mrf.mxu0  ;;  %2639 = vmatprep.subr.mxu0 %v1686_v50 }
 0x134   :  { %1106 = vst.msk [vmem:[#allocation2 + $0x38] sm:$0xff] %vm573_vm3, %v1102_v24  ;;  %v572_v29 = vadd.f32 %v3174_v26, %v556_v25  ;;  %2578 = vmatprep.mubr.msk.f32.mxu1 %vm573_vm3, %v3220_v20  ;;  %2599 = vmatmul.mubr.msk.f32.gmra.mxu0 %vm573_vm3, %v3220_v20  ;;  %v3236_v26 = vpop.f32.mrf.mxu1  ;;  %v2152_v19 = vld [vmem:[%s3392_s0 + $0x21] ss:$2 sm:$0xff]  ;;  %v1650_v24 = vld [vmem:[#allocation6 + $0x18] sm:$0xff]  ;;  %v1624_v25 = vmax.f32 %v2147_v15, 0.0  ;;  %v1625_v28 = vmax.f32 %v2148_v18, 0.0 }
 0x135   :  { %v1099_v30 = vld [vmem:[#allocation3 + $0x28] sm:$0xff]  ;;  %2579 = vmatmul.mubr.msk.f32.gmra.mxu1 %vm573_vm3, %v3217_v27  ;;  %2601 = vmatprep.mubr.msk.f32.mxu0 %vm573_vm3, %v3217_v27  ;;  %v1651_v22 = vld [vmem:[#allocation6 + $0x20] sm:$0xff] }
 0x136   :  { %v1103_v31 = vmax.f32 %v1099_v30, 0.0  ;;  %584 = vst.msk [vmem:[#allocation3 + $0x3e] sm:$0x3] %vm583_vm5, %v572_v29  ;;  %2581 = vmatprep.mubr.msk.f32.mxu1 %vm573_vm3, %v3222_v21  ;;  %2640 = vmatpush3.msra.mxu0 %v1686_v50  ;;  %v3241_v33 = vpop.f32.mrf.mxu1  ;;  %v1659_v46 = vld [vmem:[#allocation3 + $0x20] ss:$2 sm:$0xff]  ;;  %v1637_v29 = vmax.f32 %v2152_v19, 0.0 }
 0x137   :  { %v1671_v48 = vld [vmem:[#allocation3 + $0x21] ss:$2 sm:$0xff]  ;;  %v1664_v54 = vmax.f32 %v1659_v46, 0.0  ;;  %v2149_v30 = vld [vmem:[%s3392_s0 + $0x30] ss:$2 sm:$0xff] }
 0x138   :  { %1107 = vst.msk [vmem:[#allocation2 + $0x40] sm:$0xff] %vm573_vm3, %v1103_v31  ;;  %2602 = vmatmul.mubr.msk.f32.gmra.mxu0 %vm573_vm3, %v3222_v21  ;;  %v3245_v37 = vpop.f32.mrf.mxu1  ;;  %v1676_v57 = vmax.f32 %v1671_v48, 0.0  ;;  %v2153_v31 = vld [vmem:[%s3392_s0 + $0x31] ss:$2 sm:$0xff]  ;;  %v1626_v42 = vmax.f32 %v2149_v30, 0.0 }
 0x139   :  { %v1100_v32 = vld [vmem:[#allocation3 + $0x30] sm:$0xff]  ;;  %v1638_v43 = vmax.f32 %v2153_v31, 0.0 }
 0x13a   :  { %v1104_v34 = vmax.f32 %v1100_v32, 0.0  ;;  %v3252_v40 = vpop.f32.mrf.mxu1  ;;  %v1680_v4 = vadd.f32 %v1676_v57, %v1664_v54  ;;  %v2551_v32 = vpop.f32.mrf.mxu0 }
 0x13b   :  { %v3243_v35 = vld [vmem:[#allocation2 + $0x38] sm:$0xff]  ;;  %v1642_v56 = vadd.f32 %v1638_v43, %v1626_v42 }
 0x13c   :  { %1108 = vst.msk [vmem:[#allocation2 + $0x48] sm:$0xff] %vm573_vm3, %v1104_v34  ;;  %2582 = vmatmul.mubr.msk.f32.gmra.mxu1 %vm573_vm3, %v3243_v35  ;;  %2604 = vmatprep.mubr.msk.f32.mxu0 %vm573_vm3, %v3243_v35  ;;  %v2495_v47 = vpop.f32.mrf.mxu1  ;;  %v1684_v11 = vmul.f32 0.5, %v1680_v4  ;;  %v1916_v4 = vld [vmem:[#allocation6 + $0x60] sm:$0xff] }
 0x13d   :  { %v1101_v39 = vld [vmem:[#allocation3 + $0x38] sm:$0xff]  ;;  %v1641_v47 = vadd.f32 %v1637_v29, %v1625_v28 }
 0x13e   :  { %v1105_v41 = vmax.f32 %v1101_v39, 0.0  ;;  %v778_v51 = vpop.f32.mrf.mxu1  ;;  %v1661_v58 = vld [vmem:[#allocation3 + $0x30] ss:$2 sm:$0xff]  ;;  %v1673_v59 = vld [vmem:[#allocation3 + $0x31] ss:$2 sm:$0xff]  ;;  %v1027_v39 = vpop.f32.mrf.mxu0 }
 0x13f   :  { %v3254_v44 = vld [vmem:[#allocation2 + $0x40] sm:$0xff]  ;;  %v1665_v62 = vmax.f32 %v1661_v58, 0.0  ;;  %v1677_v63 = vmax.f32 %v1673_v59, 0.0  ;;  %v1645_v59 = vmul.f32 0.5, %v1641_v47 }
 0x140   :  { %1109 = vst.msk [vmem:[#allocation2 + $0x50] sm:$0xff] %vm573_vm3, %v1105_v41  ;;  %2584 = vmatprep.mubr.msk.f32.mxu1 %vm573_vm3, %v3254_v44  ;;  %2605 = vmatmul.mubr.msk.f32.gmra.mxu0 %vm573_vm3, %v3254_v44  ;;  %v3267_v60 = vpop.f32.mrf.mxu1  ;;  %v2554_v48 = vpop.f32.mrf.mxu0 }
 0x142   :  { %v3271_v1 = vpop.f32.mrf.mxu1  ;;  %v1037_v54 = vpop.f32.mrf.mxu0 }
 0x143   :  { %v3261_v55 = vld [vmem:[#allocation2 + $0x48] sm:$0xff] }
 0x144   :  { %2585 = vmatmul.mubr.msk.f32.gmra.mxu1 %vm573_vm3, %v3261_v55  ;;  %2607 = vmatprep.mubr.msk.f32.mxu0 %vm573_vm3, %v3261_v55  ;;  %v3282_v6 = vpop.f32.mrf.mxu1 }
 0x145   :  { %2618 = vmatprep.mubr.msk.f32.mxu1 %vm573_vm3, %v3193_v8  ;;  %v1681_v8 = vadd.f32 %v1677_v63, %v1665_v62  ;;  %v1646_v62 = vmul.f32 0.5, %v1642_v56  ;;  %v1919_v63 = vld [vmem:[#allocation6 + $0x78] sm:$0xff] }
 0x146   :  { %v3291_v49 = vpop.f32.mrf.mxu1  ;;  %2669 = vmatprep.subr.mxu0 %v1919_v63 }
 0x147   :  { %v3273_v2 = vld [vmem:[#allocation2 + $0x50] sm:$0xff] }
 0x148   :  { %2608 = vmatmul.mubr.msk.f32.gmra.mxu0 %vm573_vm3, %v3273_v2  ;;  %2619 = vmatmul.mubr.msk.f32.vlgmr.msra.gmra.mxu1 %vm573_vm3, %v3205_v16  ;;  %v2151_v16 = vld [vmem:[%s3392_s0 + $0x11] ss:$2 sm:$0xff]  ;;  %v2520_v50 = vpop.f32.mrf.mxu1 }
 0x149   :  { %2621 = vmatprep.mubr.msk.f32.mxu1 %vm573_vm3, %v3220_v20  ;;  %2641 = vmatprep.mubr.msk.f32.mxu0 %vm573_vm3, %v1682_v3  ;;  %v880_v23 = vadd.f32 %v2520_v50, %v3236_v26  ;;  %v1917_v3 = vld [vmem:[#allocation6 + $0x68] sm:$0xff] }
 0x14a   :  { %2648 = vmatpush3.msra.mxu1 %v3207_v17  ;;  %v1685_v17 = vmul.f32 0.5, %v1681_v8  ;;  %v874_v20 = vpop.f32.mrf.mxu1 }
 0x14b   :  { %2649 = vmatprep.subr.mxu1 %v1653_v5  ;;  %v875_v26 = vadd.f32 %v874_v20, %v3241_v33  ;;  %v3324_v34 = vadd.f32 %v2551_v32, %v880_v23 }
 0x14c   :  { %2622 = vmatmul.mubr.msk.f32.gmra.mxu1 %vm573_vm3, %v3217_v27  ;;  %2642 = vmatmul.mubr.msk.f32.vlgmr.msra.gmra.mxu0 %vm573_vm3, %v1683_v7  ;;  %v1636_v27 = vmax.f32 %v2151_v16, 0.0 }
 0x14d   :  { %2644 = vmatprep.mubr.msk.f32.mxu0 %vm573_vm3, %v1684_v11  ;;  %2624 = vmatprep.mubr.msk.f32.mxu1 %vm573_vm3, %v3222_v21  ;;  %v1639_v21 = vadd.f32 %v1635_v14, %v1623_v13 }
 0x14e   :  { %2650 = vmatpush3.msra.mxu1 %v1653_v5  ;;  %v1640_v41 = vadd.f32 %v1636_v27, %v1624_v25  ;;  %2670 = vmatpush3.msra.mxu0 %v1919_v63 }
 0x14f   :  { %2651 = vmatprep.subr.mxu1 %v1652_v12  ;;  %v1643_v46 = vmul.f32 0.5, %v1639_v21 }
 0x150   :  { %2625 = vmatmul.mubr.msk.f32.gmra.mxu1 %vm573_vm3, %v3243_v35  ;;  %2645 = vmatmul.mubr.msk.f32.gmra.mxu0 %vm573_vm3, %v1685_v17  ;;  %v2523_v35 = vpop.f32.mrf.mxu1 }
 0x151   :  { %2627 = vmatprep.mubr.msk.f32.mxu1 %vm573_vm3, %v3254_v44  ;;  %2652 = vmatpush3.msra.mxu1 %v1652_v12  ;;  %v890_v38 = vadd.f32 %v2523_v35, %v3245_v37  ;;  %v3329_v44 = vadd.f32 %v1027_v39, %v875_v26  ;;  %v3346_v35 = vld [vmem:[%s3396_s4] ss:$0 sm:$0xff] }
 0x152   :  { %2653 = vmatprep.subr.mxu1 %v1651_v22  ;;  %v884_v33 = vpop.f32.mrf.mxu1 }
 0x153   :  { %2654 = vmatpush3.msra.mxu1 %v1651_v22  ;;  %v885_v37 = vadd.f32 %v884_v33, %v3252_v40  ;;  %v3334_v51 = vadd.f32 %v2554_v48, %v890_v38  ;;  %v2557_v40 = vpop.f32.mrf.mxu0 }
 0x154   :  { %2628 = vmatmul.mubr.msk.f32.gmra.mxu1 %vm573_vm3, %v3261_v55  ;;  %2655 = vmatprep.subr.mxu1 %v1650_v24  ;;  %v2526_v52 = vpop.f32.mrf.mxu1  ;;  %v1644_v55 = vmul.f32 0.5, %v1640_v41 }
 0x155   :  { %2630 = vmatprep.mubr.msk.f32.mxu1 %vm573_vm3, %v3273_v2  ;;  %2656 = vmatpush3.msra.mxu1 %v1650_v24  ;;  %v1076_v57 = vadd.f32 %v1037_v54, %v885_v37  ;;  %v1047_v61 = vpop.f32.mrf.mxu0  ;;  %v1918_v2 = vld [vmem:[#allocation6 + $0x70] sm:$0xff] }
 0x156   :  { %2657 = vmatprep.subr.mxu1 %v1649_v36  ;;  %v894_v58 = vpop.f32.mrf.mxu1  ;;  %2671 = vmatprep.subr.mxu0 %v1918_v2 }
 0x157   :  { %2658 = vmatpush3.msra.mxu1 %v1649_v36  ;;  %2672 = vmatpush3.msra.mxu0 %v1918_v2  ;;  %v2560_v8 = vpop.f32.mrf.mxu0 }
 0x158   :  { %2631 = vmatmul.mubr.msk.f32.gmra.mxu1 %vm573_vm3, %v1441_v45  ;;  %2659 = vmatprep.subr.mxu1 %v1648_v0  ;;  %v2529_v5 = vpop.f32.mrf.mxu1 }
 0x159   :  { %2660 = vmatpush3.msra.mxu1 %v1648_v0  ;;  %2663 = vmatprep.mubr.msk.f32.mxu1 %vm91_vm0, %v1643_v46  ;;  %v1055_v10 = vpop.f32.mrf.mxu0  ;;  %v908_v41 = vadd.f32 %v2529_v5, %v3267_v60 }
 0x15a   :  { %2661 = vmatprep.subr.mxu1 %v1647_v53  ;;  %2673 = vmatprep.subr.mxu0 %v1917_v3  ;;  %v902_v7 = vpop.f32.mrf.mxu1 }
 0x15b   :  { %2662 = vmatpush3.msra.mxu1 %v1647_v53  ;;  %2674 = vmatpush3.msra.mxu0 %v1917_v3  ;;  %v2563_v12 = vpop.f32.mrf.mxu0  ;;  %v903_v46 = vadd.f32 %v902_v7, %v3271_v1  ;;  %v1079_v60 = vadd.f32 %v2560_v8, %v908_v41 }
 0x15c   :  { %2664 = vmatmul.mubr.msk.f32.vlgmr.msra.gmra.mxu1 %vm91_vm0, %v1644_v55  ;;  %2675 = vmatprep.subr.mxu0 %v1916_v4  ;;  %v2532_v9 = vpop.f32.mrf.mxu1 }
 0x15d   :  { %2666 = vmatprep.mubr.msk.f32.mxu1 %vm91_vm0, %v1645_v59  ;;  %2676 = vmatpush3.msra.mxu0 %v1916_v4  ;;  %v1065_v14 = vpop.f32.mrf.mxu0  ;;  %v1078_v1 = vadd.f32 %v1055_v10, %v903_v46 }
 0x15e   :  { %v912_v11 = vpop.f32.mrf.mxu1 }
 0x15f   :  { %v913_v55 = vadd.f32 %v912_v11, %v3291_v49 }
 0x160   :  { %2667 = vmatmul.mubr.msk.f32.gmra.mxu1 %vm91_vm0, %v1646_v62 }
 0x161   :  { %v1080_v2 = vadd.f32 %v1065_v14, %v913_v55 }
 0x1e8   :  { %v2574_v13 = vpop.f32.mrf.mxu1 }
 0x1e9   :  { %v1264_v29 = vadd.f32 %v2574_v13, %v3324_v34 }
 0x1ea   :  { %v1216_v15 = vpop.f32.mrf.mxu1 }
 0x1eb   :  { %v1263_v31 = vadd.f32 %v1216_v15, %v3329_v44 }
 0x1ec   :  { %v2597_v16 = vpop.f32.mrf.mxu0 }
 0x1ed   :  { %v1425_v26 = vadd.f32 %v2597_v16, %v1264_v29 }
 0x1ee   :  { %v1377_v18 = vpop.f32.mrf.mxu0 }
 0x1ef   :  { %v1424_v36 = vadd.f32 %v1377_v18, %v1263_v31 }
 0x1f0   :  { %v2577_v17 = vpop.f32.mrf.mxu1 }
 0x1f1   :  { %v1266_v38 = vadd.f32 %v2577_v17, %v3334_v51  ;;  %v918_v51 = vadd.f32 %v2532_v9, %v3282_v6 }
 0x1f2   :  { %v1226_v19 = vpop.f32.mrf.mxu1 }
 0x1f3   :  { %v1265_v43 = vadd.f32 %v1226_v19, %v1076_v57  ;;  %v1081_v40 = vadd.f32 %v2563_v12, %v918_v51 }
 0x1f4   :  { %v2600_v50 = vpop.f32.mrf.mxu0 }
 0x1f5   :  { %v2580_v22 = vpop.f32.mrf.mxu1  ;;  %v1427_v33 = vadd.f32 %v2600_v50, %v1266_v38 }
 0x1f6   :  { %v1387_v23 = vpop.f32.mrf.mxu0 }
 0x1f7   :  { %v1236_v24 = vpop.f32.mrf.mxu1  ;;  %v1426_v47 = vadd.f32 %v1387_v23, %v1265_v43 }
 0x1f8   :  { %v2603_v25 = vpop.f32.mrf.mxu0 }
 0x1fa   :  { %v1397_v27 = vpop.f32.mrf.mxu0 }
 0x1fc   :  { %v2583_v20 = vpop.f32.mrf.mxu1 }
 0x1fd   :  { %v1268_v58 = vadd.f32 %v2583_v20, %v1079_v60 }
 0x1fe   :  { %v1244_v21 = vpop.f32.mrf.mxu1 }
 0x1ff   :  { %v1267_v62 = vadd.f32 %v1244_v21, %v1078_v1 }
 0x200   :  { %v2606_v44 = vpop.f32.mrf.mxu0 }
 0x201   :  { %v1429_v63 = vadd.f32 %v2606_v44, %v1268_v58 }
 0x202   :  { %v1405_v56 = vpop.f32.mrf.mxu0 }
 0x203   :  { %v1428_v5 = vadd.f32 %v1405_v56, %v1267_v62 }
 0x204   :  { %v2586_v28 = vpop.f32.mrf.mxu1 }
 0x205   :  { %v1270_v3 = vadd.f32 %v2586_v28, %v1081_v40 }
 0x206   :  { %v1254_v30 = vpop.f32.mrf.mxu1 }
 0x207   :  { %v1269_v7 = vadd.f32 %v1254_v30, %v1080_v2 }
 0x208   :  { %v2620_v32 = vpop.f32.mrf.mxu1  ;;  %v2609_v61 = vpop.f32.mrf.mxu0 }
 0x209   :  { %v1586_v39 = vadd.f32 %v2620_v32, %v1425_v26  ;;  %v1431_v8 = vadd.f32 %v2609_v61, %v1270_v3 }
 0x20a   :  { %v1538_v42 = vpop.f32.mrf.mxu1  ;;  %v1415_v9 = vpop.f32.mrf.mxu0 }
 0x20b   :  { %v1601_v34 = vadd.f32 %v3346_v35, %v1586_v39  ;;  %v1585_v45 = vadd.f32 %v1538_v42, %v1424_v36  ;;  %v1430_v19 = vadd.f32 %v1415_v9, %v1269_v7 }
 0x20c   :  { %v2623_v0 = vpop.f32.mrf.mxu1 }
 0x20d   :  { %1609 = vst.msk [vmem:[#allocation3 + $0x48] sm:$0xff] %vm573_vm3, %v1601_v34  ;;  %v1600_v37 = vadd.f32 %v3346_v35, %v1585_v45  ;;  %v1588_v48 = vadd.f32 %v2623_v0, %v1427_v33  ;;  %v2643_v0 = vpop.f32.mrf.mxu0 }
 0x20e   :  { %v1548_v52 = vpop.f32.mrf.mxu1 }
 0x20f   :  { %1608 = vst.msk [vmem:[#allocation3 + $0x40] sm:$0xff] %vm573_vm3, %v1600_v37  ;;  %v1603_v53 = vadd.f32 %v3346_v35, %v1588_v48  ;;  %v1587_v54 = vadd.f32 %v1548_v52, %v1426_v47  ;;  %v1768_v46 = vpop.f32.mrf.mxu0 }
 0x210   :  { %v2626_v57 = vpop.f32.mrf.mxu1 }
 0x211   :  { %1611 = vst.msk [vmem:[#allocation3 + $0x58] sm:$0xff] %vm573_vm3, %v1603_v53  ;;  %v1602_v59 = vadd.f32 %v3346_v35, %v1587_v54  ;;  %v2646_v47 = vpop.f32.mrf.mxu0  ;;  %v2166_v53 = vld [vmem:[%s3398_s6] ss:$0 sm:$0xff] }
 0x212   :  { %v1558_v6 = vpop.f32.mrf.mxu1 }
 0x213   :  { %1610 = vst.msk [vmem:[#allocation3 + $0x50] sm:$0xff] %vm573_vm3, %v1602_v59  ;;  %v1778_v48 = vpop.f32.mrf.mxu0 }
 0x214   :  { %v2629_v4 = vpop.f32.mrf.mxu1 }
 0x215   :  { %v1590_v49 = vadd.f32 %v2629_v4, %v1429_v63 }
 0x216   :  { %v1566_v10 = vpop.f32.mrf.mxu1  ;;  %v1885_v11 = vld [vmem:[#allocation3 + $0x40] ss:$2 sm:$0xff]  ;;  %v1897_v13 = vld [vmem:[#allocation3 + $0x41] ss:$2 sm:$0xff] }
 0x217   :  { %v1605_v15 = vadd.f32 %v3346_v35, %v1590_v49  ;;  %v1589_v12 = vadd.f32 %v1566_v10, %v1428_v5  ;;  %v1892_v16 = vmax.f32 %v1885_v11, 0.0  ;;  %v1904_v17 = vmax.f32 %v1897_v13, 0.0 }
 0x218   :  { %v2632_v18 = vpop.f32.mrf.mxu1 }
 0x219   :  { %1613 = vst.msk [vmem:[#allocation3 + $0x68] sm:$0xff] %vm573_vm3, %v1605_v15  ;;  %v1604_v14 = vadd.f32 %v3346_v35, %v1589_v12  ;;  %v1592_v50 = vadd.f32 %v2632_v18, %v1431_v8  ;;  %v1908_v22 = vadd.f32 %v1904_v17, %v1892_v16 }
 0x21a   :  { %v1576_v23 = vpop.f32.mrf.mxu1  ;;  %v1887_v24 = vld [vmem:[#allocation3 + $0x50] ss:$2 sm:$0xff]  ;;  %v1899_v25 = vld [vmem:[#allocation3 + $0x51] ss:$2 sm:$0xff] }
 0x21b   :  { %1612 = vst.msk [vmem:[#allocation3 + $0x60] sm:$0xff] %vm573_vm3, %v1604_v14  ;;  %v1607_v27 = vadd.f32 %v3346_v35, %v1592_v50  ;;  %v1591_v20 = vadd.f32 %v1576_v23, %v1430_v19  ;;  %v1912_v21 = vmul.f32 0.5, %v1908_v22  ;;  %v1893_v28 = vmax.f32 %v1887_v24, 0.0 }
 0x21c   :  { %v1905_v29 = vmax.f32 %v1899_v25, 0.0  ;;  %v2665_v37 = vpop.f32.mrf.mxu1 }
 0x21d   :  { %1615 = vst.msk [vmem:[#allocation3 + $0x78] sm:$0xff] %vm573_vm3, %v1607_v27  ;;  %v1606_v30 = vadd.f32 %v3346_v35, %v1591_v20  ;;  %2677 = vmatprep.mubr.msk.f32.mxu0 %vm573_vm3, %v1912_v21  ;;  %v1871_v52 = vadd.f32 %v2665_v37, %v2643_v0 }
 0x21e   :  { %v1909_v31 = vadd.f32 %v1905_v29, %v1893_v28  ;;  %v1865_v51 = vpop.f32.mrf.mxu1 }
 0x21f   :  { %1614 = vst.msk [vmem:[#allocation3 + $0x70] sm:$0xff] %vm573_vm3, %v1606_v30  ;;  %v1866_v54 = vadd.f32 %v1865_v51, %v1768_v46 }
 0x220   :  { %v1913_v26 = vmul.f32 0.5, %v1909_v31  ;;  %v2668_v58 = vpop.f32.mrf.mxu1 }
 0x221   :  { %v1881_v61 = vadd.f32 %v2668_v58, %v2646_v47 }
 0x222   :  { %2678 = vmatmul.mubr.msk.f32.vlgmr.msra.gmra.mxu0 %vm573_vm3, %v1913_v26  ;;  %v1889_v32 = vld [vmem:[#allocation3 + $0x60] ss:$2 sm:$0xff]  ;;  %v1901_v36 = vld [vmem:[#allocation3 + $0x61] ss:$2 sm:$0xff]  ;;  %v1875_v40 = vpop.f32.mrf.mxu1 }
 0x223   :  { %v1894_v38 = vmax.f32 %v1889_v32, 0.0  ;;  %v1906_v39 = vmax.f32 %v1901_v36, 0.0  ;;  %v1876_v62 = vadd.f32 %v1875_v40, %v1778_v48 }
 0x225   :  { %v1910_v41 = vadd.f32 %v1906_v39, %v1894_v38 }
 0x226   :  { %v1891_v42 = vld [vmem:[#allocation3 + $0x70] ss:$2 sm:$0xff]  ;;  %v1903_v43 = vld [vmem:[#allocation3 + $0x71] ss:$2 sm:$0xff] }
 0x227   :  { %v1914_v33 = vmul.f32 0.5, %v1910_v41  ;;  %v1895_v34 = vmax.f32 %v1891_v42, 0.0  ;;  %v1907_v45 = vmax.f32 %v1903_v43, 0.0 }
 0x229   :  { %2680 = vmatprep.mubr.msk.f32.mxu0 %vm573_vm3, %v1914_v33  ;;  %v1911_v35 = vadd.f32 %v1907_v45, %v1895_v34 }
 0x22b   :  { %v1915_v44 = vmul.f32 0.5, %v1911_v35 }
 0x22d   :  { %2681 = vmatmul.mubr.msk.f32.gmra.mxu0 %vm573_vm3, %v1915_v44 }
 0x2e2   :  { %v2679_v60 = vpop.f32.mrf.mxu0 }
 0x2e3   :  { %v2018_v55 = vadd.f32 %v2679_v60, %v1871_v52 }
 0x2e4   :  { %v1998_v56 = vpop.f32.mrf.mxu0 }
 0x2e5   :  { %v2029_v57 = vadd.f32 %v2166_v53, %v2018_v55  ;;  %v2017_v1 = vadd.f32 %v1998_v56, %v1866_v54 }
 0x2e7   :  { %2033 = vst.msk [vmem:[%s3399_s7 + $0x8] sm:$0xff] %vm91_vm0, %v2029_v57  ;;  %v2028_v59 = vadd.f32 %v2166_v53, %v2017_v1 }
 0x2e9   :  { %2032 = vst.msk [vmem:[%s3399_s7] sm:$0xff] %vm91_vm0, %v2028_v59 }
 0x2ed   :  { %v2682_v6 = vpop.f32.mrf.mxu0 }
 0x2ee   :  { %v2020_v63 = vadd.f32 %v2682_v6, %v1881_v61 }
 0x2ef   :  { %v2008_v2 = vpop.f32.mrf.mxu0 }
 0x2f0   :  { %v2031_v3 = vadd.f32 %v2166_v53, %v2020_v63  ;;  %v2019_v4 = vadd.f32 %v2008_v2, %v1876_v62 }
 0x2f2   :  { %2035 = vst.msk [vmem:[%s3399_s7 + $0x18] sm:$0xff] %vm91_vm0, %v2031_v3  ;;  %v2030_v5 = vadd.f32 %v2166_v53, %v2019_v4 }
 0x2f4   :  { %2034 = vst.msk [vmem:[%s3399_s7 + $0x10] sm:$0xff] %vm91_vm0, %v2030_v5 }
 0x2f5   :  { %2040 = vsyncpa [#allocation5], 1 }
 0x2f6   :  { %2041 = vsyncpa [#allocation7], 1 }

// kernel: _lambda_.10
= control target key start
LH: loop header
LB: loop body
LE: loop exit
PB: predicated region body
PF: predicated region fallthrough
CT: control target
= control target key end

     0   :  { %vm40_vm0 = vcmask 385024   ;;  %v636_v3 = vmov 0.0   ;;  %vm45_vm1 = vcmask 388096   ;;  %vm56_vm2 = vcmask 392192   ;;  %s798_s1 = inlined_call_operand.vmem [shape: f32[3,48,32], index: 1, kind: input, shape index: {}]   ;;  %s799_s0 = inlined_call_operand.vmem [shape: f32[8,48], index: 0, kind: input, shape index: {}]   ;;  %s800_s3 = inlined_call_operand.vmem [shape: f32[80,40], index: 3, kind: input, shape index: {}]   ;;  %s801_s2 = inlined_call_operand.vmem [shape: f32[1,32], index: 2, kind: input, shape index: {}]   ;;  %s802_s4 = inlined_call_operand.vmem [shape: f32[1,40], index: 4, kind: input, shape index: {}]   ;;  %s803_s5 = inlined_call_operand.vmem [shape: f32[4,40], index: 5, kind: output, shape index: {}]  }
   0x1   :  { %v509_v0 = vld [vmem:[%s798_s1 + $0x58] sm:$0xff]  ;;  %v25_v1 = vld [vmem:[%s798_s1 + $0x28] sm:$0xff]  ;;  %v508_v2 = vld [vmem:[%s798_s1 + $0x50] sm:$0xff]  ;;  %42 = vst.msk [vmem:[#allocation2 + $0x5] sm:$0x1] %vm40_vm0, %v636_v3  ;;  %vm637_vm3 = vmmov 0  }
   0x2   :  { %47 = vst.msk [vmem:[#allocation2 + $0x6] sm:$0x1] %vm40_vm0, %v636_v3  ;;  %41 = vst.msk [vmem:[#allocation2] sm:$0x1] %vm40_vm0, %v636_v3  ;;  %563 = vmatprep.subr.mxu0 %v509_v0  ;;  %578 = vmatprep.subr.mxu1 %v25_v1  ;;  %v24_v4 = vld [vmem:[%s798_s1 + $0x20] sm:$0xff]  ;;  %v507_v5 = vld [vmem:[%s798_s1 + $0x48] sm:$0xff] }
   0x3   :  { %48 = vst.msk [vmem:[#allocation2 + $0xb] sm:$0x1] %vm40_vm0, %v636_v3  ;;  %564 = vmatpush3.msra.mxu0 %v509_v0  ;;  %579 = vmatpush3.msra.mxu1 %v25_v1  ;;  %v23_v6 = vld [vmem:[%s798_s1 + $0x18] sm:$0xff]  ;;  %v506_v7 = vld [vmem:[%s798_s1 + $0x40] sm:$0xff]  ;;  %v22_v8 = vld [vmem:[%s798_s1 + $0x10] sm:$0xff]  ;;  %vm317_vm4 = vcmask 254976  }
   0x4   :  { %565 = vmatprep.subr.mxu0 %v508_v2  ;;  %580 = vmatprep.subr.mxu1 %v24_v4  ;;  %v43_v9 = vld [vmem:[%s799_s0] sm:$0xf]  ;;  %v49_v10 = vld [vmem:[%s799_s0 + $0x4] sm:$0xf]  ;;  %v505_v13 = vld [vmem:[%s798_s1 + $0x38] sm:$0xff]  ;;  %vm313_vm5 = vcmask 257024  }
   0x5   :  { %566 = vmatpush3.msra.mxu0 %v508_v2  ;;  %581 = vmatpush3.msra.mxu1 %v24_v4  ;;  %v44_v11 = vmax.f32 %v43_v9, 0.0  ;;  %v50_v12 = vmax.f32 %v49_v10, 0.0  ;;  %v21_v14 = vld [vmem:[%s798_s1 + $0x8] sm:$0xff]  ;;  %v504_v15 = vld [vmem:[%s798_s1 + $0x30] sm:$0xff]  ;;  %v20_v16 = vld [vmem:[%s798_s1] sm:$0xff]  ;;  %vm315_vm6 = vcmask 261126  }
   0x6   :  { %567 = vmatprep.subr.mxu0 %v507_v5  ;;  %582 = vmatprep.subr.mxu1 %v23_v6  ;;  %v515_v17 = vld [vmem:[%s798_s1 + $0x88] sm:$0xff]  ;;  %v514_v22 = vld [vmem:[%s798_s1 + $0x80] sm:$0xff]  ;;  %v513_v24 = vld [vmem:[%s798_s1 + $0x78] sm:$0xff]  ;;  %vm343_vm7 = vcmask 261120   ;;  %vm498_vm8 = vcmask 322560  }
   0x7   :  { %568 = vmatpush3.msra.mxu0 %v507_v5  ;;  %583 = vmatpush3.msra.mxu1 %v23_v6  ;;  %46 = vst.msk [vmem:[#allocation2 + $0x1] sm:$0xf] %vm45_vm1, %v44_v11  ;;  %51 = vst.msk [vmem:[#allocation2 + $0x7] sm:$0xf] %vm45_vm1, %v50_v12  ;;  %v512_v25 = vld [vmem:[%s798_s1 + $0x70] sm:$0xff]  ;;  %v511_v26 = vld [vmem:[%s798_s1 + $0x68] sm:$0xff] }
   0x8   :  { %569 = vmatprep.subr.mxu0 %v506_v7  ;;  %584 = vmatprep.subr.mxu1 %v22_v8  ;;  %v510_v27 = vld [vmem:[%s798_s1 + $0x60] sm:$0xff]  ;;  %v342_v29 = vld [vmem:[%s800_s3 + $0x48] sm:$0xff]  ;;  %v340_v31 = vld [vmem:[%s800_s3 + $0x38] sm:$0xff] }
   0x9   :  { %570 = vmatpush3.msra.mxu0 %v506_v7  ;;  %585 = vmatpush3.msra.mxu1 %v22_v8  ;;  %v341_v30 = vld [vmem:[%s800_s3 + $0x40] sm:$0xff]  ;;  %v339_v32 = vld [vmem:[%s800_s3 + $0x30] sm:$0xff]  ;;  %v331_v54 = vld [vmem:[%s800_s3 + $0x28] sm:$0xff] }
   0xa   :  { %571 = vmatprep.subr.mxu0 %v505_v13  ;;  %586 = vmatprep.subr.mxu1 %v21_v14  ;;  %v522_v39 = vld [vmem:[%s801_s2] ss:$0 sm:$0xff]  ;;  %v523_v52 = vld [vmem:[%s799_s0 + $0x1] ss:$2 sm:$0xf]  ;;  %v329_v58 = vld [vmem:[%s800_s3 + $0x18] sm:$0xff] }
   0xb   :  { %572 = vmatpush3.msra.mxu0 %v505_v13  ;;  %587 = vmatpush3.msra.mxu1 %v21_v14  ;;  %v319_v51 = vld [vmem:[%s799_s0] ss:$2 sm:$0xf]  ;;  %v323_v57 = vmax.f32 %v523_v52, 0.0  ;;  %v328_v59 = vld [vmem:[%s800_s3 + $0x10] sm:$0xff]  ;;  %v327_v61 = vld [vmem:[%s800_s3 + $0x8] sm:$0xff] }
   0xc   :  { %573 = vmatprep.subr.mxu0 %v504_v15  ;;  %588 = vmatprep.subr.mxu1 %v20_v16  ;;  %v330_v55 = vld [vmem:[%s800_s3 + $0x20] sm:$0xff]  ;;  %v320_v56 = vmax.f32 %v319_v51, 0.0 }
   0xd   :  { %574 = vmatpush3.msra.mxu0 %v504_v15  ;;  %589 = vmatpush3.msra.mxu1 %v20_v16  ;;  %v326_v62 = vld [vmem:[%s800_s3] sm:$0xff] }
   0xe   :  { %593 = vmatprep.subr.mxu0 %v515_v17  ;;  %608 = vmatprep.subr.mxu1 %v636_v3  ;;  %v54_v18 = vld [vmem:[#allocation2 + $0x1] sm:$0xff]  ;;  %v55_v20 = vld [vmem:[#allocation2 + $0x9] sm:$0x3]  ;;  %v324_v60 = vadd.f32 %v323_v57, %v320_v56  ;;  %v526_v4 = vld [vmem:[%s802_s4] ss:$0 sm:$0xff] }
   0xf   :  { %v52_v19 = vld [vmem:[#allocation2] sm:$0xff]  ;;  %575 = vmatprep.mubr.msk.f32.mxu0 %vm56_vm2, %v54_v18  ;;  %v53_v21 = vld [vmem:[#allocation2 + $0x8] sm:$0x3]  ;;  %v220_v28 = vld [vmem:[#allocation2 + $0xa] sm:$0x3] }
  0x10   :  { %590 = vmatprep.mubr.msk.f32.mxu1 %vm56_vm2, %v52_v19  ;;  %v219_v23 = vld [vmem:[#allocation2 + $0x2] sm:$0xff]  ;;  %576 = vmatmul.mubr.msk.f32.vlgmr.msra.gmra.mxu0 %vm56_vm2, %v55_v20  ;;  %v325_v63 = vmul.f32 0.5, %v324_v60 }
  0x11   :  { %591 = vmatmul.mubr.msk.f32.vlgmr.msra.gmra.mxu1 %vm56_vm2, %v53_v21  ;;  %594 = vmatpush3.msra.mxu0 %v515_v17 }
  0x12   :  { %605 = vmatprep.mubr.msk.f32.mxu0 %vm56_vm2, %v219_v23  ;;  %595 = vmatprep.subr.mxu0 %v514_v22 }
  0x13   :  { %596 = vmatpush3.msra.mxu0 %v514_v22  ;;  %616 = vmatprep.mubr.msk.f32.mxu1 %vm637_vm3, %v636_v3 }
  0x14   :  { %597 = vmatprep.subr.mxu0 %v513_v24  ;;  %609 = vmatpush3.msra.mxu1 %v342_v29 }
  0x15   :  { %598 = vmatpush3.msra.mxu0 %v513_v24  ;;  %610 = vmatprep.subr.mxu1 %v636_v3 }
  0x16   :  { %599 = vmatprep.subr.mxu0 %v512_v25  ;;  %611 = vmatpush3.msra.mxu1 %v341_v30 }
  0x17   :  { %600 = vmatpush3.msra.mxu0 %v512_v25  ;;  %612 = vmatprep.subr.mxu1 %v636_v3 }
  0x18   :  { %601 = vmatprep.subr.mxu0 %v511_v26  ;;  %613 = vmatpush3.msra.mxu1 %v340_v31 }
  0x19   :  { %602 = vmatpush3.msra.mxu0 %v511_v26  ;;  %614 = vmatprep.subr.mxu1 %v636_v3 }
  0x1a   :  { %603 = vmatprep.subr.mxu0 %v510_v27  ;;  %615 = vmatpush3.msra.mxu1 %v339_v32 }
  0x1b   :  { %604 = vmatpush3.msra.mxu0 %v510_v27  ;;  %619 = vmatprep.subr.mxu1 %v636_v3 }
  0x1c   :  { %606 = vmatmul.mubr.msk.f32.vlgmr.msra.gmra.mxu0 %vm56_vm2, %v220_v28 }
  0xd0   :  { %v577_v33 = vpop.f32.mrf.mxu0 }
  0xd1   :  { %v592_v34 = vpop.f32.mrf.mxu1 }
  0xd2   :  { %v129_v35 = vpop.f32.mrf.mxu0  ;;  %v216_v37 = vadd.f32 %v592_v34, %v577_v33 }
  0xd3   :  { %v210_v36 = vpop.f32.mrf.mxu1 }
  0xd4   :  { %v211_v40 = vadd.f32 %v210_v36, %v129_v35 }
  0xdc   :  { %v607_v38 = vpop.f32.mrf.mxu0 }
  0xdd   :  { %v303_v41 = vadd.f32 %v607_v38, %v216_v37 }
  0xde   :  { %v293_v42 = vpop.f32.mrf.mxu0 }
  0xdf   :  { %v312_v43 = vadd.f32 %v522_v39, %v303_v41  ;;  %v302_v44 = vadd.f32 %v293_v42, %v211_v40 }
  0xe1   :  { %318 = vst.msk [vmem:[#allocation3 + $0x6] sm:$0x3] %vm317_vm4, %v312_v43  ;;  %v311_v45 = vadd.f32 %v522_v39, %v302_v44 }
  0xe3   :  { %314 = vst.msk [vmem:[#allocation3] sm:$0xf] %vm313_vm5, %v311_v45 }
  0xe4   :  { %316 = vst.msk [vmem:[#allocation3 - $0x2] sm:$0xc0] %vm315_vm6, %v311_v45 }
  0xeb   :  { %v332_v46 = vld [vmem:[#allocation3] ss:$2 sm:$0xf]  ;;  %v335_v47 = vld [vmem:[#allocation3 + $0x1] ss:$2 sm:$0xf] }
  0xec   :  { %v333_v48 = vmax.f32 %v332_v46, 0.0  ;;  %v336_v49 = vmax.f32 %v335_v47, 0.0 }
  0xee   :  { %v337_v50 = vadd.f32 %v336_v49, %v333_v48 }
  0xf0   :  { %v338_v53 = vmul.f32 0.5, %v337_v50 }
  0xf2   :  { %617 = vmatmul.mubr.msk.f32.vlgmr.msra.gmra.mxu1 %vm343_vm7, %v338_v53 }
  0xf3   :  { %620 = vmatpush3.msra.mxu1 %v331_v54  ;;  %631 = vmatprep.mubr.msk.f32.mxu1 %vm637_vm3, %v636_v3 }
  0xf4   :  { %621 = vmatprep.subr.mxu1 %v636_v3 }
  0xf5   :  { %622 = vmatpush3.msra.mxu1 %v330_v55 }
  0xf6   :  { %623 = vmatprep.subr.mxu1 %v636_v3 }
  0xf7   :  { %624 = vmatpush3.msra.mxu1 %v329_v58 }
  0xf8   :  { %625 = vmatprep.subr.mxu1 %v636_v3 }
  0xf9   :  { %626 = vmatpush3.msra.mxu1 %v328_v59 }
  0xfa   :  { %627 = vmatprep.subr.mxu1 %v636_v3 }
  0xfb   :  { %628 = vmatpush3.msra.mxu1 %v327_v61 }
  0xfc   :  { %629 = vmatprep.subr.mxu1 %v636_v3 }
  0xfd   :  { %630 = vmatpush3.msra.mxu1 %v326_v62 }
  0xfe   :  { %632 = vmatmul.mubr.msk.f32.vlgmr.msra.gmra.mxu1 %vm56_vm2, %v325_v63 }
 0x1b2   :  { %v413_v0 = vpop.f32.mrf.mxu1 }
 0x1b4   :  { %v618_v1 = vpop.f32.mrf.mxu1 }
 0x1be   :  { %v486_v2 = vpop.f32.mrf.mxu1 }
 0x1bf   :  { %v487_v5 = vadd.f32 %v486_v2, %v413_v0 }
 0x1c0   :  { %v633_v6 = vpop.f32.mrf.mxu1 }
 0x1c1   :  { %v497_v7 = vadd.f32 %v526_v4, %v487_v5 }
 0x1c3   :  { %499 = vst.msk [vmem:[%s803_s5] sm:$0xf] %vm498_vm8, %v497_v7 }

// kernel: _lambda_.11
= control target key start
LH: loop header
LB: loop body
LE: loop exit
PB: predicated region body
PF: predicated region fallthrough
CT: control target
= control target key end

     0   :  { %vm16_vm0 = vcmask 320512   ;;  %v187_v1 = vmov 0.0   ;;  %vm188_vm1 = vmmov 0   ;;  %s237_s0 = inlined_call_operand.vmem [shape: f32[4,40], index: 0, kind: input, shape index: {}]   ;;  %s238_s1 = inlined_call_operand.vmem [shape: f32[40,5], index: 1, kind: input, shape index: {}]   ;;  %s239_s2 = inlined_call_operand.vmem [shape: f32[1,5], index: 2, kind: input, shape index: {}]   ;;  %s240_s3 = inlined_call_operand.hbm [shape: f32[2,5], index: 3, kind: output, shape index: {}]  }
   0x1   :  { %v43_v0 = vld [vmem:[%s238_s1 + $0x20] sm:$0xff]  ;;  %149 = vmatprep.subr.mxu0 %v187_v1  ;;  %v42_v2 = vld [vmem:[%s238_s1 + $0x18] sm:$0xff]  ;;  %159 = vmatprep.mubr.msk.f32.mxu0 %vm188_vm1, %v187_v1  ;;  %v41_v6 = vld [vmem:[%s238_s1 + $0x10] sm:$0xff] }
   0x2   :  { %v15_v3 = vld [vmem:[%s237_s0] sm:$0x3]  ;;  %150 = vmatpush3.msra.mxu0 %v43_v0  ;;  %v28_v5 = vld [vmem:[%s237_s0 + $0x2] sm:$0x3] }
   0x3   :  { %v17_v4 = vsel %vm16_vm0, %v15_v3, 0.0  ;;  %151 = vmatprep.subr.mxu0 %v187_v1  ;;  %v29_v8 = vsel %vm16_vm0, %v28_v5, 0.0 }
   0x4   :  { %v18_v7 = vrot.slane %v17_v4, 4 }
   0x5   :  { %8 = vsyncpa [#allocation4], 0  ;;  %152 = vmatpush3.msra.mxu0 %v42_v2  ;;  %v30_v9 = vrot.slane %v29_v8, 4  ;;  %v40_v10 = vld [vmem:[%s238_s1 + $0x8] sm:$0xff]  ;;  %v39_v13 = vld [vmem:[%s238_s1] sm:$0xff]  ;;  %vm26_vm2 = vcmask 319488  }
   0x6   :  { %153 = vmatprep.subr.mxu0 %v187_v1  ;;  %v19_v11 = vadd.f32 %v18_v7, %v17_v4  ;;  %vm51_vm3 = vcmask 326656   ;;  %v141_v25 = vld [vmem:[%s239_s2] ss:$0 sm:$0xff]  ;;  %s189_s26 = smov [#allocation3]   ;;  %vm125_vm4 = vcmask 33792  }
   0x7   :  { %154 = vmatpush3.msra.mxu0 %v41_v6  ;;  %v31_v12 = vadd.f32 %v30_v9, %v29_v8  ;;  %s133_s27 = sshll.u32 %s189_s26, 4  ;;  %s134_s27 = int_to_ptr.vmem [resolvable:$true] %s133_s27 }
   0x8   :  { %155 = vmatprep.subr.mxu0 %v187_v1  ;;  %v20_v14 = vrot.slane %v19_v11, 2  ;;  %s165_s28 = scalar_lea.vmem %s134_s27, 32  ;;  %p170_p1 = scmp.lt.s32.totalorder %s134_s27, %s134_s27 }
   0x9   :  { %156 = vmatpush3.msra.mxu0 %v40_v10  ;;  %v32_v15 = vrot.slane %v31_v12, 2  ;;  %p166_p0 = scmp.ne.s32.totalorder %s134_s27, %s165_s28  ;;  %p171_p2 = scmp.lt.s32.totalorder %s165_s28, %s165_s28 }
   0xa   :  { %157 = vmatprep.subr.mxu0 %v187_v1  ;;  %v21_v16 = vadd.f32 %v20_v14, %v19_v11 }
   0xb   :  { %158 = vmatpush3.msra.mxu0 %v39_v13  ;;  %v33_v17 = vadd.f32 %v32_v15, %v31_v12  ;;  %p172_p3 = por %p171_p2, %p170_p1 }
   0xc   :  { %v22_v18 = vrot.slane %v21_v16, 1 }
   0xd   :  { %v34_v19 = vrot.slane %v33_v17, 1  ;;  %p173_p4 = pnand %p172_p3, %p166_p0 }
   0xe   :  { %v23_v20 = vadd.f32 %v22_v18, %v21_v16 }
   0xf   :  { %v35_v21 = vadd.f32 %v34_v19, %v33_v17 }
  0x10   :  { %v25_v22 = vmul.f32 0.5, %v23_v20 }
  0x11   :  { %v36_v23 = vmul.f32 0.5, %v35_v21 }
  0x12   :  { %27 = vst.msk [vmem:[#allocation2] sm:$0x1] %vm26_vm2, %v25_v22 }
  0x13   :  { %37 = vst.msk [vmem:[#allocation2 + $0x1] sm:$0x1] %vm26_vm2, %v36_v23 }
  0x1a   :  { %v38_v24 = vld [vmem:[#allocation2] sm:$0x3] }
  0x1b   :  { %160 = vmatmul.mubr.msk.f32.vlgmr.msra.gmra.mxu0 %vm51_vm3, %v38_v24 }
  0xdb   :  { %v121_v26 = vpop.f32.mrf.mxu0 }
  0xdc   :  { %v122_v27 = vadd.f32 %v141_v25, %v121_v26 }
  0xdd   :  { %v161_v28 = vpop.f32.mrf.mxu0 }
  0xde   :  { %126 = vst.msk [vmem:[#allocation3] sm:$0x3] %vm125_vm4, %v122_v27 }
  0xdf   :  { %176 = shalt.err (!%p173_p4)
}
  0xe0   :  { %136 = dma.vmem_to_hbm [thread:$0]  %s134_s27, 32, %s240_s3, [#allocation4]  }
  0xe1   :  { %185 = dma.done.wait [#allocation4], 32  }
  0xe2   :  { %186 = vsyncadd [#allocation4], 4294967264 }
  0xe3   :  { %140 = vsyncpa [#allocation4], 1 }

</bundles_post_ra>
